<compile_context>
chip_gen: v6e
topology: v6e:2x2x1
jax: 0.10.0
libtpu: 0.0.40
codegen_flags: <defaults>
</compile_context>

<pallas_src>
import functools

import jax
import jax.numpy as jnp
from jax import lax
from jax.experimental import pallas as pl
from jax.experimental.pallas import tpu as pltpu


# ----------------------------------------------------------------------------
# In-kernel helpers (operate on 2-D (rows, C) f32 values; rows = bb * T)
# ----------------------------------------------------------------------------

def _shift_rows(a, pos, offset, period):
    """result[r] = a[r + offset] if row r+offset stays inside the same
    length-`period` batch element, else 0 (Conv1d zero padding).  `offset` and
    `period` are static Python ints; `pos` is a (rows, 1) int32 within-element
    position.  Uses pltpu.roll (XLU) + a select -- no VMEM concatenate copy."""
    rows = a.shape[0]
    if offset == 0:
        return a
    if abs(offset) >= period:                    # tap falls outside every element
        return jnp.zeros_like(a)
    shifted = pltpu.roll(a, (-offset) % rows, axis=0)
    if offset > 0:
        keep = pos < (period - offset)
    else:
        keep = pos >= (-offset)
    return jnp.where(keep, shifted, 0.0)


def _conv3(a, pos, w_m, w_c, w_p, dilation, period):
    """3-tap dilated conv along rows (taps at -d, 0, +d).  `a` is f32; the
    operands are cast to the weights' (compute) dtype only at the MXU dots,
    which accumulate in f32."""
    cd = w_c.dtype
    acc = jnp.dot(a.astype(cd), w_c, preferred_element_type=jnp.float32)
    if dilation < period:                        # otherwise side taps are all-zero
        a_m = _shift_rows(a, pos, -dilation, period).astype(cd)
        a_p = _shift_rows(a, pos, dilation, period).astype(cd)
        acc = acc + jnp.dot(a_m, w_m, preferred_element_type=jnp.float32)
        acc = acc + jnp.dot(a_p, w_p, preferred_element_type=jnp.float32)
    return acc


# ----------------------------------------------------------------------------
# Fused stage kernel (optional input conv, resblocks, polyphase upsample+conv,
# optional output head), built per static configuration.
# ----------------------------------------------------------------------------

def _make_stage_kernel(*, dilations, period, has_in, has_head):
    def kernel(*refs):
        it = iter(refs)
        x_ref = next(it)
        if has_in:
            wi_ref, bi_ref = next(it), next(it)
        w1_ref, b1_ref, w2_ref, b2_ref = next(it), next(it), next(it), next(it)
        wcc_ref, wcs_ref, bc2_ref = next(it), next(it), next(it)
        if has_head:
            wh1_ref, bh1_ref, wh2_ref, bh2_ref = next(it), next(it), next(it), next(it)
        o_ref = next(it)

        rows = x_ref.shape[0]
        C = w2_ref.shape[-1]
        cd = w2_ref.dtype
        # In-kernel within-element position (blocks hold whole batch elements,
        # so this is grid-step invariant) -- replaces the old HBM pos stream.
        pos = lax.broadcasted_iota(jnp.int32, (rows, 1), 0) % period

        # --- optional fused input conv:  Conv1d(c_in -> C, k=3, pad 1) + ReLU
        if has_in:
            x = x_ref[...].astype(jnp.float32)
            h = _conv3(x, pos, wi_ref[0], wi_ref[1], wi_ref[2], 1, period)
            h = jnp.maximum(h + bi_ref[...], 0.0)
        else:
            h = x_ref[...].astype(jnp.float32)

        # --- Resnet1D: depth x [relu -> dilated conv3 -> relu -> 1x1 -> +res]
        # (static unroll; fine at depth<=3 -- switch to fori_loop if deeper)
        for j, d in enumerate(dilations):
            a = jnp.maximum(h, 0.0)
            acc = _conv3(a, pos, w1_ref[j, 0], w1_ref[j, 1], w1_ref[j, 2], d, period)
            acc = jnp.maximum(acc + b1_ref[j], 0.0)
            res = jnp.dot(acc.astype(cd), w2_ref[j],
                          preferred_element_type=jnp.float32) + b2_ref[j]
            h = h + res

        # --- Upsample(x2, nearest) + Conv1d(k=3, pad 1), polyphase -----------
        #   even = out[2t]   = wc0 @ h[t-1] + (wc1+wc2) @ h[t] + bc
        #   odd  = out[2t+1] = (wc0+wc1) @ h[t] + wc2 @ h[t+1] + bc
        # wcc_ref = [(wc1+wc2) | (wc0+wc1)] : one lane-dense (C, 2C) matmul.
        up = jnp.dot(h.astype(cd), wcc_ref[...],
                     preferred_element_type=jnp.float32) + bc2_ref[...]
        s_m = _shift_rows(h, pos, -1, period).astype(cd)
        s_p = _shift_rows(h, pos, 1, period).astype(cd)
        side = jnp.concatenate(
            [jnp.dot(s_m, wcs_ref[0], preferred_element_type=jnp.float32),
             jnp.dot(s_p, wcs_ref[1], preferred_element_type=jnp.float32)],
            axis=-1)
        up = up + side                                   # (rows, 2C) = [even | odd]

        if not has_head:
            o_ref[...] = up.astype(o_ref.dtype)          # single lane-dense store
            return

        # --- fused output head at 2T resolution, kept in polyphase form ------
        #   u[2t] = even[t], u[2t+1] = odd[t];  conv3 -> ReLU -> conv3(in_emb)
        even = up[:, :C]
        odd = up[:, C:]
        cdh = wh1_ref.dtype
        e_c, od_c = even.astype(cdh), odd.astype(cdh)
        o_m1 = _shift_rows(odd, pos, -1, period).astype(cdh)     # odd[t-1]
        e_p1 = _shift_rows(even, pos, 1, period).astype(cdh)     # even[t+1]
        bh1 = bh1_ref[...]
        y1e = (jnp.dot(o_m1, wh1_ref[0], preferred_element_type=jnp.float32)
               + jnp.dot(e_c, wh1_ref[1], preferred_element_type=jnp.float32)
               + jnp.dot(od_c, wh1_ref[2], preferred_element_type=jnp.float32) + bh1)
        y1o = (jnp.dot(e_c, wh1_ref[0], preferred_element_type=jnp.float32)
               + jnp.dot(od_c, wh1_ref[1], preferred_element_type=jnp.float32)
               + jnp.dot(e_p1, wh1_ref[2], preferred_element_type=jnp.float32) + bh1)
        ae = jnp.maximum(y1e, 0.0)
        ao = jnp.maximum(y1o, 0.0)
        ae_c, ao_c = ae.astype(cdh), ao.astype(cdh)
        ao_m1 = _shift_rows(ao, pos, -1, period).astype(cdh)
        ae_p1 = _shift_rows(ae, pos, 1, period).astype(cdh)
        bh2 = bh2_ref[...]
        y2e = (jnp.dot(ao_m1, wh2_ref[0], preferred_element_type=jnp.float32)
               + jnp.dot(ae_c, wh2_ref[1], preferred_element_type=jnp.float32)
               + jnp.dot(ao_c, wh2_ref[2], preferred_element_type=jnp.float32) + bh2)
        y2o = (jnp.dot(ae_c, wh2_ref[0], preferred_element_type=jnp.float32)
               + jnp.dot(ao_c, wh2_ref[1], preferred_element_type=jnp.float32)
               + jnp.dot(ae_p1, wh2_ref[2], preferred_element_type=jnp.float32) + bh2)
        o_ref[...] = jnp.concatenate([y2e, y2o], axis=-1).astype(o_ref.dtype)

    return kernel


# ----------------------------------------------------------------------------
# pallas_call plumbing
# ----------------------------------------------------------------------------

def _probe_single_buffer_mode():
    """pl.Buffered(1) for constant-index (weight) BlockSpecs if this Pallas
    build supports it (halves resident weight VMEM); None otherwise."""
    try:
        try:
            mode = pl.Buffered(1)
        except TypeError:
            mode = pl.Buffered(buffer_count=1)

        def _k(w_ref, o_ref):
            o_ref[...] = w_ref[...] + 1.0

        fn = pl.pallas_call(
            _k,
            out_shape=jax.ShapeDtypeStruct((16, 128), jnp.float32),
            grid=(2,),
            in_specs=[pl.BlockSpec((8, 128), lambda i: (0, 0), pipeline_mode=mode)],
            out_specs=pl.BlockSpec((8, 128), lambda i: (i, 0)),
        )
        jax.block_until_ready(fn(jnp.zeros((8, 128), jnp.float32)))
        return mode
    except Exception:                 # any failure -> plain double-buffering
        return None


_WEIGHT_BUFFERING = _probe_single_buffer_mode()


@functools.lru_cache(maxsize=None)
def _compiler_params():
    # Raise the scoped-VMEM limit above the 32 MiB default, but stay well
    # inside the chip's physical VMEM (64 MiB on v7x, 128 MiB on v5e/v6e).
    limit = 48 * 1024 * 1024
    try:
        limit = min(int(pltpu.get_tpu_info().vmem_capacity_bytes * 3 // 4),
                    100 * 1024 * 1024)
    except Exception:
        pass
    return pltpu.CompilerParams(dimension_semantics=("parallel",),
                                vmem_limit_bytes=limit)


@functools.lru_cache(maxsize=None)
def _default_row_block_target():
    # ~512 rows keeps C=512 bf16 stages inside v7x's 64 MiB VMEM; chips with
    # 128 MiB (v5e/v6e) get larger blocks to amortize per-grid-step overhead.
    try:
        if pltpu.get_tpu_info().vmem_capacity_bytes > 64 * 1024 * 1024:
            return 1024
    except Exception:
        pass
    return 512


def _row_block_batch(batch, t, target_rows, sublane):
    """How many whole batch elements per row block: prefer sublane-aligned
    blocks and >=2 grid steps (v7x has two TensorCores), then the largest
    block under the row target."""
    divisors = [d for d in range(1, batch + 1) if batch % d == 0]
    cands = [d for d in divisors if d * t <= max(target_rows, t)] or [1]

    def score(d):
        return ((d * t) % sublane == 0, batch // d >= 2, d)

    return max(cands, key=score)


def _act_spec(rows_block, chans):
    return pl.BlockSpec((rows_block, chans), lambda i: (i, 0))


def _full_spec(shape, pipeline_mode=None):
    nd = len(shape)
    idx = lambda i: (0,) * nd
    if pipeline_mode is None:
        return pl.BlockSpec(tuple(shape), idx)
    return pl.BlockSpec(tuple(shape), idx, pipeline_mode=pipeline_mode)


def fused_stage(x2d, stage, *, batch, t, compute_dtype, target_rows,
                conv_in_p=None, head_p=None):
    rows, c_in = x2d.shape
    C = stage["W2"].shape[-1]
    cd = jnp.dtype(compute_dtype)
    sublane = 16 if cd.itemsize == 2 else 8
    bb = _row_block_batch(batch, t, target_rows, sublane)
    rb = bb * t
    wmode = _WEIGHT_BUFFERING

    # Pre-combined polyphase (upsample x2 + conv3) weights: combine in f32,
    # then cast.  wcc: merged even/odd center taps -> one (C, 2C) matmul.
    wc, bc = stage["wc"], stage["bc"]
    wcc = jnp.concatenate([wc[1] + wc[2], wc[0] + wc[1]], axis=-1).astype(cd)  # (C, 2C)
    wcs = jnp.stack([wc[0], wc[2]]).astype(cd)                                 # (2, C, C)
    bc2 = jnp.concatenate([bc, bc], axis=-1)                                   # (1, 2C) f32

    args = [x2d]
    if conv_in_p is not None:
        args += [conv_in_p["w"].astype(cd), conv_in_p["b"]]
    args += [stage["W1"].astype(cd), stage["B1"], stage["W2"].astype(cd),
             stage["B2"], wcc, wcs, bc2]
    if head_p is not None:
        args += [head_p["w1"].astype(cd), head_p["b1"],
                 head_p["w2"].astype(cd), head_p["b2"]]
        c_out = head_p["w2"].shape[-1]
        out_dtype = jnp.float32
    else:
        c_out = C
        out_dtype = compute_dtype

    in_specs = [_act_spec(rb, c_in)]
    in_specs += [_full_spec(a.shape, wmode) for a in args[1:]]

    kernel = _make_stage_kernel(dilations=tuple(stage["dilations"]), period=t,
                                has_in=conv_in_p is not None,
                                has_head=head_p is not None)
    out = pl.pallas_call(
        kernel,
        out_shape=jax.ShapeDtypeStruct((rows, 2 * c_out), out_dtype),
        grid=(rows // rb,),
        in_specs=in_specs,
        out_specs=_act_spec(rb, 2 * c_out),
        compiler_params=_compiler_params(),
    )(*args)
    # Zero-copy contiguous reshape de-interleaves the even/odd phases:
    # (B*T, 2*c_out) -> (B*2T, c_out); rows stay batch-major / time-minor.
    return out.reshape(rows * 2, c_out)


# ----------------------------------------------------------------------------
# Parameter init (deterministic, synthetic) and forward pass
# ----------------------------------------------------------------------------

def init_params(key, *, input_emb_width, output_emb_width, width, down_t, depth,
                dilation_growth_rate=3, kernel_size=3):
    keys = iter(jax.random.split(key, 256))

    def conv_w(c_in, c_out, k):
        scale = 1.0 / jnp.sqrt(float(c_in * k))
        return jax.random.normal(next(keys), (k, c_in, c_out), jnp.float32) * scale

    def bias(c):
        return jax.random.normal(next(keys), (1, c), jnp.float32) * 0.01

    params = {"conv_in": {"w": conv_w(output_emb_width, width, kernel_size),
                          "b": bias(width)},
              "stages": []}
    # Resnet1D dilations 1, g, g^2, ...; reverse_dilation=True reverses them.
    dilations = tuple([dilation_growth_rate ** d for d in range(depth)][::-1])
    for _ in range(down_t):
        w1 = jnp.stack([conv_w(width, width, kernel_size) for _ in range(depth)])
        b1 = jnp.stack([bias(width) for _ in range(depth)])
        w2 = jnp.stack([jax.random.normal(next(keys), (width, width), jnp.float32)
                        / jnp.sqrt(float(width)) for _ in range(depth)])
        b2 = jnp.stack([bias(width) for _ in range(depth)])
        params["stages"].append({"W1": w1, "B1": b1, "W2": w2, "B2": b2,
                                 "wc": conv_w(width, width, 3), "bc": bias(width),
                                 "dilations": dilations})
    params["head"] = {"w1": conv_w(width, width, kernel_size), "b1": bias(width),
                      "w2": conv_w(width, input_emb_width, kernel_size),
                      "b2": bias(input_emb_width)}
    return params


def decoder_forward(x_ncl, params, *, compute_dtype=jnp.bfloat16,
                    row_block_target=None):
    # x_ncl: (B, output_emb_width, T) -- PyTorch NCL layout
    if row_block_target is None:
        row_block_target = _default_row_block_target()
    batch, _, t = x_ncl.shape
    stages = params["stages"]
    assert stages, "down_t must be >= 1"
    x = jnp.transpose(x_ncl, (0, 2, 1)).reshape(batch * t, -1).astype(compute_dtype)
    last = len(stages) - 1
    for i, stage in enumerate(stages):
        x = fused_stage(
            x, stage, batch=batch, t=t, compute_dtype=compute_dtype,
            target_rows=row_block_target,
            conv_in_p=params["conv_in"] if i == 0 else None,
            head_p=params["head"] if i == last else None)
        t *= 2
    out = x.reshape(batch, t, -1).transpose(0, 2, 1)      # back to NCL
    return out.astype(jnp.float32)


# ----------------------------------------------------------------------------
# Pure-JAX reference (lax.conv_general_dilated), for correctness checking
# ----------------------------------------------------------------------------

def reference_forward(x_ncl, params):
    def conv_ref(x, w, b, dilation=1):
        w_oih = jnp.transpose(w, (2, 1, 0))               # (K, Cin, Cout) -> OIH
        pad = dilation * (w.shape[0] - 1) // 2
        y = lax.conv_general_dilated(x, w_oih, window_strides=(1,),
                                     padding=[(pad, pad)], rhs_dilation=(dilation,),
                                     dimension_numbers=("NCH", "OIH", "NCH"))
        return y + b[0][None, :, None]

    x = jnp.maximum(conv_ref(x_ncl, params["conv_in"]["w"], params["conv_in"]["b"]), 0.0)
    for stage in params["stages"]:
        for j, d in enumerate(stage["dilations"]):
            h = jnp.maximum(x, 0.0)
            h = jnp.maximum(conv_ref(h, stage["W1"][j], stage["B1"][j], d), 0.0)
            h = jnp.einsum("bct,cd->bdt", h, stage["W2"][j])
            h = h + stage["B2"][j][0][None, :, None]
            x = x + h
        x = jnp.repeat(x, 2, axis=2)                      # nearest upsample x2
        x = conv_ref(x, stage["wc"], stage["bc"])
    x = jnp.maximum(conv_ref(x, params["head"]["w1"], params["head"]["b1"]), 0.0)
    x = conv_ref(x, params["head"]["w2"], params["head"]["b2"])
    return x


# ----------------------------------------------------------------------------

if __name__ == "__main__":
    key = jax.random.PRNGKey(0)
    pkey, xkey = jax.random.split(key)

    INPUT_EMB_WIDTH = 3      # PyTorch default: 3
    OUTPUT_EMB_WIDTH = 128   # scaled down from 512 (kept lane-dense: >=128)
    WIDTH = 128              # scaled down from 512
    DOWN_T = 2               # scaled down from 3
    DEPTH = 3                # PyTorch default: 3 (dilations 9, 3, 1)
    B, T = 4, 8

    params = init_params(pkey,
                         input_emb_width=INPUT_EMB_WIDTH,
                         output_emb_width=OUTPUT_EMB_WIDTH,
                         width=WIDTH, down_t=DOWN_T, depth=DEPTH,
                         dilation_growth_rate=3, kernel_size=3)
    x = jax.random.normal(xkey, (B, OUTPUT_EMB_WIDTH, T), jnp.float32)   # NCL

    ref = jax.block_until_ready(reference_forward(x, params))

    # f32 compute path (tight check); small row_block_target so the test also
    # exercises multi-step grids and in-block batch boundaries.
    fwd_f32 = jax.jit(lambda inp: decoder_forward(
        inp, params, compute_dtype=jnp.float32, row_block_target=16))
    out = jax.block_until_ready(fwd_f32(x))
    assert out.shape == (B, INPUT_EMB_WIDTH, T * 2 ** DOWN_T), out.shape
    err = float(jnp.max(jnp.abs(out - ref)))
    assert err < 1e-3, f"f32 max abs error vs reference: {err}"

    # bf16 MXU path (production default: bf16 operands, f32 accumulation,
    # auto row-block target / VMEM limit from the chip's VMEM size).
    fwd_bf16 = jax.jit(lambda inp: decoder_forward(
        inp, params, compute_dtype=jnp.bfloat16))
    out_bf16 = jax.block_until_ready(fwd_bf16(x))
    rel = float(jnp.max(jnp.abs(out_bf16 - ref)) / (jnp.max(jnp.abs(ref)) + 1e-6))
    assert rel < 0.1, f"bf16 relative error vs reference: {rel}"

    print("KERNEL_OK")
</pallas_src>

<mosaic_0001>
module attributes {stable_mosaic.version = 11 : i64} {
  func.func @_k(%arg0: i32, %arg1: memref<8x128xf32, #tpu.memory_space<vmem>>, %arg2: memref<8x128xf32, #tpu.memory_space<vmem>>) attributes {dimension_semantics = [#tpu.dimension_semantics<arbitrary>], iteration_bounds = array<i64: 2>, scalar_prefetch = 0 : i64, scratch_operands = 0 : i64, tpu.core_type = #tpu.core_type<tc>, window_params = [{pipeline_mode = #tpu.pipeline_mode<synchronous>, transform_indices = @transform_0, window_bounds = array<i64: 8, 128>}, {transform_indices = @transform_1, window_bounds = array<i64: 8, 128>}]} {
    %c0 = arith.constant 0 : index
    %c0_0 = arith.constant 0 : index
    %0 = vector.load %arg1[%c0, %c0_0] : memref<8x128xf32, #tpu.memory_space<vmem>>, vector<8x128xf32>
    %cst = arith.constant 1.000000e+00 : f32
    %1 = vector.broadcast %cst : f32 to vector<8x128xf32>
    %2 = arith.addf %0, %1 : vector<8x128xf32>
    %c0_1 = arith.constant 0 : index
    %c0_2 = arith.constant 0 : index
    %3 = vector.load %arg2[%c0_1, %c0_2] : memref<8x128xf32, #tpu.memory_space<vmem>>, vector<8x128xf32>
    tpu.vector_store %arg2[%c0_1, %c0_2], %2 {strides = array<i32>} : memref<8x128xf32, #tpu.memory_space<vmem>>, vector<8x128xf32>,
    return
  }
  func.func @transform_0(%arg0: i32) -> (i32, i32) {
    %c0_i32 = arith.constant 0 : i32
    %c0_i32_0 = arith.constant 0 : i32
    %c0_i32_1 = arith.constant 0 : i32
    return %c0_i32, %c0_i32_0 : i32, i32
  }
  func.func @transform_1(%arg0: i32) -> (i32, i32) {
    %c0_i32 = arith.constant 0 : i32
    %c0_i32_0 = arith.constant 0 : i32
    return %arg0, %c0_i32 : i32, i32
  }
}

module attributes {stable_mosaic.version = 11 : i64} {
  func.func @kernel(%arg0: i32, %arg1: memref<16x128xf32, #tpu.memory_space<vmem>>, %arg2: memref<3x128x128xf32, #tpu.memory_space<vmem>>, %arg3: memref<1x128xf32, #tpu.memory_space<vmem>>, %arg4: memref<3x3x128x128xf32, #tpu.memory_space<vmem>>, %arg5: memref<3x1x128xf32, #tpu.memory_space<vmem>>, %arg6: memref<3x128x128xf32, #tpu.memory_space<vmem>>, %arg7: memref<3x1x128xf32, #tpu.memory_space<vmem>>, %arg8: memref<128x256xf32, #tpu.memory_space<vmem>>, %arg9: memref<2x128x128xf32, #tpu.memory_space<vmem>>, %arg10: memref<1x256xf32, #tpu.memory_space<vmem>>, %arg11: memref<16x256xf32, #tpu.memory_space<vmem>>) attributes {dimension_semantics = [#tpu.dimension_semantics<parallel>], iteration_bounds = array<i64: 2>, scalar_prefetch = 0 : i64, scratch_operands = 0 : i64, tpu.core_type = #tpu.core_type<tc>, window_params = [{transform_indices = @transform_0, window_bounds = array<i64: 16, 128>}, {pipeline_mode = #tpu.pipeline_mode<synchronous>, transform_indices = @transform_1, window_bounds = array<i64: 3, 128, 128>}, {pipeline_mode = #tpu.pipeline_mode<synchronous>, transform_indices = @transform_2, window_bounds = array<i64: 1, 128>}, {pipeline_mode = #tpu.pipeline_mode<synchronous>, transform_indices = @transform_3, window_bounds = array<i64: 3, 3, 128, 128>}, {pipeline_mode = #tpu.pipeline_mode<synchronous>, transform_indices = @transform_4, window_bounds = array<i64: 3, 1, 128>}, {pipeline_mode = #tpu.pipeline_mode<synchronous>, transform_indices = @transform_5, window_bounds = array<i64: 3, 128, 128>}, {pipeline_mode = #tpu.pipeline_mode<synchronous>, transform_indices = @transform_6, window_bounds = array<i64: 3, 1, 128>}, {pipeline_mode = #tpu.pipeline_mode<synchronous>, transform_indices = @transform_7, window_bounds = array<i64: 128, 256>}, {pipeline_mode = #tpu.pipeline_mode<synchronous>, transform_indices = @transform_8, window_bounds = array<i64: 2, 128, 128>}, {pipeline_mode = #tpu.pipeline_mode<synchronous>, transform_indices = @transform_9, window_bounds = array<i64: 1, 256>}, {transform_indices = @transform_10, window_bounds = array<i64: 16, 256>}]} {
    %0 = tpu.iota {dimensions = array<i32: 0>} : vector<16x1xi32>
    %c8_i32 = arith.constant 8 : i32
    %c0_i32 = arith.constant 0 : i32
    %1 = arith.cmpi eq, %c8_i32, %c0_i32 : i32
    %c1_i32 = arith.constant 1 : i32
    %2 = arith.select %1, %c1_i32, %c8_i32 : i32
    %3 = vector.broadcast %2 : i32 to vector<16x1xi32>
    %4 = arith.remsi %0, %3 : vector<16x1xi32>
    %c0_i32_0 = arith.constant 0 : i32
    %5 = vector.broadcast %c0_i32_0 : i32 to vector<16x1xi32>
    %6 = arith.cmpi ne, %4, %5 : vector<16x1xi32>
    %c0_i32_1 = arith.constant 0 : i32
    %7 = vector.broadcast %c0_i32_1 : i32 to vector<16x1xi32>
    %8 = arith.cmpi slt, %4, %7 : vector<16x1xi32>
    %c0_i32_2 = arith.constant 0 : i32
    %9 = arith.cmpi slt, %2, %c0_i32_2 : i32
    %10 = vector.broadcast %9 : i1 to vector<16x1xi1>
    %11 = vector.broadcast %10 : vector<16x1xi1> to vector<16x1xi1>
    %12 = arith.xori %8, %11 : vector<16x1xi1>
    %13 = arith.andi %12, %6 : vector<16x1xi1>
    %14 = vector.broadcast %2 : i32 to vector<16x1xi32>
    %15 = arith.addi %4, %14 : vector<16x1xi32>
    %16 = arith.select %13, %15, %4 : vector<16x1xi1>, vector<16x1xi32>
    %c0 = arith.constant 0 : index
    %c0_3 = arith.constant 0 : index
    %17 = vector.load %arg1[%c0, %c0_3] : memref<16x128xf32, #tpu.memory_space<vmem>>, vector<16x128xf32>
    %c0_4 = arith.constant 0 : index
    %c0_5 = arith.constant 0 : index
    %c0_6 = arith.constant 0 : index
    %18 = vector.load %arg2[%c0_4, %c0_5, %c0_6] : memref<3x128x128xf32, #tpu.memory_space<vmem>>, vector<1x128x128xf32>
    %19 = vector.shape_cast %18 : vector<1x128x128xf32> to vector<128x128xf32>
    %c1 = arith.constant 1 : index
    %c0_7 = arith.constant 0 : index
    %c0_8 = arith.constant 0 : index
    %20 = vector.load %arg2[%c1, %c0_7, %c0_8] : memref<3x128x128xf32, #tpu.memory_space<vmem>>, vector<1x128x128xf32>
    %21 = vector.shape_cast %20 : vector<1x128x128xf32> to vector<128x128xf32>
    %c2 = arith.constant 2 : index
    %c0_9 = arith.constant 0 : index
    %c0_10 = arith.constant 0 : index
    %22 = vector.load %arg2[%c2, %c0_9, %c0_10] : memref<3x128x128xf32, #tpu.memory_space<vmem>>, vector<1x128x128xf32>
    %23 = vector.shape_cast %22 : vector<1x128x128xf32> to vector<128x128xf32>
    %cst = arith.constant dense<0.000000e+00> : vector<16x128xf32>
    %24 = tpu.matmul %17, %21, %cst {dimension_numbers = #tpu.dot_dimension_numbers<[1], [0], [0], [1], [0, 0, 1, 1], [], []>} : vector<16x128xf32>, vector<128x128xf32>, vector<16x128xf32> -> vector<16x128xf32>
    %c1_i32_11 = arith.constant 1 : i32
    %25 = tpu.dynamic_rotate %17 by %c1_i32_11 dim 0 : vector<16x128xf32>, i32 -> vector<16x128xf32>
    %c1_i32_12 = arith.constant 1 : i32
    %26 = vector.broadcast %c1_i32_12 : i32 to vector<16x1xi32>
    %27 = arith.cmpi sge, %16, %26 : vector<16x1xi32>
    %cst_13 = arith.constant 0.000000e+00 : f32
    %28 = vector.shape_cast %27 : vector<16x1xi1> to vector<16x1xi1>
    %29 = vector.broadcast %28 : vector<16x1xi1> to vector<16x128xi1>
    %30 = vector.broadcast %cst_13 : f32 to vector<16x128xf32>
    %31 = arith.select %29, %25, %30 : vector<16x128xi1>, vector<16x128xf32>
    %c15_i32 = arith.constant 15 : i32
    %32 = tpu.dynamic_rotate %17 by %c15_i32 dim 0 : vector<16x128xf32>, i32 -> vector<16x128xf32>
    %c7_i32 = arith.constant 7 : i32
    %33 = vector.broadcast %c7_i32 : i32 to vector<16x1xi32>
    %34 = arith.cmpi slt, %16, %33 : vector<16x1xi32>
    %cst_14 = arith.constant 0.000000e+00 : f32
    %35 = vector.shape_cast %34 : vector<16x1xi1> to vector<16x1xi1>
    %36 = vector.broadcast %35 : vector<16x1xi1> to vector<16x128xi1>
    %37 = vector.broadcast %cst_14 : f32 to vector<16x128xf32>
    %38 = arith.select %36, %32, %37 : vector<16x128xi1>, vector<16x128xf32>
    %cst_15 = arith.constant dense<0.000000e+00> : vector<16x128xf32>
    %39 = tpu.matmul %31, %19, %cst_15 {dimension_numbers = #tpu.dot_dimension_numbers<[1], [0], [0], [1], [0, 0, 1, 1], [], []>} : vector<16x128xf32>, vector<128x128xf32>, vector<16x128xf32> -> vector<16x128xf32>
    %40 = arith.addf %24, %39 : vector<16x128xf32>
    %cst_16 = arith.constant dense<0.000000e+00> : vector<16x128xf32>
    %41 = tpu.matmul %38, %23, %cst_16 {dimension_numbers = #tpu.dot_dimension_numbers<[1], [0], [0], [1], [0, 0, 1, 1], [], []>} : vector<16x128xf32>, vector<128x128xf32>, vector<16x128xf32> -> vector<16x128xf32>
    %42 = arith.addf %40, %41 : vector<16x128xf32>
    %c0_17 = arith.constant 0 : index
    %c0_18 = arith.constant 0 : index
    %43 = vector.load %arg3[%c0_17, %c0_18] : memref<1x128xf32, #tpu.memory_space<vmem>>, vector<1x128xf32>
    %44 = vector.broadcast %43 : vector<1x128xf32> to vector<16x128xf32>
    %45 = arith.addf %42, %44 : vector<16x128xf32>
    %cst_19 = arith.constant 0.000000e+00 : f32
    %46 = vector.broadcast %cst_19 : f32 to vector<16x128xf32>
    %47 = arith.maximumf %45, %46 : vector<16x128xf32>
    %cst_20 = arith.constant 0.000000e+00 : f32
    %48 = vector.broadcast %cst_20 : f32 to vector<16x128xf32>
    %49 = arith.maximumf %47, %48 : vector<16x128xf32>
    %c0_21 = arith.constant 0 : index
    %c1_22 = arith.constant 1 : index
    %c0_23 = arith.constant 0 : index
    %c0_24 = arith.constant 0 : index
    %50 = vector.load %arg4[%c0_21, %c1_22, %c0_23, %c0_24] : memref<3x3x128x128xf32, #tpu.memory_space<vmem>>, vector<1x1x128x128xf32>
    %51 = vector.shape_cast %50 : vector<1x1x128x128xf32> to vector<128x128xf32>
    %cst_25 = arith.constant dense<0.000000e+00> : vector<16x128xf32>
    %52 = tpu.matmul %49, %51, %cst_25 {dimension_numbers = #tpu.dot_dimension_numbers<[1], [0], [0], [1], [0, 0, 1, 1], [], []>} : vector<16x128xf32>, vector<128x128xf32>, vector<16x128xf32> -> vector<16x128xf32>
    %c0_26 = arith.constant 0 : index
    %c0_27 = arith.constant 0 : index
    %c0_28 = arith.constant 0 : index
    %53 = vector.load %arg5[%c0_26, %c0_27, %c0_28] : memref<3x1x128xf32, #tpu.memory_space<vmem>>, vector<1x1x128xf32>
    %54 = vector.shape_cast %53 : vector<1x1x128xf32> to vector<1x128xf32>
    %55 = vector.broadcast %54 : vector<1x128xf32> to vector<16x128xf32>
    %56 = arith.addf %52, %55 : vector<16x128xf32>
    %cst_29 = arith.constant 0.000000e+00 : f32
    %57 = vector.broadcast %cst_29 : f32 to vector<16x128xf32>
    %58 = arith.maximumf %56, %57 : vector<16x128xf32>
    %c0_30 = arith.constant 0 : index
    %c0_31 = arith.constant 0 : index
    %c0_32 = arith.constant 0 : index
    %59 = vector.load %arg6[%c0_30, %c0_31, %c0_32] : memref<3x128x128xf32, #tpu.memory_space<vmem>>, vector<1x128x128xf32>
    %60 = vector.shape_cast %59 : vector<1x128x128xf32> to vector<128x128xf32>
    %cst_33 = arith.constant dense<0.000000e+00> : vector<16x128xf32>
    %61 = tpu.matmul %58, %60, %cst_33 {dimension_numbers = #tpu.dot_dimension_numbers<[1], [0], [0], [1], [0, 0, 1, 1], [], []>} : vector<16x128xf32>, vector<128x128xf32>, vector<16x128xf32> -> vector<16x128xf32>
    %c0_34 = arith.constant 0 : index
    %c0_35 = arith.constant 0 : index
    %c0_36 = arith.constant 0 : index
    %62 = vector.load %arg7[%c0_34, %c0_35, %c0_36] : memref<3x1x128xf32, #tpu.memory_space<vmem>>, vector<1x1x128xf32>
    %63 = vector.shape_cast %62 : vector<1x1x128xf32> to vector<1x128xf32>
    %64 = vector.broadcast %63 : vector<1x128xf32> to vector<16x128xf32>
    %65 = arith.addf %61, %64 : vector<16x128xf32>
    %66 = arith.addf %47, %65 : vector<16x128xf32>
    %cst_37 = arith.constant 0.000000e+00 : f32
    %67 = vector.broadcast %cst_37 : f32 to vector<16x128xf32>
    %68 = arith.maximumf %66, %67 : vector<16x128xf32>
    %c1_38 = arith.constant 1 : index
    %c0_39 = arith.constant 0 : index
    %c0_40 = arith.constant 0 : index
    %c0_41 = arith.constant 0 : index
    %69 = vector.load %arg4[%c1_38, %c0_39, %c0_40, %c0_41] : memref<3x3x128x128xf32, #tpu.memory_space<vmem>>, vector<1x1x128x128xf32>
    %70 = vector.shape_cast %69 : vector<1x1x128x128xf32> to vector<128x128xf32>
    %c1_42 = arith.constant 1 : index
    %c1_43 = arith.constant 1 : index
    %c0_44 = arith.constant 0 : index
    %c0_45 = arith.constant 0 : index
    %71 = vector.load %arg4[%c1_42, %c1_43, %c0_44, %c0_45] : memref<3x3x128x128xf32, #tpu.memory_space<vmem>>, vector<1x1x128x128xf32>
    %72 = vector.shape_cast %71 : vector<1x1x128x128xf32> to vector<128x128xf32>
    %c1_46 = arith.constant 1 : index
    %c2_47 = arith.constant 2 : index
    %c0_48 = arith.constant 0 : index
    %c0_49 = arith.constant 0 : index
    %73 = vector.load %arg4[%c1_46, %c2_47, %c0_48, %c0_49] : memref<3x3x128x128xf32, #tpu.memory_space<vmem>>, vector<1x1x128x128xf32>
    %74 = vector.shape_cast %73 : vector<1x1x128x128xf32> to vector<128x128xf32>
    %cst_50 = arith.constant dense<0.000000e+00> : vector<16x128xf32>
    %75 = tpu.matmul %68, %72, %cst_50 {dimension_numbers = #tpu.dot_dimension_numbers<[1], [0], [0], [1], [0, 0, 1, 1], [], []>} : vector<16x128xf32>, vector<128x128xf32>, vector<16x128xf32> -> vector<16x128xf32>
    %c3_i32 = arith.constant 3 : i32
    %76 = tpu.dynamic_rotate %68 by %c3_i32 dim 0 : vector<16x128xf32>, i32 -> vector<16x128xf32>
    %c3_i32_51 = arith.constant 3 : i32
    %77 = vector.broadcast %c3_i32_51 : i32 to vector<16x1xi32>
    %78 = arith.cmpi sge, %16, %77 : vector<16x1xi32>
    %cst_52 = arith.constant 0.000000e+00 : f32
    %79 = vector.shape_cast %78 : vector<16x1xi1> to vector<16x1xi1>
    %80 = vector.broadcast %79 : vector<16x1xi1> to vector<16x128xi1>
    %81 = vector.broadcast %cst_52 : f32 to vector<16x128xf32>
    %82 = arith.select %80, %76, %81 : vector<16x128xi1>, vector<16x128xf32>
    %c13_i32 = arith.constant 13 : i32
    %83 = tpu.dynamic_rotate %68 by %c13_i32 dim 0 : vector<16x128xf32>, i32 -> vector<16x128xf32>
    %c5_i32 = arith.constant 5 : i32
    %84 = vector.broadcast %c5_i32 : i32 to vector<16x1xi32>
    %85 = arith.cmpi slt, %16, %84 : vector<16x1xi32>
    %cst_53 = arith.constant 0.000000e+00 : f32
    %86 = vector.shape_cast %85 : vector<16x1xi1> to vector<16x1xi1>
    %87 = vector.broadcast %86 : vector<16x1xi1> to vector<16x128xi1>
    %88 = vector.broadcast %cst_53 : f32 to vector<16x128xf32>
    %89 = arith.select %87, %83, %88 : vector<16x128xi1>, vector<16x128xf32>
    %cst_54 = arith.constant dense<0.000000e+00> : vector<16x128xf32>
    %90 = tpu.matmul %82, %70, %cst_54 {dimension_numbers = #tpu.dot_dimension_numbers<[1], [0], [0], [1], [0, 0, 1, 1], [], []>} : vector<16x128xf32>, vector<128x128xf32>, vector<16x128xf32> -> vector<16x128xf32>
    %91 = arith.addf %75, %90 : vector<16x128xf32>
    %cst_55 = arith.constant dense<0.000000e+00> : vector<16x128xf32>
    %92 = tpu.matmul %89, %74, %cst_55 {dimension_numbers = #tpu.dot_dimension_numbers<[1], [0], [0], [1], [0, 0, 1, 1], [], []>} : vector<16x128xf32>, vector<128x128xf32>, vector<16x128xf32> -> vector<16x128xf32>
    %93 = arith.addf %91, %92 : vector<16x128xf32>
    %c1_56 = arith.constant 1 : index
    %c0_57 = arith.constant 0 : index
    %c0_58 = arith.constant 0 : index
    %94 = vector.load %arg5[%c1_56, %c0_57, %c0_58] : memref<3x1x128xf32, #tpu.memory_space<vmem>>, vector<1x1x128xf32>
    %95 = vector.shape_cast %94 : vector<1x1x128xf32> to vector<1x128xf32>
    %96 = vector.broadcast %95 : vector<1x128xf32> to vector<16x128xf32>
    %97 = arith.addf %93, %96 : vector<16x128xf32>
    %cst_59 = arith.constant 0.000000e+00 : f32
    %98 = vector.broadcast %cst_59 : f32 to vector<16x128xf32>
    %99 = arith.maximumf %97, %98 : vector<16x128xf32>
    %c1_60 = arith.constant 1 : index
    %c0_61 = arith.constant 0 : index
    %c0_62 = arith.constant 0 : index
    %100 = vector.load %arg6[%c1_60, %c0_61, %c0_62] : memref<3x128x128xf32, #tpu.memory_space<vmem>>, vector<1x128x128xf32>
    %101 = vector.shape_cast %100 : vector<1x128x128xf32> to vector<128x128xf32>
    %cst_63 = arith.constant dense<0.000000e+00> : vector<16x128xf32>
    %102 = tpu.matmul %99, %101, %cst_63 {dimension_numbers = #tpu.dot_dimension_numbers<[1], [0], [0], [1], [0, 0, 1, 1], [], []>} : vector<16x128xf32>, vector<128x128xf32>, vector<16x128xf32> -> vector<16x128xf32>
    %c1_64 = arith.constant 1 : index
    %c0_65 = arith.constant 0 : index
    %c0_66 = arith.constant 0 : index
    %103 = vector.load %arg7[%c1_64, %c0_65, %c0_66] : memref<3x1x128xf32, #tpu.memory_space<vmem>>, vector<1x1x128xf32>
    %104 = vector.shape_cast %103 : vector<1x1x128xf32> to vector<1x128xf32>
    %105 = vector.broadcast %104 : vector<1x128xf32> to vector<16x128xf32>
    %106 = arith.addf %102, %105 : vector<16x128xf32>
    %107 = arith.addf %66, %106 : vector<16x128xf32>
    %cst_67 = arith.constant 0.000000e+00 : f32
    %108 = vector.broadcast %cst_67 : f32 to vector<16x128xf32>
    %109 = arith.maximumf %107, %108 : vector<16x128xf32>
    %c2_68 = arith.constant 2 : index
    %c0_69 = arith.constant 0 : index
    %c0_70 = arith.constant 0 : index
    %c0_71 = arith.constant 0 : index
    %110 = vector.load %arg4[%c2_68, %c0_69, %c0_70, %c0_71] : memref<3x3x128x128xf32, #tpu.memory_space<vmem>>, vector<1x1x128x128xf32>
    %111 = vector.shape_cast %110 : vector<1x1x128x128xf32> to vector<128x128xf32>
    %c2_72 = arith.constant 2 : index
    %c1_73 = arith.constant 1 : index
    %c0_74 = arith.constant 0 : index
    %c0_75 = arith.constant 0 : index
    %112 = vector.load %arg4[%c2_72, %c1_73, %c0_74, %c0_75] : memref<3x3x128x128xf32, #tpu.memory_space<vmem>>, vector<1x1x128x128xf32>
    %113 = vector.shape_cast %112 : vector<1x1x128x128xf32> to vector<128x128xf32>
    %c2_76 = arith.constant 2 : index
    %c2_77 = arith.constant 2 : index
    %c0_78 = arith.constant 0 : index
    %c0_79 = arith.constant 0 : index
    %114 = vector.load %arg4[%c2_76, %c2_77, %c0_78, %c0_79] : memref<3x3x128x128xf32, #tpu.memory_space<vmem>>, vector<1x1x128x128xf32>
    %115 = vector.shape_cast %114 : vector<1x1x128x128xf32> to vector<128x128xf32>
    %cst_80 = arith.constant dense<0.000000e+00> : vector<16x128xf32>
    %116 = tpu.matmul %109, %113, %cst_80 {dimension_numbers = #tpu.dot_dimension_numbers<[1], [0], [0], [1], [0, 0, 1, 1], [], []>} : vector<16x128xf32>, vector<128x128xf32>, vector<16x128xf32> -> vector<16x128xf32>
    %c1_i32_81 = arith.constant 1 : i32
    %117 = tpu.dynamic_rotate %109 by %c1_i32_81 dim 0 : vector<16x128xf32>, i32 -> vector<16x128xf32>
    %c1_i32_82 = arith.constant 1 : i32
    %118 = vector.broadcast %c1_i32_82 : i32 to vector<16x1xi32>
    %119 = arith.cmpi sge, %16, %118 : vector<16x1xi32>
    %cst_83 = arith.constant 0.000000e+00 : f32
    %120 = vector.shape_cast %119 : vector<16x1xi1> to vector<16x1xi1>
    %121 = vector.broadcast %120 : vector<16x1xi1> to vector<16x128xi1>
    %122 = vector.broadcast %cst_83 : f32 to vector<16x128xf32>
    %123 = arith.select %121, %117, %122 : vector<16x128xi1>, vector<16x128xf32>
    %c15_i32_84 = arith.constant 15 : i32
    %124 = tpu.dynamic_rotate %109 by %c15_i32_84 dim 0 : vector<16x128xf32>, i32 -> vector<16x128xf32>
    %c7_i32_85 = arith.constant 7 : i32
    %125 = vector.broadcast %c7_i32_85 : i32 to vector<16x1xi32>
    %126 = arith.cmpi slt, %16, %125 : vector<16x1xi32>
    %cst_86 = arith.constant 0.000000e+00 : f32
    %127 = vector.shape_cast %126 : vector<16x1xi1> to vector<16x1xi1>
    %128 = vector.broadcast %127 : vector<16x1xi1> to vector<16x128xi1>
    %129 = vector.broadcast %cst_86 : f32 to vector<16x128xf32>
    %130 = arith.select %128, %124, %129 : vector<16x128xi1>, vector<16x128xf32>
    %cst_87 = arith.constant dense<0.000000e+00> : vector<16x128xf32>
    %131 = tpu.matmul %123, %111, %cst_87 {dimension_numbers = #tpu.dot_dimension_numbers<[1], [0], [0], [1], [0, 0, 1, 1], [], []>} : vector<16x128xf32>, vector<128x128xf32>, vector<16x128xf32> -> vector<16x128xf32>
    %132 = arith.addf %116, %131 : vector<16x128xf32>
    %cst_88 = arith.constant dense<0.000000e+00> : vector<16x128xf32>
    %133 = tpu.matmul %130, %115, %cst_88 {dimension_numbers = #tpu.dot_dimension_numbers<[1], [0], [0], [1], [0, 0, 1, 1], [], []>} : vector<16x128xf32>, vector<128x128xf32>, vector<16x128xf32> -> vector<16x128xf32>
    %134 = arith.addf %132, %133 : vector<16x128xf32>
    %c2_89 = arith.constant 2 : index
    %c0_90 = arith.constant 0 : index
    %c0_91 = arith.constant 0 : index
    %135 = vector.load %arg5[%c2_89, %c0_90, %c0_91] : memref<3x1x128xf32, #tpu.memory_space<vmem>>, vector<1x1x128xf32>
    %136 = vector.shape_cast %135 : vector<1x1x128xf32> to vector<1x128xf32>
    %137 = vector.broadcast %136 : vector<1x128xf32> to vector<16x128xf32>
    %138 = arith.addf %134, %137 : vector<16x128xf32>
    %cst_92 = arith.constant 0.000000e+00 : f32
    %139 = vector.broadcast %cst_92 : f32 to vector<16x128xf32>
    %140 = arith.maximumf %138, %139 : vector<16x128xf32>
    %c2_93 = arith.constant 2 : index
    %c0_94 = arith.constant 0 : index
    %c0_95 = arith.constant 0 : index
    %141 = vector.load %arg6[%c2_93, %c0_94, %c0_95] : memref<3x128x128xf32, #tpu.memory_space<vmem>>, vector<1x128x128xf32>
    %142 = vector.shape_cast %141 : vector<1x128x128xf32> to vector<128x128xf32>
    %cst_96 = arith.constant dense<0.000000e+00> : vector<16x128xf32>
    %143 = tpu.matmul %140, %142, %cst_96 {dimension_numbers = #tpu.dot_dimension_numbers<[1], [0], [0], [1], [0, 0, 1, 1], [], []>} : vector<16x128xf32>, vector<128x128xf32>, vector<16x128xf32> -> vector<16x128xf32>
    %c2_97 = arith.constant 2 : index
    %c0_98 = arith.constant 0 : index
    %c0_99 = arith.constant 0 : index
    %144 = vector.load %arg7[%c2_97, %c0_98, %c0_99] : memref<3x1x128xf32, #tpu.memory_space<vmem>>, vector<1x1x128xf32>
    %145 = vector.shape_cast %144 : vector<1x1x128xf32> to vector<1x128xf32>
    %146 = vector.broadcast %145 : vector<1x128xf32> to vector<16x128xf32>
    %147 = arith.addf %143, %146 : vector<16x128xf32>
    %148 = arith.addf %107, %147 : vector<16x128xf32>
    %c0_100 = arith.constant 0 : index
    %c0_101 = arith.constant 0 : index
    %149 = vector.load %arg8[%c0_100, %c0_101] : memref<128x256xf32, #tpu.memory_space<vmem>>, vector<128x256xf32>
    %cst_102 = arith.constant dense<0.000000e+00> : vector<16x256xf32>
    %150 = tpu.matmul %148, %149, %cst_102 {dimension_numbers = #tpu.dot_dimension_numbers<[1], [0], [0], [1], [0, 0, 1, 1], [], []>} : vector<16x128xf32>, vector<128x256xf32>, vector<16x256xf32> -> vector<16x256xf32>
    %c0_103 = arith.constant 0 : index
    %c0_104 = arith.constant 0 : index
    %151 = vector.load %arg10[%c0_103, %c0_104] : memref<1x256xf32, #tpu.memory_space<vmem>>, vector<1x256xf32>
    %152 = vector.broadcast %151 : vector<1x256xf32> to vector<16x256xf32>
    %153 = arith.addf %150, %152 : vector<16x256xf32>
    %c1_i32_105 = arith.constant 1 : i32
    %154 = tpu.dynamic_rotate %148 by %c1_i32_105 dim 0 : vector<16x128xf32>, i32 -> vector<16x128xf32>
    %c1_i32_106 = arith.constant 1 : i32
    %155 = vector.broadcast %c1_i32_106 : i32 to vector<16x1xi32>
    %156 = arith.cmpi sge, %16, %155 : vector<16x1xi32>
    %cst_107 = arith.constant 0.000000e+00 : f32
    %157 = vector.shape_cast %156 : vector<16x1xi1> to vector<16x1xi1>
    %158 = vector.broadcast %157 : vector<16x1xi1> to vector<16x128xi1>
    %159 = vector.broadcast %cst_107 : f32 to vector<16x128xf32>
    %160 = arith.select %158, %154, %159 : vector<16x128xi1>, vector<16x128xf32>
    %c15_i32_108 = arith.constant 15 : i32
    %161 = tpu.dynamic_rotate %148 by %c15_i32_108 dim 0 : vector<16x128xf32>, i32 -> vector<16x128xf32>
    %c7_i32_109 = arith.constant 7 : i32
    %162 = vector.broadcast %c7_i32_109 : i32 to vector<16x1xi32>
    %163 = arith.cmpi slt, %16, %162 : vector<16x1xi32>
    %cst_110 = arith.constant 0.000000e+00 : f32
    %164 = vector.shape_cast %163 : vector<16x1xi1> to vector<16x1xi1>
    %165 = vector.broadcast %164 : vector<16x1xi1> to vector<16x128xi1>
    %166 = vector.broadcast %cst_110 : f32 to vector<16x128xf32>
    %167 = arith.select %165, %161, %166 : vector<16x128xi1>, vector<16x128xf32>
    %c0_111 = arith.constant 0 : index
    %c0_112 = arith.constant 0 : index
    %c0_113 = arith.constant 0 : index
    %168 = vector.load %arg9[%c0_111, %c0_112, %c0_113] : memref<2x128x128xf32, #tpu.memory_space<vmem>>, vector<1x128x128xf32>
    %169 = vector.shape_cast %168 : vector<1x128x128xf32> to vector<128x128xf32>
    %cst_114 = arith.constant dense<0.000000e+00> : vector<16x128xf32>
    %170 = tpu.matmul %160, %169, %cst_114 {dimension_numbers = #tpu.dot_dimension_numbers<[1], [0], [0], [1], [0, 0, 1, 1], [], []>} : vector<16x128xf32>, vector<128x128xf32>, vector<16x128xf32> -> vector<16x128xf32>
    %c1_115 = arith.constant 1 : index
    %c0_116 = arith.constant 0 : index
    %c0_117 = arith.constant 0 : index
    %171 = vector.load %arg9[%c1_115, %c0_116, %c0_117] : memref<2x128x128xf32, #tpu.memory_space<vmem>>, vector<1x128x128xf32>
    %172 = vector.shape_cast %171 : vector<1x128x128xf32> to vector<128x128xf32>
    %cst_118 = arith.constant dense<0.000000e+00> : vector<16x128xf32>
    %173 = tpu.matmul %167, %172, %cst_118 {dimension_numbers = #tpu.dot_dimension_numbers<[1], [0], [0], [1], [0, 0, 1, 1], [], []>} : vector<16x128xf32>, vector<128x128xf32>, vector<16x128xf32> -> vector<16x128xf32>
    %174 = tpu.concatenate %170, %173 in 1 : vector<16x128xf32>, vector<16x128xf32> -> vector<16x256xf32>
    %175 = arith.addf %153, %174 : vector<16x256xf32>
    %c0_119 = arith.constant 0 : index
    %c0_120 = arith.constant 0 : index
    %176 = vector.load %arg11[%c0_119, %c0_120] : memref<16x256xf32, #tpu.memory_space<vmem>>, vector<16x256xf32>
    tpu.vector_store %arg11[%c0_119, %c0_120], %175 {strides = array<i32>} : memref<16x256xf32, #tpu.memory_space<vmem>>, vector<16x256xf32>,
    return
  }
  func.func @transform_0(%arg0: i32) -> (i32, i32) {
    %c0_i32 = arith.constant 0 : i32
    %c0_i32_0 = arith.constant 0 : i32
    return %arg0, %c0_i32 : i32, i32
  }
  func.func @transform_1(%arg0: i32) -> (i32, i32, i32) {
    %c0_i32 = arith.constant 0 : i32
    %c0_i32_0 = arith.constant 0 : i32
    %c0_i32_1 = arith.constant 0 : i32
    %c0_i32_2 = arith.constant 0 : i32
    return %c0_i32, %c0_i32_0, %c0_i32_1 : i32, i32, i32
  }
  func.func @transform_2(%arg0: i32) -> (i32, i32) {
    %c0_i32 = arith.constant 0 : i32
    %c0_i32_0 = arith.constant 0 : i32
    %c0_i32_1 = arith.constant 0 : i32
    return %c0_i32, %c0_i32_0 : i32, i32
  }
  func.func @transform_3(%arg0: i32) -> (i32, i32, i32, i32) {
    %c0_i32 = arith.constant 0 : i32
    %c0_i32_0 = arith.constant 0 : i32
    %c0_i32_1 = arith.constant 0 : i32
    %c0_i32_2 = arith.constant 0 : i32
    %c0_i32_3 = arith.constant 0 : i32
    return %c0_i32, %c0_i32_0, %c0_i32_1, %c0_i32_2 : i32, i32, i32, i32
  }
  func.func @transform_4(%arg0: i32) -> (i32, i32, i32) {
    %c0_i32 = arith.constant 0 : i32
    %c0_i32_0 = arith.constant 0 : i32
    %c0_i32_1 = arith.constant 0 : i32
    %c0_i32_2 = arith.constant 0 : i32
    return %c0_i32, %c0_i32_0, %c0_i32_1 : i32, i32, i32
  }
  func.func @transform_5(%arg0: i32) -> (i32, i32, i32) {
    %c0_i32 = arith.constant 0 : i32
    %c0_i32_0 = arith.constant 0 : i32
    %c0_i32_1 = arith.constant 0 : i32
    %c0_i32_2 = arith.constant 0 : i32
    return %c0_i32, %c0_i32_0, %c0_i32_1 : i32, i32, i32
  }
  func.func @transform_6(%arg0: i32) -> (i32, i32, i32) {
    %c0_i32 = arith.constant 0 : i32
    %c0_i32_0 = arith.constant 0 : i32
    %c0_i32_1 = arith.constant 0 : i32
    %c0_i32_2 = arith.constant 0 : i32
    return %c0_i32, %c0_i32_0, %c0_i32_1 : i32, i32, i32
  }
  func.func @transform_7(%arg0: i32) -> (i32, i32) {
    %c0_i32 = arith.constant 0 : i32
    %c0_i32_0 = arith.constant 0 : i32
    %c0_i32_1 = arith.constant 0 : i32
    return %c0_i32, %c0_i32_0 : i32, i32
  }
  func.func @transform_8(%arg0: i32) -> (i32, i32, i32) {
    %c0_i32 = arith.constant 0 : i32
    %c0_i32_0 = arith.constant 0 : i32
    %c0_i32_1 = arith.constant 0 : i32
    %c0_i32_2 = arith.constant 0 : i32
    return %c0_i32, %c0_i32_0, %c0_i32_1 : i32, i32, i32
  }
  func.func @transform_9(%arg0: i32) -> (i32, i32) {
    %c0_i32 = arith.constant 0 : i32
    %c0_i32_0 = arith.constant 0 : i32
    %c0_i32_1 = arith.constant 0 : i32
    return %c0_i32, %c0_i32_0 : i32, i32
  }
  func.func @transform_10(%arg0: i32) -> (i32, i32) {
    %c0_i32 = arith.constant 0 : i32
    %c0_i32_0 = arith.constant 0 : i32
    return %arg0, %c0_i32 : i32, i32
  }
}

module attributes {stable_mosaic.version = 11 : i64} {
  func.func @kernel(%arg0: i32, %arg1: memref<16x128xf32, #tpu.memory_space<vmem>>, %arg2: memref<3x3x128x128xf32, #tpu.memory_space<vmem>>, %arg3: memref<3x1x128xf32, #tpu.memory_space<vmem>>, %arg4: memref<3x128x128xf32, #tpu.memory_space<vmem>>, %arg5: memref<3x1x128xf32, #tpu.memory_space<vmem>>, %arg6: memref<128x256xf32, #tpu.memory_space<vmem>>, %arg7: memref<2x128x128xf32, #tpu.memory_space<vmem>>, %arg8: memref<1x256xf32, #tpu.memory_space<vmem>>, %arg9: memref<3x128x128xf32, #tpu.memory_space<vmem>>, %arg10: memref<1x128xf32, #tpu.memory_space<vmem>>, %arg11: memref<3x128x3xf32, #tpu.memory_space<vmem>>, %arg12: memref<1x3xf32, #tpu.memory_space<vmem>>, %arg13: memref<16x6xf32, #tpu.memory_space<vmem>>) attributes {dimension_semantics = [#tpu.dimension_semantics<parallel>], iteration_bounds = array<i64: 4>, scalar_prefetch = 0 : i64, scratch_operands = 0 : i64, tpu.core_type = #tpu.core_type<tc>, window_params = [{transform_indices = @transform_0, window_bounds = array<i64: 16, 128>}, {pipeline_mode = #tpu.pipeline_mode<synchronous>, transform_indices = @transform_1, window_bounds = array<i64: 3, 3, 128, 128>}, {pipeline_mode = #tpu.pipeline_mode<synchronous>, transform_indices = @transform_2, window_bounds = array<i64: 3, 1, 128>}, {pipeline_mode = #tpu.pipeline_mode<synchronous>, transform_indices = @transform_3, window_bounds = array<i64: 3, 128, 128>}, {pipeline_mode = #tpu.pipeline_mode<synchronous>, transform_indices = @transform_4, window_bounds = array<i64: 3, 1, 128>}, {pipeline_mode = #tpu.pipeline_mode<synchronous>, transform_indices = @transform_5, window_bounds = array<i64: 128, 256>}, {pipeline_mode = #tpu.pipeline_mode<synchronous>, transform_indices = @transform_6, window_bounds = array<i64: 2, 128, 128>}, {pipeline_mode = #tpu.pipeline_mode<synchronous>, transform_indices = @transform_7, window_bounds = array<i64: 1, 256>}, {pipeline_mode = #tpu.pipeline_mode<synchronous>, transform_indices = @transform_8, window_bounds = array<i64: 3, 128, 128>}, {pipeline_mode = #tpu.pipeline_mode<synchronous>, transform_indices = @transform_9, window_bounds = array<i64: 1, 128>}, {pipeline_mode = #tpu.pipeline_mode<synchronous>, transform_indices = @transform_10, window_bounds = array<i64: 3, 128, 3>}, {pipeline_mode = #tpu.pipeline_mode<synchronous>, transform_indices = @transform_11, window_bounds = array<i64: 1, 3>}, {transform_indices = @transform_12, window_bounds = array<i64: 16, 6>}]} {
    %0 = tpu.iota {dimensions = array<i32: 0>} : vector<16x1xi32>
    %c16_i32 = arith.constant 16 : i32
    %c0_i32 = arith.constant 0 : i32
    %1 = arith.cmpi eq, %c16_i32, %c0_i32 : i32
    %c1_i32 = arith.constant 1 : i32
    %2 = arith.select %1, %c1_i32, %c16_i32 : i32
    %3 = vector.broadcast %2 : i32 to vector<16x1xi32>
    %4 = arith.remsi %0, %3 : vector<16x1xi32>
    %c0_i32_0 = arith.constant 0 : i32
    %5 = vector.broadcast %c0_i32_0 : i32 to vector<16x1xi32>
    %6 = arith.cmpi ne, %4, %5 : vector<16x1xi32>
    %c0_i32_1 = arith.constant 0 : i32
    %7 = vector.broadcast %c0_i32_1 : i32 to vector<16x1xi32>
    %8 = arith.cmpi slt, %4, %7 : vector<16x1xi32>
    %c0_i32_2 = arith.constant 0 : i32
    %9 = arith.cmpi slt, %2, %c0_i32_2 : i32
    %10 = vector.broadcast %9 : i1 to vector<16x1xi1>
    %11 = vector.broadcast %10 : vector<16x1xi1> to vector<16x1xi1>
    %12 = arith.xori %8, %11 : vector<16x1xi1>
    %13 = arith.andi %12, %6 : vector<16x1xi1>
    %14 = vector.broadcast %2 : i32 to vector<16x1xi32>
    %15 = arith.addi %4, %14 : vector<16x1xi32>
    %16 = arith.select %13, %15, %4 : vector<16x1xi1>, vector<16x1xi32>
    %c0 = arith.constant 0 : index
    %c0_3 = arith.constant 0 : index
    %17 = vector.load %arg1[%c0, %c0_3] : memref<16x128xf32, #tpu.memory_space<vmem>>, vector<16x128xf32>
    %cst = arith.constant 0.000000e+00 : f32
    %18 = vector.broadcast %cst : f32 to vector<16x128xf32>
    %19 = arith.maximumf %17, %18 : vector<16x128xf32>
    %c0_4 = arith.constant 0 : index
    %c0_5 = arith.constant 0 : index
    %c0_6 = arith.constant 0 : index
    %c0_7 = arith.constant 0 : index
    %20 = vector.load %arg2[%c0_4, %c0_5, %c0_6, %c0_7] : memref<3x3x128x128xf32, #tpu.memory_space<vmem>>, vector<1x1x128x128xf32>
    %21 = vector.shape_cast %20 : vector<1x1x128x128xf32> to vector<128x128xf32>
    %c0_8 = arith.constant 0 : index
    %c1 = arith.constant 1 : index
    %c0_9 = arith.constant 0 : index
    %c0_10 = arith.constant 0 : index
    %22 = vector.load %arg2[%c0_8, %c1, %c0_9, %c0_10] : memref<3x3x128x128xf32, #tpu.memory_space<vmem>>, vector<1x1x128x128xf32>
    %23 = vector.shape_cast %22 : vector<1x1x128x128xf32> to vector<128x128xf32>
    %c0_11 = arith.constant 0 : index
    %c2 = arith.constant 2 : index
    %c0_12 = arith.constant 0 : index
    %c0_13 = arith.constant 0 : index
    %24 = vector.load %arg2[%c0_11, %c2, %c0_12, %c0_13] : memref<3x3x128x128xf32, #tpu.memory_space<vmem>>, vector<1x1x128x128xf32>
    %25 = vector.shape_cast %24 : vector<1x1x128x128xf32> to vector<128x128xf32>
    %cst_14 = arith.constant dense<0.000000e+00> : vector<16x128xf32>
    %26 = tpu.matmul %19, %23, %cst_14 {dimension_numbers = #tpu.dot_dimension_numbers<[1], [0], [0], [1], [0, 0, 1, 1], [], []>} : vector<16x128xf32>, vector<128x128xf32>, vector<16x128xf32> -> vector<16x128xf32>
    %c9_i32 = arith.constant 9 : i32
    %27 = tpu.dynamic_rotate %19 by %c9_i32 dim 0 : vector<16x128xf32>, i32 -> vector<16x128xf32>
    %c9_i32_15 = arith.constant 9 : i32
    %28 = vector.broadcast %c9_i32_15 : i32 to vector<16x1xi32>
    %29 = arith.cmpi sge, %16, %28 : vector<16x1xi32>
    %cst_16 = arith.constant 0.000000e+00 : f32
    %30 = vector.shape_cast %29 : vector<16x1xi1> to vector<16x1xi1>
    %31 = vector.broadcast %30 : vector<16x1xi1> to vector<16x128xi1>
    %32 = vector.broadcast %cst_16 : f32 to vector<16x128xf32>
    %33 = arith.select %31, %27, %32 : vector<16x128xi1>, vector<16x128xf32>
    %c7_i32 = arith.constant 7 : i32
    %34 = tpu.dynamic_rotate %19 by %c7_i32 dim 0 : vector<16x128xf32>, i32 -> vector<16x128xf32>
    %c7_i32_17 = arith.constant 7 : i32
    %35 = vector.broadcast %c7_i32_17 : i32 to vector<16x1xi32>
    %36 = arith.cmpi slt, %16, %35 : vector<16x1xi32>
    %cst_18 = arith.constant 0.000000e+00 : f32
    %37 = vector.shape_cast %36 : vector<16x1xi1> to vector<16x1xi1>
    %38 = vector.broadcast %37 : vector<16x1xi1> to vector<16x128xi1>
    %39 = vector.broadcast %cst_18 : f32 to vector<16x128xf32>
    %40 = arith.select %38, %34, %39 : vector<16x128xi1>, vector<16x128xf32>
    %cst_19 = arith.constant dense<0.000000e+00> : vector<16x128xf32>
    %41 = tpu.matmul %33, %21, %cst_19 {dimension_numbers = #tpu.dot_dimension_numbers<[1], [0], [0], [1], [0, 0, 1, 1], [], []>} : vector<16x128xf32>, vector<128x128xf32>, vector<16x128xf32> -> vector<16x128xf32>
    %42 = arith.addf %26, %41 : vector<16x128xf32>
    %cst_20 = arith.constant dense<0.000000e+00> : vector<16x128xf32>
    %43 = tpu.matmul %40, %25, %cst_20 {dimension_numbers = #tpu.dot_dimension_numbers<[1], [0], [0], [1], [0, 0, 1, 1], [], []>} : vector<16x128xf32>, vector<128x128xf32>, vector<16x128xf32> -> vector<16x128xf32>
    %44 = arith.addf %42, %43 : vector<16x128xf32>
    %c0_21 = arith.constant 0 : index
    %c0_22 = arith.constant 0 : index
    %c0_23 = arith.constant 0 : index
    %45 = vector.load %arg3[%c0_21, %c0_22, %c0_23] : memref<3x1x128xf32, #tpu.memory_space<vmem>>, vector<1x1x128xf32>
    %46 = vector.shape_cast %45 : vector<1x1x128xf32> to vector<1x128xf32>
    %47 = vector.broadcast %46 : vector<1x128xf32> to vector<16x128xf32>
    %48 = arith.addf %44, %47 : vector<16x128xf32>
    %cst_24 = arith.constant 0.000000e+00 : f32
    %49 = vector.broadcast %cst_24 : f32 to vector<16x128xf32>
    %50 = arith.maximumf %48, %49 : vector<16x128xf32>
    %c0_25 = arith.constant 0 : index
    %c0_26 = arith.constant 0 : index
    %c0_27 = arith.constant 0 : index
    %51 = vector.load %arg4[%c0_25, %c0_26, %c0_27] : memref<3x128x128xf32, #tpu.memory_space<vmem>>, vector<1x128x128xf32>
    %52 = vector.shape_cast %51 : vector<1x128x128xf32> to vector<128x128xf32>
    %cst_28 = arith.constant dense<0.000000e+00> : vector<16x128xf32>
    %53 = tpu.matmul %50, %52, %cst_28 {dimension_numbers = #tpu.dot_dimension_numbers<[1], [0], [0], [1], [0, 0, 1, 1], [], []>} : vector<16x128xf32>, vector<128x128xf32>, vector<16x128xf32> -> vector<16x128xf32>
    %c0_29 = arith.constant 0 : index
    %c0_30 = arith.constant 0 : index
    %c0_31 = arith.constant 0 : index
    %54 = vector.load %arg5[%c0_29, %c0_30, %c0_31] : memref<3x1x128xf32, #tpu.memory_space<vmem>>, vector<1x1x128xf32>
    %55 = vector.shape_cast %54 : vector<1x1x128xf32> to vector<1x128xf32>
    %56 = vector.broadcast %55 : vector<1x128xf32> to vector<16x128xf32>
    %57 = arith.addf %53, %56 : vector<16x128xf32>
    %58 = arith.addf %17, %57 : vector<16x128xf32>
    %cst_32 = arith.constant 0.000000e+00 : f32
    %59 = vector.broadcast %cst_32 : f32 to vector<16x128xf32>
    %60 = arith.maximumf %58, %59 : vector<16x128xf32>
    %c1_33 = arith.constant 1 : index
    %c0_34 = arith.constant 0 : index
    %c0_35 = arith.constant 0 : index
    %c0_36 = arith.constant 0 : index
    %61 = vector.load %arg2[%c1_33, %c0_34, %c0_35, %c0_36] : memref<3x3x128x128xf32, #tpu.memory_space<vmem>>, vector<1x1x128x128xf32>
    %62 = vector.shape_cast %61 : vector<1x1x128x128xf32> to vector<128x128xf32>
    %c1_37 = arith.constant 1 : index
    %c1_38 = arith.constant 1 : index
    %c0_39 = arith.constant 0 : index
    %c0_40 = arith.constant 0 : index
    %63 = vector.load %arg2[%c1_37, %c1_38, %c0_39, %c0_40] : memref<3x3x128x128xf32, #tpu.memory_space<vmem>>, vector<1x1x128x128xf32>
    %64 = vector.shape_cast %63 : vector<1x1x128x128xf32> to vector<128x128xf32>
    %c1_41 = arith.constant 1 : index
    %c2_42 = arith.constant 2 : index
    %c0_43 = arith.constant 0 : index
    %c0_44 = arith.constant 0 : index
    %65 = vector.load %arg2[%c1_41, %c2_42, %c0_43, %c0_44] : memref<3x3x128x128xf32, #tpu.memory_space<vmem>>, vector<1x1x128x128xf32>
    %66 = vector.shape_cast %65 : vector<1x1x128x128xf32> to vector<128x128xf32>
    %cst_45 = arith.constant dense<0.000000e+00> : vector<16x128xf32>
    %67 = tpu.matmul %60, %64, %cst_45 {dimension_numbers = #tpu.dot_dimension_numbers<[1], [0], [0], [1], [0, 0, 1, 1], [], []>} : vector<16x128xf32>, vector<128x128xf32>, vector<16x128xf32> -> vector<16x128xf32>
    %c3_i32 = arith.constant 3 : i32
    %68 = tpu.dynamic_rotate %60 by %c3_i32 dim 0 : vector<16x128xf32>, i32 -> vector<16x128xf32>
    %c3_i32_46 = arith.constant 3 : i32
    %69 = vector.broadcast %c3_i32_46 : i32 to vector<16x1xi32>
    %70 = arith.cmpi sge, %16, %69 : vector<16x1xi32>
    %cst_47 = arith.constant 0.000000e+00 : f32
    %71 = vector.shape_cast %70 : vector<16x1xi1> to vector<16x1xi1>
    %72 = vector.broadcast %71 : vector<16x1xi1> to vector<16x128xi1>
    %73 = vector.broadcast %cst_47 : f32 to vector<16x128xf32>
    %74 = arith.select %72, %68, %73 : vector<16x128xi1>, vector<16x128xf32>
    %c13_i32 = arith.constant 13 : i32
    %75 = tpu.dynamic_rotate %60 by %c13_i32 dim 0 : vector<16x128xf32>, i32 -> vector<16x128xf32>
    %c13_i32_48 = arith.constant 13 : i32
    %76 = vector.broadcast %c13_i32_48 : i32 to vector<16x1xi32>
    %77 = arith.cmpi slt, %16, %76 : vector<16x1xi32>
    %cst_49 = arith.constant 0.000000e+00 : f32
    %78 = vector.shape_cast %77 : vector<16x1xi1> to vector<16x1xi1>
    %79 = vector.broadcast %78 : vector<16x1xi1> to vector<16x128xi1>
    %80 = vector.broadcast %cst_49 : f32 to vector<16x128xf32>
    %81 = arith.select %79, %75, %80 : vector<16x128xi1>, vector<16x128xf32>
    %cst_50 = arith.constant dense<0.000000e+00> : vector<16x128xf32>
    %82 = tpu.matmul %74, %62, %cst_50 {dimension_numbers = #tpu.dot_dimension_numbers<[1], [0], [0], [1], [0, 0, 1, 1], [], []>} : vector<16x128xf32>, vector<128x128xf32>, vector<16x128xf32> -> vector<16x128xf32>
    %83 = arith.addf %67, %82 : vector<16x128xf32>
    %cst_51 = arith.constant dense<0.000000e+00> : vector<16x128xf32>
    %84 = tpu.matmul %81, %66, %cst_51 {dimension_numbers = #tpu.dot_dimension_numbers<[1], [0], [0], [1], [0, 0, 1, 1], [], []>} : vector<16x128xf32>, vector<128x128xf32>, vector<16x128xf32> -> vector<16x128xf32>
    %85 = arith.addf %83, %84 : vector<16x128xf32>
    %c1_52 = arith.constant 1 : index
    %c0_53 = arith.constant 0 : index
    %c0_54 = arith.constant 0 : index
    %86 = vector.load %arg3[%c1_52, %c0_53, %c0_54] : memref<3x1x128xf32, #tpu.memory_space<vmem>>, vector<1x1x128xf32>
    %87 = vector.shape_cast %86 : vector<1x1x128xf32> to vector<1x128xf32>
    %88 = vector.broadcast %87 : vector<1x128xf32> to vector<16x128xf32>
    %89 = arith.addf %85, %88 : vector<16x128xf32>
    %cst_55 = arith.constant 0.000000e+00 : f32
    %90 = vector.broadcast %cst_55 : f32 to vector<16x128xf32>
    %91 = arith.maximumf %89, %90 : vector<16x128xf32>
    %c1_56 = arith.constant 1 : index
    %c0_57 = arith.constant 0 : index
    %c0_58 = arith.constant 0 : index
    %92 = vector.load %arg4[%c1_56, %c0_57, %c0_58] : memref<3x128x128xf32, #tpu.memory_space<vmem>>, vector<1x128x128xf32>
    %93 = vector.shape_cast %92 : vector<1x128x128xf32> to vector<128x128xf32>
    %cst_59 = arith.constant dense<0.000000e+00> : vector<16x128xf32>
    %94 = tpu.matmul %91, %93, %cst_59 {dimension_numbers = #tpu.dot_dimension_numbers<[1], [0], [0], [1], [0, 0, 1, 1], [], []>} : vector<16x128xf32>, vector<128x128xf32>, vector<16x128xf32> -> vector<16x128xf32>
    %c1_60 = arith.constant 1 : index
    %c0_61 = arith.constant 0 : index
    %c0_62 = arith.constant 0 : index
    %95 = vector.load %arg5[%c1_60, %c0_61, %c0_62] : memref<3x1x128xf32, #tpu.memory_space<vmem>>, vector<1x1x128xf32>
    %96 = vector.shape_cast %95 : vector<1x1x128xf32> to vector<1x128xf32>
    %97 = vector.broadcast %96 : vector<1x128xf32> to vector<16x128xf32>
    %98 = arith.addf %94, %97 : vector<16x128xf32>
    %99 = arith.addf %58, %98 : vector<16x128xf32>
    %cst_63 = arith.constant 0.000000e+00 : f32
    %100 = vector.broadcast %cst_63 : f32 to vector<16x128xf32>
    %101 = arith.maximumf %99, %100 : vector<16x128xf32>
    %c2_64 = arith.constant 2 : index
    %c0_65 = arith.constant 0 : index
    %c0_66 = arith.constant 0 : index
    %c0_67 = arith.constant 0 : index
    %102 = vector.load %arg2[%c2_64, %c0_65, %c0_66, %c0_67] : memref<3x3x128x128xf32, #tpu.memory_space<vmem>>, vector<1x1x128x128xf32>
    %103 = vector.shape_cast %102 : vector<1x1x128x128xf32> to vector<128x128xf32>
    %c2_68 = arith.constant 2 : index
    %c1_69 = arith.constant 1 : index
    %c0_70 = arith.constant 0 : index
    %c0_71 = arith.constant 0 : index
    %104 = vector.load %arg2[%c2_68, %c1_69, %c0_70, %c0_71] : memref<3x3x128x128xf32, #tpu.memory_space<vmem>>, vector<1x1x128x128xf32>
    %105 = vector.shape_cast %104 : vector<1x1x128x128xf32> to vector<128x128xf32>
    %c2_72 = arith.constant 2 : index
    %c2_73 = arith.constant 2 : index
    %c0_74 = arith.constant 0 : index
    %c0_75 = arith.constant 0 : index
    %106 = vector.load %arg2[%c2_72, %c2_73, %c0_74, %c0_75] : memref<3x3x128x128xf32, #tpu.memory_space<vmem>>, vector<1x1x128x128xf32>
    %107 = vector.shape_cast %106 : vector<1x1x128x128xf32> to vector<128x128xf32>
    %cst_76 = arith.constant dense<0.000000e+00> : vector<16x128xf32>
    %108 = tpu.matmul %101, %105, %cst_76 {dimension_numbers = #tpu.dot_dimension_numbers<[1], [0], [0], [1], [0, 0, 1, 1], [], []>} : vector<16x128xf32>, vector<128x128xf32>, vector<16x128xf32> -> vector<16x128xf32>
    %c1_i32_77 = arith.constant 1 : i32
    %109 = tpu.dynamic_rotate %101 by %c1_i32_77 dim 0 : vector<16x128xf32>, i32 -> vector<16x128xf32>
    %c1_i32_78 = arith.constant 1 : i32
    %110 = vector.broadcast %c1_i32_78 : i32 to vector<16x1xi32>
    %111 = arith.cmpi sge, %16, %110 : vector<16x1xi32>
    %cst_79 = arith.constant 0.000000e+00 : f32
    %112 = vector.shape_cast %111 : vector<16x1xi1> to vector<16x1xi1>
    %113 = vector.broadcast %112 : vector<16x1xi1> to vector<16x128xi1>
    %114 = vector.broadcast %cst_79 : f32 to vector<16x128xf32>
    %115 = arith.select %113, %109, %114 : vector<16x128xi1>, vector<16x128xf32>
    %c15_i32 = arith.constant 15 : i32
    %116 = tpu.dynamic_rotate %101 by %c15_i32 dim 0 : vector<16x128xf32>, i32 -> vector<16x128xf32>
    %c15_i32_80 = arith.constant 15 : i32
    %117 = vector.broadcast %c15_i32_80 : i32 to vector<16x1xi32>
    %118 = arith.cmpi slt, %16, %117 : vector<16x1xi32>
    %cst_81 = arith.constant 0.000000e+00 : f32
    %119 = vector.shape_cast %118 : vector<16x1xi1> to vector<16x1xi1>
    %120 = vector.broadcast %119 : vector<16x1xi1> to vector<16x128xi1>
    %121 = vector.broadcast %cst_81 : f32 to vector<16x128xf32>
    %122 = arith.select %120, %116, %121 : vector<16x128xi1>, vector<16x128xf32>
    %cst_82 = arith.constant dense<0.000000e+00> : vector<16x128xf32>
    %123 = tpu.matmul %115, %103, %cst_82 {dimension_numbers = #tpu.dot_dimension_numbers<[1], [0], [0], [1], [0, 0, 1, 1], [], []>} : vector<16x128xf32>, vector<128x128xf32>, vector<16x128xf32> -> vector<16x128xf32>
    %124 = arith.addf %108, %123 : vector<16x128xf32>
    %cst_83 = arith.constant dense<0.000000e+00> : vector<16x128xf32>
    %125 = tpu.matmul %122, %107, %cst_83 {dimension_numbers = #tpu.dot_dimension_numbers<[1], [0], [0], [1], [0, 0, 1, 1], [], []>} : vector<16x128xf32>, vector<128x128xf32>, vector<16x128xf32> -> vector<16x128xf32>
    %126 = arith.addf %124, %125 : vector<16x128xf32>
    %c2_84 = arith.constant 2 : index
    %c0_85 = arith.constant 0 : index
    %c0_86 = arith.constant 0 : index
    %127 = vector.load %arg3[%c2_84, %c0_85, %c0_86] : memref<3x1x128xf32, #tpu.memory_space<vmem>>, vector<1x1x128xf32>
    %128 = vector.shape_cast %127 : vector<1x1x128xf32> to vector<1x128xf32>
    %129 = vector.broadcast %128 : vector<1x128xf32> to vector<16x128xf32>
    %130 = arith.addf %126, %129 : vector<16x128xf32>
    %cst_87 = arith.constant 0.000000e+00 : f32
    %131 = vector.broadcast %cst_87 : f32 to vector<16x128xf32>
    %132 = arith.maximumf %130, %131 : vector<16x128xf32>
    %c2_88 = arith.constant 2 : index
    %c0_89 = arith.constant 0 : index
    %c0_90 = arith.constant 0 : index
    %133 = vector.load %arg4[%c2_88, %c0_89, %c0_90] : memref<3x128x128xf32, #tpu.memory_space<vmem>>, vector<1x128x128xf32>
    %134 = vector.shape_cast %133 : vector<1x128x128xf32> to vector<128x128xf32>
    %cst_91 = arith.constant dense<0.000000e+00> : vector<16x128xf32>
    %135 = tpu.matmul %132, %134, %cst_91 {dimension_numbers = #tpu.dot_dimension_numbers<[1], [0], [0], [1], [0, 0, 1, 1], [], []>} : vector<16x128xf32>, vector<128x128xf32>, vector<16x128xf32> -> vector<16x128xf32>
    %c2_92 = arith.constant 2 : index
    %c0_93 = arith.constant 0 : index
    %c0_94 = arith.constant 0 : index
    %136 = vector.load %arg5[%c2_92, %c0_93, %c0_94] : memref<3x1x128xf32, #tpu.memory_space<vmem>>, vector<1x1x128xf32>
    %137 = vector.shape_cast %136 : vector<1x1x128xf32> to vector<1x128xf32>
    %138 = vector.broadcast %137 : vector<1x128xf32> to vector<16x128xf32>
    %139 = arith.addf %135, %138 : vector<16x128xf32>
    %140 = arith.addf %99, %139 : vector<16x128xf32>
    %c0_95 = arith.constant 0 : index
    %c0_96 = arith.constant 0 : index
    %141 = vector.load %arg6[%c0_95, %c0_96] : memref<128x256xf32, #tpu.memory_space<vmem>>, vector<128x256xf32>
    %cst_97 = arith.constant dense<0.000000e+00> : vector<16x256xf32>
    %142 = tpu.matmul %140, %141, %cst_97 {dimension_numbers = #tpu.dot_dimension_numbers<[1], [0], [0], [1], [0, 0, 1, 1], [], []>} : vector<16x128xf32>, vector<128x256xf32>, vector<16x256xf32> -> vector<16x256xf32>
    %c0_98 = arith.constant 0 : index
    %c0_99 = arith.constant 0 : index
    %143 = vector.load %arg8[%c0_98, %c0_99] : memref<1x256xf32, #tpu.memory_space<vmem>>, vector<1x256xf32>
    %144 = vector.broadcast %143 : vector<1x256xf32> to vector<16x256xf32>
    %145 = arith.addf %142, %144 : vector<16x256xf32>
    %c1_i32_100 = arith.constant 1 : i32
    %146 = tpu.dynamic_rotate %140 by %c1_i32_100 dim 0 : vector<16x128xf32>, i32 -> vector<16x128xf32>
    %c1_i32_101 = arith.constant 1 : i32
    %147 = vector.broadcast %c1_i32_101 : i32 to vector<16x1xi32>
    %148 = arith.cmpi sge, %16, %147 : vector<16x1xi32>
    %cst_102 = arith.constant 0.000000e+00 : f32
    %149 = vector.shape_cast %148 : vector<16x1xi1> to vector<16x1xi1>
    %150 = vector.broadcast %149 : vector<16x1xi1> to vector<16x128xi1>
    %151 = vector.broadcast %cst_102 : f32 to vector<16x128xf32>
    %152 = arith.select %150, %146, %151 : vector<16x128xi1>, vector<16x128xf32>
    %c15_i32_103 = arith.constant 15 : i32
    %153 = tpu.dynamic_rotate %140 by %c15_i32_103 dim 0 : vector<16x128xf32>, i32 -> vector<16x128xf32>
    %c15_i32_104 = arith.constant 15 : i32
    %154 = vector.broadcast %c15_i32_104 : i32 to vector<16x1xi32>
    %155 = arith.cmpi slt, %16, %154 : vector<16x1xi32>
    %cst_105 = arith.constant 0.000000e+00 : f32
    %156 = vector.shape_cast %155 : vector<16x1xi1> to vector<16x1xi1>
    %157 = vector.broadcast %156 : vector<16x1xi1> to vector<16x128xi1>
    %158 = vector.broadcast %cst_105 : f32 to vector<16x128xf32>
    %159 = arith.select %157, %153, %158 : vector<16x128xi1>, vector<16x128xf32>
    %c0_106 = arith.constant 0 : index
    %c0_107 = arith.constant 0 : index
    %c0_108 = arith.constant 0 : index
    %160 = vector.load %arg7[%c0_106, %c0_107, %c0_108] : memref<2x128x128xf32, #tpu.memory_space<vmem>>, vector<1x128x128xf32>
    %161 = vector.shape_cast %160 : vector<1x128x128xf32> to vector<128x128xf32>
    %cst_109 = arith.constant dense<0.000000e+00> : vector<16x128xf32>
    %162 = tpu.matmul %152, %161, %cst_109 {dimension_numbers = #tpu.dot_dimension_numbers<[1], [0], [0], [1], [0, 0, 1, 1], [], []>} : vector<16x128xf32>, vector<128x128xf32>, vector<16x128xf32> -> vector<16x128xf32>
    %c1_110 = arith.constant 1 : index
    %c0_111 = arith.constant 0 : index
    %c0_112 = arith.constant 0 : index
    %163 = vector.load %arg7[%c1_110, %c0_111, %c0_112] : memref<2x128x128xf32, #tpu.memory_space<vmem>>, vector<1x128x128xf32>
    %164 = vector.shape_cast %163 : vector<1x128x128xf32> to vector<128x128xf32>
    %cst_113 = arith.constant dense<0.000000e+00> : vector<16x128xf32>
    %165 = tpu.matmul %159, %164, %cst_113 {dimension_numbers = #tpu.dot_dimension_numbers<[1], [0], [0], [1], [0, 0, 1, 1], [], []>} : vector<16x128xf32>, vector<128x128xf32>, vector<16x128xf32> -> vector<16x128xf32>
    %166 = tpu.concatenate %162, %165 in 1 : vector<16x128xf32>, vector<16x128xf32> -> vector<16x256xf32>
    %167 = arith.addf %145, %166 : vector<16x256xf32>
    %168 = vector.extract_strided_slice %167 {offsets = [0, 0], sizes = [16, 128], strides = [1, 1]} : vector<16x256xf32> to vector<16x128xf32>
    %169 = vector.extract_strided_slice %167 {offsets = [0, 128], sizes = [16, 128], strides = [1, 1]} : vector<16x256xf32> to vector<16x128xf32>
    %c1_i32_114 = arith.constant 1 : i32
    %170 = tpu.dynamic_rotate %169 by %c1_i32_114 dim 0 : vector<16x128xf32>, i32 -> vector<16x128xf32>
    %c1_i32_115 = arith.constant 1 : i32
    %171 = vector.broadcast %c1_i32_115 : i32 to vector<16x1xi32>
    %172 = arith.cmpi sge, %16, %171 : vector<16x1xi32>
    %cst_116 = arith.constant 0.000000e+00 : f32
    %173 = vector.shape_cast %172 : vector<16x1xi1> to vector<16x1xi1>
    %174 = vector.broadcast %173 : vector<16x1xi1> to vector<16x128xi1>
    %175 = vector.broadcast %cst_116 : f32 to vector<16x128xf32>
    %176 = arith.select %174, %170, %175 : vector<16x128xi1>, vector<16x128xf32>
    %c15_i32_117 = arith.constant 15 : i32
    %177 = tpu.dynamic_rotate %168 by %c15_i32_117 dim 0 : vector<16x128xf32>, i32 -> vector<16x128xf32>
    %c15_i32_118 = arith.constant 15 : i32
    %178 = vector.broadcast %c15_i32_118 : i32 to vector<16x1xi32>
    %179 = arith.cmpi slt, %16, %178 : vector<16x1xi32>
    %cst_119 = arith.constant 0.000000e+00 : f32
    %180 = vector.shape_cast %179 : vector<16x1xi1> to vector<16x1xi1>
    %181 = vector.broadcast %180 : vector<16x1xi1> to vector<16x128xi1>
    %182 = vector.broadcast %cst_119 : f32 to vector<16x128xf32>
    %183 = arith.select %181, %177, %182 : vector<16x128xi1>, vector<16x128xf32>
    %c0_120 = arith.constant 0 : index
    %c0_121 = arith.constant 0 : index
    %184 = vector.load %arg10[%c0_120, %c0_121] : memref<1x128xf32, #tpu.memory_space<vmem>>, vector<1x128xf32>
    %c0_122 = arith.constant 0 : index
    %c0_123 = arith.constant 0 : index
    %c0_124 = arith.constant 0 : index
    %185 = vector.load %arg9[%c0_122, %c0_123, %c0_124] : memref<3x128x128xf32, #tpu.memory_space<vmem>>, vector<1x128x128xf32>
    %186 = vector.shape_cast %185 : vector<1x128x128xf32> to vector<128x128xf32>
    %cst_125 = arith.constant dense<0.000000e+00> : vector<16x128xf32>
    %187 = tpu.matmul %176, %186, %cst_125 {dimension_numbers = #tpu.dot_dimension_numbers<[1], [0], [0], [1], [0, 0, 1, 1], [], []>} : vector<16x128xf32>, vector<128x128xf32>, vector<16x128xf32> -> vector<16x128xf32>
    %c1_126 = arith.constant 1 : index
    %c0_127 = arith.constant 0 : index
    %c0_128 = arith.constant 0 : index
    %188 = vector.load %arg9[%c1_126, %c0_127, %c0_128] : memref<3x128x128xf32, #tpu.memory_space<vmem>>, vector<1x128x128xf32>
    %189 = vector.shape_cast %188 : vector<1x128x128xf32> to vector<128x128xf32>
    %cst_129 = arith.constant dense<0.000000e+00> : vector<16x128xf32>
    %190 = tpu.matmul %168, %189, %cst_129 {dimension_numbers = #tpu.dot_dimension_numbers<[1], [0], [0], [1], [0, 0, 1, 1], [], []>} : vector<16x128xf32>, vector<128x128xf32>, vector<16x128xf32> -> vector<16x128xf32>
    %191 = arith.addf %187, %190 : vector<16x128xf32>
    %c2_130 = arith.constant 2 : index
    %c0_131 = arith.constant 0 : index
    %c0_132 = arith.constant 0 : index
    %192 = vector.load %arg9[%c2_130, %c0_131, %c0_132] : memref<3x128x128xf32, #tpu.memory_space<vmem>>, vector<1x128x128xf32>
    %193 = vector.shape_cast %192 : vector<1x128x128xf32> to vector<128x128xf32>
    %cst_133 = arith.constant dense<0.000000e+00> : vector<16x128xf32>
    %194 = tpu.matmul %169, %193, %cst_133 {dimension_numbers = #tpu.dot_dimension_numbers<[1], [0], [0], [1], [0, 0, 1, 1], [], []>} : vector<16x128xf32>, vector<128x128xf32>, vector<16x128xf32> -> vector<16x128xf32>
    %195 = arith.addf %191, %194 : vector<16x128xf32>
    %196 = vector.broadcast %184 : vector<1x128xf32> to vector<16x128xf32>
    %197 = arith.addf %195, %196 : vector<16x128xf32>
    %c0_134 = arith.constant 0 : index
    %c0_135 = arith.constant 0 : index
    %c0_136 = arith.constant 0 : index
    %198 = vector.load %arg9[%c0_134, %c0_135, %c0_136] : memref<3x128x128xf32, #tpu.memory_space<vmem>>, vector<1x128x128xf32>
    %199 = vector.shape_cast %198 : vector<1x128x128xf32> to vector<128x128xf32>
    %cst_137 = arith.constant dense<0.000000e+00> : vector<16x128xf32>
    %200 = tpu.matmul %168, %199, %cst_137 {dimension_numbers = #tpu.dot_dimension_numbers<[1], [0], [0], [1], [0, 0, 1, 1], [], []>} : vector<16x128xf32>, vector<128x128xf32>, vector<16x128xf32> -> vector<16x128xf32>
    %c1_138 = arith.constant 1 : index
    %c0_139 = arith.constant 0 : index
    %c0_140 = arith.constant 0 : index
    %201 = vector.load %arg9[%c1_138, %c0_139, %c0_140] : memref<3x128x128xf32, #tpu.memory_space<vmem>>, vector<1x128x128xf32>
    %202 = vector.shape_cast %201 : vector<1x128x128xf32> to vector<128x128xf32>
    %cst_141 = arith.constant dense<0.000000e+00> : vector<16x128xf32>
    %203 = tpu.matmul %169, %202, %cst_141 {dimension_numbers = #tpu.dot_dimension_numbers<[1], [0], [0], [1], [0, 0, 1, 1], [], []>} : vector<16x128xf32>, vector<128x128xf32>, vector<16x128xf32> -> vector<16x128xf32>
    %204 = arith.addf %200, %203 : vector<16x128xf32>
    %c2_142 = arith.constant 2 : index
    %c0_143 = arith.constant 0 : index
    %c0_144 = arith.constant 0 : index
    %205 = vector.load %arg9[%c2_142, %c0_143, %c0_144] : memref<3x128x128xf32, #tpu.memory_space<vmem>>, vector<1x128x128xf32>
    %206 = vector.shape_cast %205 : vector<1x128x128xf32> to vector<128x128xf32>
    %cst_145 = arith.constant dense<0.000000e+00> : vector<16x128xf32>
    %207 = tpu.matmul %183, %206, %cst_145 {dimension_numbers = #tpu.dot_dimension_numbers<[1], [0], [0], [1], [0, 0, 1, 1], [], []>} : vector<16x128xf32>, vector<128x128xf32>, vector<16x128xf32> -> vector<16x128xf32>
    %208 = arith.addf %204, %207 : vector<16x128xf32>
    %209 = vector.broadcast %184 : vector<1x128xf32> to vector<16x128xf32>
    %210 = arith.addf %208, %209 : vector<16x128xf32>
    %cst_146 = arith.constant 0.000000e+00 : f32
    %211 = vector.broadcast %cst_146 : f32 to vector<16x128xf32>
    %212 = arith.maximumf %197, %211 : vector<16x128xf32>
    %cst_147 = arith.constant 0.000000e+00 : f32
    %213 = vector.broadcast %cst_147 : f32 to vector<16x128xf32>
    %214 = arith.maximumf %210, %213 : vector<16x128xf32>
    %c1_i32_148 = arith.constant 1 : i32
    %215 = tpu.dynamic_rotate %214 by %c1_i32_148 dim 0 : vector<16x128xf32>, i32 -> vector<16x128xf32>
    %c1_i32_149 = arith.constant 1 : i32
    %216 = vector.broadcast %c1_i32_149 : i32 to vector<16x1xi32>
    %217 = arith.cmpi sge, %16, %216 : vector<16x1xi32>
    %cst_150 = arith.constant 0.000000e+00 : f32
    %218 = vector.shape_cast %217 : vector<16x1xi1> to vector<16x1xi1>
    %219 = vector.broadcast %218 : vector<16x1xi1> to vector<16x128xi1>
    %220 = vector.broadcast %cst_150 : f32 to vector<16x128xf32>
    %221 = arith.select %219, %215, %220 : vector<16x128xi1>, vector<16x128xf32>
    %c15_i32_151 = arith.constant 15 : i32
    %222 = tpu.dynamic_rotate %212 by %c15_i32_151 dim 0 : vector<16x128xf32>, i32 -> vector<16x128xf32>
    %c15_i32_152 = arith.constant 15 : i32
    %223 = vector.broadcast %c15_i32_152 : i32 to vector<16x1xi32>
    %224 = arith.cmpi slt, %16, %223 : vector<16x1xi32>
    %cst_153 = arith.constant 0.000000e+00 : f32
    %225 = vector.shape_cast %224 : vector<16x1xi1> to vector<16x1xi1>
    %226 = vector.broadcast %225 : vector<16x1xi1> to vector<16x128xi1>
    %227 = vector.broadcast %cst_153 : f32 to vector<16x128xf32>
    %228 = arith.select %226, %222, %227 : vector<16x128xi1>, vector<16x128xf32>
    %c0_154 = arith.constant 0 : index
    %c0_155 = arith.constant 0 : index
    %229 = vector.load %arg12[%c0_154, %c0_155] : memref<1x3xf32, #tpu.memory_space<vmem>>, vector<1x3xf32>
    %c0_156 = arith.constant 0 : index
    %c0_157 = arith.constant 0 : index
    %c0_158 = arith.constant 0 : index
    %230 = vector.load %arg11[%c0_156, %c0_157, %c0_158] : memref<3x128x3xf32, #tpu.memory_space<vmem>>, vector<1x128x3xf32>
    %231 = vector.shape_cast %230 : vector<1x128x3xf32> to vector<128x3xf32>
    %cst_159 = arith.constant dense<0.000000e+00> : vector<16x3xf32>
    %232 = tpu.matmul %221, %231, %cst_159 {dimension_numbers = #tpu.dot_dimension_numbers<[1], [0], [0], [1], [0, 0, 1, 1], [], []>} : vector<16x128xf32>, vector<128x3xf32>, vector<16x3xf32> -> vector<16x3xf32>
    %c1_160 = arith.constant 1 : index
    %c0_161 = arith.constant 0 : index
    %c0_162 = arith.constant 0 : index
    %233 = vector.load %arg11[%c1_160, %c0_161, %c0_162] : memref<3x128x3xf32, #tpu.memory_space<vmem>>, vector<1x128x3xf32>
    %234 = vector.shape_cast %233 : vector<1x128x3xf32> to vector<128x3xf32>
    %cst_163 = arith.constant dense<0.000000e+00> : vector<16x3xf32>
    %235 = tpu.matmul %212, %234, %cst_163 {dimension_numbers = #tpu.dot_dimension_numbers<[1], [0], [0], [1], [0, 0, 1, 1], [], []>} : vector<16x128xf32>, vector<128x3xf32>, vector<16x3xf32> -> vector<16x3xf32>
    %236 = arith.addf %232, %235 : vector<16x3xf32>
    %c2_164 = arith.constant 2 : index
    %c0_165 = arith.constant 0 : index
    %c0_166 = arith.constant 0 : index
    %237 = vector.load %arg11[%c2_164, %c0_165, %c0_166] : memref<3x128x3xf32, #tpu.memory_space<vmem>>, vector<1x128x3xf32>
    %238 = vector.shape_cast %237 : vector<1x128x3xf32> to vector<128x3xf32>
    %cst_167 = arith.constant dense<0.000000e+00> : vector<16x3xf32>
    %239 = tpu.matmul %214, %238, %cst_167 {dimension_numbers = #tpu.dot_dimension_numbers<[1], [0], [0], [1], [0, 0, 1, 1], [], []>} : vector<16x128xf32>, vector<128x3xf32>, vector<16x3xf32> -> vector<16x3xf32>
    %240 = arith.addf %236, %239 : vector<16x3xf32>
    %241 = vector.broadcast %229 : vector<1x3xf32> to vector<16x3xf32>
    %242 = arith.addf %240, %241 : vector<16x3xf32>
    %c0_168 = arith.constant 0 : index
    %c0_169 = arith.constant 0 : index
    %c0_170 = arith.constant 0 : index
    %243 = vector.load %arg11[%c0_168, %c0_169, %c0_170] : memref<3x128x3xf32, #tpu.memory_space<vmem>>, vector<1x128x3xf32>
    %244 = vector.shape_cast %243 : vector<1x128x3xf32> to vector<128x3xf32>
    %cst_171 = arith.constant dense<0.000000e+00> : vector<16x3xf32>
    %245 = tpu.matmul %212, %244, %cst_171 {dimension_numbers = #tpu.dot_dimension_numbers<[1], [0], [0], [1], [0, 0, 1, 1], [], []>} : vector<16x128xf32>, vector<128x3xf32>, vector<16x3xf32> -> vector<16x3xf32>
    %c1_172 = arith.constant 1 : index
    %c0_173 = arith.constant 0 : index
    %c0_174 = arith.constant 0 : index
    %246 = vector.load %arg11[%c1_172, %c0_173, %c0_174] : memref<3x128x3xf32, #tpu.memory_space<vmem>>, vector<1x128x3xf32>
    %247 = vector.shape_cast %246 : vector<1x128x3xf32> to vector<128x3xf32>
    %cst_175 = arith.constant dense<0.000000e+00> : vector<16x3xf32>
    %248 = tpu.matmul %214, %247, %cst_175 {dimension_numbers = #tpu.dot_dimension_numbers<[1], [0], [0], [1], [0, 0, 1, 1], [], []>} : vector<16x128xf32>, vector<128x3xf32>, vector<16x3xf32> -> vector<16x3xf32>
    %249 = arith.addf %245, %248 : vector<16x3xf32>
    %c2_176 = arith.constant 2 : index
    %c0_177 = arith.constant 0 : index
    %c0_178 = arith.constant 0 : index
    %250 = vector.load %arg11[%c2_176, %c0_177, %c0_178] : memref<3x128x3xf32, #tpu.memory_space<vmem>>, vector<1x128x3xf32>
    %251 = vector.shape_cast %250 : vector<1x128x3xf32> to vector<128x3xf32>
    %cst_179 = arith.constant dense<0.000000e+00> : vector<16x3xf32>
    %252 = tpu.matmul %228, %251, %cst_179 {dimension_numbers = #tpu.dot_dimension_numbers<[1], [0], [0], [1], [0, 0, 1, 1], [], []>} : vector<16x128xf32>, vector<128x3xf32>, vector<16x3xf32> -> vector<16x3xf32>
    %253 = arith.addf %249, %252 : vector<16x3xf32>
    %254 = vector.broadcast %229 : vector<1x3xf32> to vector<16x3xf32>
    %255 = arith.addf %253, %254 : vector<16x3xf32>
    %256 = tpu.concatenate %242, %255 in 1 : vector<16x3xf32>, vector<16x3xf32> -> vector<16x6xf32>
    %c0_180 = arith.constant 0 : index
    %c0_181 = arith.constant 0 : index
    %257 = vector.load %arg13[%c0_180, %c0_181] : memref<16x6xf32, #tpu.memory_space<vmem>>, vector<16x6xf32>
    tpu.vector_store %arg13[%c0_180, %c0_181], %256 {strides = array<i32>} : memref<16x6xf32, #tpu.memory_space<vmem>>, vector<16x6xf32>,
    return
  }
  func.func @transform_0(%arg0: i32) -> (i32, i32) {
    %c0_i32 = arith.constant 0 : i32
    %c0_i32_0 = arith.constant 0 : i32
    return %arg0, %c0_i32 : i32, i32
  }
  func.func @transform_1(%arg0: i32) -> (i32, i32, i32, i32) {
    %c0_i32 = arith.constant 0 : i32
    %c0_i32_0 = arith.constant 0 : i32
    %c0_i32_1 = arith.constant 0 : i32
    %c0_i32_2 = arith.constant 0 : i32
    %c0_i32_3 = arith.constant 0 : i32
    return %c0_i32, %c0_i32_0, %c0_i32_1, %c0_i32_2 : i32, i32, i32, i32
  }
  func.func @transform_2(%arg0: i32) -> (i32, i32, i32) {
    %c0_i32 = arith.constant 0 : i32
    %c0_i32_0 = arith.constant 0 : i32
    %c0_i32_1 = arith.constant 0 : i32
    %c0_i32_2 = arith.constant 0 : i32
    return %c0_i32, %c0_i32_0, %c0_i32_1 : i32, i32, i32
  }
  func.func @transform_3(%arg0: i32) -> (i32, i32, i32) {
    %c0_i32 = arith.constant 0 : i32
    %c0_i32_0 = arith.constant 0 : i32
    %c0_i32_1 = arith.constant 0 : i32
    %c0_i32_2 = arith.constant 0 : i32
    return %c0_i32, %c0_i32_0, %c0_i32_1 : i32, i32, i32
  }
  func.func @transform_4(%arg0: i32) -> (i32, i32, i32) {
    %c0_i32 = arith.constant 0 : i32
    %c0_i32_0 = arith.constant 0 : i32
    %c0_i32_1 = arith.constant 0 : i32
    %c0_i32_2 = arith.constant 0 : i32
    return %c0_i32, %c0_i32_0, %c0_i32_1 : i32, i32, i32
  }
  func.func @transform_5(%arg0: i32) -> (i32, i32) {
    %c0_i32 = arith.constant 0 : i32
    %c0_i32_0 = arith.constant 0 : i32
    %c0_i32_1 = arith.constant 0 : i32
    return %c0_i32, %c0_i32_0 : i32, i32
  }
  func.func @transform_6(%arg0: i32) -> (i32, i32, i32) {
    %c0_i32 = arith.constant 0 : i32
    %c0_i32_0 = arith.constant 0 : i32
    %c0_i32_1 = arith.constant 0 : i32
    %c0_i32_2 = arith.constant 0 : i32
    return %c0_i32, %c0_i32_0, %c0_i32_1 : i32, i32, i32
  }
  func.func @transform_7(%arg0: i32) -> (i32, i32) {
    %c0_i32 = arith.constant 0 : i32
    %c0_i32_0 = arith.constant 0 : i32
    %c0_i32_1 = arith.constant 0 : i32
    return %c0_i32, %c0_i32_0 : i32, i32
  }
  func.func @transform_8(%arg0: i32) -> (i32, i32, i32) {
    %c0_i32 = arith.constant 0 : i32
    %c0_i32_0 = arith.constant 0 : i32
    %c0_i32_1 = arith.constant 0 : i32
    %c0_i32_2 = arith.constant 0 : i32
    return %c0_i32, %c0_i32_0, %c0_i32_1 : i32, i32, i32
  }
  func.func @transform_9(%arg0: i32) -> (i32, i32) {
    %c0_i32 = arith.constant 0 : i32
    %c0_i32_0 = arith.constant 0 : i32
    %c0_i32_1 = arith.constant 0 : i32
    return %c0_i32, %c0_i32_0 : i32, i32
  }
  func.func @transform_10(%arg0: i32) -> (i32, i32, i32) {
    %c0_i32 = arith.constant 0 : i32
    %c0_i32_0 = arith.constant 0 : i32
    %c0_i32_1 = arith.constant 0 : i32
    %c0_i32_2 = arith.constant 0 : i32
    return %c0_i32, %c0_i32_0, %c0_i32_1 : i32, i32, i32
  }
  func.func @transform_11(%arg0: i32) -> (i32, i32) {
    %c0_i32 = arith.constant 0 : i32
    %c0_i32_0 = arith.constant 0 : i32
    %c0_i32_1 = arith.constant 0 : i32
    return %c0_i32, %c0_i32_0 : i32, i32
  }
  func.func @transform_12(%arg0: i32) -> (i32, i32) {
    %c0_i32 = arith.constant 0 : i32
    %c0_i32_0 = arith.constant 0 : i32
    return %arg0, %c0_i32 : i32, i32
  }
}

</mosaic_0001>

<bundles_post_ra>
// kernel: tpu_custom_call.1
= control target key start
LH: loop header
LB: loop body
LE: loop exit
PB: predicated region body
PF: predicated region fallthrough
CT: control target
= control target key end

     0   :  { %6 = vsyncpa [#allocation3], 0  ;;  %s448_s0 = inlined_call_operand.hbm [shape: f32[8,128], index: 0, kind: input, shape index: {}]   ;;  %s449_s1 = inlined_call_operand.hbm [shape: f32[16,128], index: 1, kind: output, shape index: {}]  }
   0x1   :  { %7 = vsyncpa [#allocation4], 0 }
   0x2   :  { %9 = vsyncpa [#allocation4 + $0x1], 0  ;;  %s348_s6 = smov 0   ;;  %s350_s7 = smov 0  }
   0x3   :  { %s352_s8 = smov 0   ;;  %s354_s9 = smov 0  }
   0x4 LB: > { %s369_s10 = sadd.s32 4294967295, %s334_s9   ;;  %s184_s11 = sadd.s32 4294967294, %s334_s9   ;;  %s334_s9 = sphi %s354_s9, %s457_s9   ;;  %s330_s8 = sphi %s352_s8, %s456_s8   ;;  %s326_s7 = sphi %s350_s7, %s455_s7   ;;  %s322_s6 = sphi %s348_s6, %s454_s6  }
   0x5   : > { %s373_s12 = sadd.s32 1, %s334_s9   ;;  %s43_s13 = sadd.s32 1, %s330_s8 }
   0x6   : > { %s40_s14 = ssub.s32 %s334_s9, %s373_s12  ;;  %p53_p0 = scmp.ne.s32.totalorder %s330_s8, %s326_s7 }
   0x7   : > { %p41_p1 = scmp.eq.s32.totalorder %s40_s14, 0  ;;  %p54_p2 = scmp.eq.s32.totalorder %s369_s10, 1 }
   0x8   : > { %p59_p3 = scmp.ne.s32.totalorder %s326_s7, %s322_s6  ;;  %p60_p4 = scmp.eq.s32.totalorder %s184_s11, 1 }
   0x9   : > { %s384_s15 = scalar_select %p41_p1, %s330_s8, %s43_s13  }
   0xa   : > { %p386_p5 = por %p54_p2, %p53_p0  ;;  %p390_p6 = por %p60_p4, %p59_p3 }
   0xb   : > { %p185_p7 = scmp.ge.s32.totalorder %s334_s9, 1  ;;  %p67_p8 = scmp.lt.s32.totalorder %s334_s9, 3 }
   0xc   : > { %s451_s17 = scalar_select %p390_p6, 1, 0 }
   0xd   : > { %p208_p9 = scmp.eq.s32.totalorder %s369_s10, 0  ;;  %p397_p10 = pnand %p185_p7, %p67_p8 }
   0xe   : > { %s336_s19 = smov [#allocation2]  }
   0xf   : > { %s80_s20 = sshll.u32 %s336_s19, 4  ;;  %p200_p11 = pneg %p397_p10  ;;  %s81_s20 = int_to_ptr.vmem [resolvable:$true] %s80_s20 }
  0x10   : > { %s255_s21 = scalar_lea.vmem %s81_s20, 128  ;;  %p263_p3 = scmp.lt.s32.totalorder %s81_s20, %s81_s20 }
  0x11   : > { %p201_p12 = pnand %p208_p9, %p200_p11  ;;  %p256_p0 = scmp.ne.s32.totalorder %s81_s20, %s255_s21 }
  0x12   : > { %p264_p4 = scmp.lt.s32.totalorder %s255_s21, %s255_s21 }
  0x13   : > { %p246_p13 = pneg %p201_p12 }
  0x14   : > { %p265_p6 = por %p264_p4, %p263_p3 }
  0x15   : > { %p258_p1 = pnand %p256_p0, %p246_p13 }
  0x17   : > { %p259_p2 = pneg %p258_p1 }
  0x19   : > { %p266_p7 = pnand %p265_p6, %p259_p2 }
  0x1b   : > { %269 = shalt.err (!%p266_p7)
}
  0x1c   : > { %203 = dma.hbm_to_vmem [thread:$0]  (!%p201_p12), %s448_s0, 128, %s81_s20, [#allocation3]  }
  0x1d   : > { %93 = sbr.rel (%p397_p10) target bundleno = 60 (0x3c), region = 24 }
  0x22   : > { %313 = dma.done.wait (%p208_p9), [#allocation3], 128  }
  0x23   : > { %315 = vsyncadd (%p208_p9), [#allocation3], 4294967168  ;;  %s105_s24 = sand.u32 1, %s326_s7   ;;  %s191_s28 = sshll.u32 %s369_s10, 7  ;;  %v108_v0 = vld [vmem:[#allocation2] sm:$0xff] }
  0x24   : > { %s189_s25 = sshll.u32 %s105_s24, 3  ;;  %v109_v1 = vadd.f32 1.0, %v108_v0  ;;  %s123_s2 = scalar_lea.hbm %s449_s1, %s191_s28 }
  0x25   : > { %s107_s26 = scalar_lea.vmem [#allocation5], %s189_s25  ;;  %s112_s3 = scalar_lea.sflag [#allocation4], %s105_s24 }
  0x26   : > { %s125_s27 = sshll.u32 %s107_s26, 4  ;;  %110 = vst [vmem:[%s107_s26] sm:$0xff] %v109_v1  ;;  %s337_s5 = smov [#allocation5]   ;;  %s126_s27 = int_to_ptr.vmem [resolvable:$true] %s125_s27 }
  0x27   : > { %s270_s4 = scalar_lea.vmem %s126_s27, 128  ;;  %s274_s11 = sshll.u32 %s337_s5, 4  ;;  %s275_s11 = int_to_ptr.vmem [resolvable:$false] %s274_s11 }
  0x28   : > { %p271_p6 = scmp.ne.s32.totalorder %s126_s27, %s270_s4  ;;  %s276_s13 = scalar_lea.vmem %s275_s11, 256 }
  0x29   : > { %p277_p10 = scmp.lt.s32.totalorder %s126_s27, %s275_s11  ;;  %p278_p11 = scmp.lt.s32.totalorder %s276_s13, %s270_s4 }
  0x2a   : > { %p272_p8 = pnand %p271_p6, %p386_p5 }
  0x2b   : > { %p279_p12 = por %p278_p11, %p277_p10 }
  0x2c   : > { %p273_p9 = pneg %p272_p8 }
  0x2e   : > { %p280_p13 = pnand %p279_p12, %p273_p9 }
  0x30   : > { %283 = shalt.err (!%p280_p13)
}
  0x31   : > { %s284_s10 = scalar_lea.hbm %s123_s2, 128  ;;  %s288_s19 = scalar_lea.hbm %s449_s1, 256 }
  0x32   : > { %p285_p0 = scmp.ne.s32.totalorder %s123_s2, %s284_s10  ;;  %p289_p3 = scmp.lt.s32.totalorder %s123_s2, %s449_s1 }
  0x33   : > { %p290_p4 = scmp.lt.s32.totalorder %s288_s19, %s284_s10 }
  0x34   : > { %p286_p1 = pnand %p285_p0, %p386_p5 }
  0x35   : > { %p291_p7 = por %p290_p4, %p289_p3 }
  0x36   : > { %p287_p2 = pneg %p286_p1 }
  0x38   : > { %p292_p6 = pnand %p291_p7, %p287_p2 }
  0x3a   : > { %295 = shalt.err (!%p292_p6)
}
  0x3b   : > { %198 = dma.vmem_to_hbm [thread:$0]  (%p386_p5), %s126_s27, 128, %s123_s2, %s112_s3  }
  0x3c PF: > { %p210_p8 = scmp.ge.s32.totalorder %s334_s9, 2  ;;  %s137_s22 = sand.u32 1, %s322_s6  }
  0x3d   : > { %p453_p9 = scmp.ne.s32.totalorder %s451_s17, 0  ;;  %s138_s23 = scalar_lea.sflag [#allocation4], %s137_s22 }
  0x3f   : > { %p205_p10 = pnand %p210_p8, %p453_p9 }
  0x41   : > { %p206_p11 = pneg %p205_p10 }
  0x43   : > { %317 = dma.done.wait (%p206_p11), %s138_s23, 128  }
  0x44   : > { %319 = vsyncadd (%p206_p11), %s138_s23, 4294967168  ;;  %p12_p12 = scmp.ge.s32.totalorder %s373_s12, 4   ;;  %s454_s6 = smov %s326_s7 }
  0x45   : > { %s455_s7 = smov %s330_s8  ;;  %s456_s8 = smov %s384_s15 }
  0x46   : > { %s457_s9 = smov %s373_s12  ;;  %14 = sbr.rel (!%p12_p12) target bundleno = 4 (0x4), region = 61 }
  0x4b   :  { %143 = vsyncpa [#allocation3], 1 }
  0x4c   :  { %145 = vsyncpa [#allocation3 + $0x1], 1 }
  0x4d   :  { %146 = vsyncpa [#allocation4], 1 }
  0x4e   :  { %148 = vsyncpa [#allocation4 + $0x1], 1 }

// kernel: _lambda_.2
= control target key start
LH: loop header
LB: loop body
LE: loop exit
PB: predicated region body
PF: predicated region fallthrough
CT: control target
= control target key end

     0   :  { %s3865_s0 = inlined_call_operand.hbm [shape: f32[32,128], index: 0, kind: input, shape index: {}]   ;;  %s3866_s1 = inlined_call_operand.hbm [shape: f32[3,128,128], index: 1, kind: input, shape index: {}]   ;;  %s3867_s2 = inlined_call_operand.vmem [shape: f32[1,128], index: 2, kind: input, shape index: {}]   ;;  %s3868_s3 = inlined_call_operand.hbm [shape: f32[3,3,128,128], index: 3, kind: input, shape index: {}]   ;;  %s3869_s4 = inlined_call_operand.vmem [shape: f32[3,1,128], index: 4, kind: input, shape index: {}]   ;;  %s3870_s5 = inlined_call_operand.hbm [shape: f32[3,128,128], index: 5, kind: input, shape index: {}]   ;;  %s3871_s6 = inlined_call_operand.vmem [shape: f32[3,1,128], index: 6, kind: input, shape index: {}]   ;;  %s3872_s7 = inlined_call_operand.hbm [shape: f32[128,256], index: 7, kind: input, shape index: {}]   ;;  %s3873_s8 = inlined_call_operand.hbm [shape: f32[2,128,128], index: 8, kind: input, shape index: {}]   ;;  %s3874_s9 = inlined_call_operand.vmem [shape: f32[1,256], index: 9, kind: input, shape index: {}]   ;;  %s3875_s10 = inlined_call_operand.vmem [shape: f32[32,256], index: 10, kind: output, shape index: {}]  }
   0x1   :  { %3883 = sst [smem:[#allocation16_spill]] %s3866_s1 }
   0x2   :  { %15 = vsyncpa [#allocation3], 0 }
   0x3   :  { %17 = vsyncpa [#allocation3 + $0x1], 0 }
   0x4   :  { %18 = vsyncpa [#allocation5], 0 }
   0x5   :  { %19 = vsyncpa [#allocation8], 0 }
   0x6   :  { %20 = vsyncpa [#allocation11], 0  ;;  %s3485_s13 = smov 0   ;;  %s3487_s14 = smov 0  }
   0x7   :  { %s3489_s15 = smov 0   ;;  %s3491_s16 = smov 0  }
   0x8 LB: > { %s3419_s17 = smov [#allocation4]   ;;  %s3876_s19 = sadd.s32 4294967295, %s3417_s16   ;;  %s3417_s16 = sphi %s3491_s16, %s3900_s16   ;;  %s3413_s15 = sphi %s3489_s15, %s3899_s15   ;;  %s3409_s14 = sphi %s3487_s14, %s3898_s14   ;;  %s3405_s13 = sphi %s3485_s13, %s3897_s13  }
   0x9   : > { %s284_s18 = sshll.u32 %s3419_s17, 4  ;;  %p2272_p0 = scmp.ge.s32.totalorder %s3417_s16, 1  ;;  %s285_s18 = int_to_ptr.vmem [resolvable:$true] %s284_s18 }
   0xa   : > { %p3509_p1 = scmp.eq.s32.totalorder %s3876_s19, 0  ;;  %p272_p2 = scmp.lt.s32.totalorder %s3417_s16, 3 }
   0xb   : > { %s3420_s22 = smov [#allocation7]   ;;  %s3421_s25 = smov [#allocation6]  }
   0xc   : > { %s3884_s20 = scalar_select %p3509_p1, 1, 0 }
   0xd   : > { %p3514_p3 = pnand %p2272_p0, %p272_p2  ;;  %s316_s23 = sshll.u32 %s3420_s22, 4  ;;  %s3526_s23 = int_to_ptr.vmem [resolvable:$true] %s316_s23 }
   0xe   : > { %s300_s26 = sshll.u32 %s3421_s25, 4  ;;  %s3224_s28 = scalar_lea.vmem %s285_s18, 6144  ;;  %s3528_s26 = int_to_ptr.vmem [resolvable:$true] %s300_s26 }
   0xf   : > { %s3885_s21 = scalar_select %p3514_p3, 1, 0 }
  0x10   : > { %p3140_p4 = pneg %p3514_p3  ;;  %p3225_p7 = scmp.ne.s32.totalorder %s285_s18, %s3224_s28 }
  0x11   : > { %p3232_p10 = scmp.lt.s32.totalorder %s285_s18, %s285_s18  ;;  %p3233_p11 = scmp.lt.s32.totalorder %s3224_s28, %s3224_s28 }
  0x12   : > { %p3522_p5 = pnand %p3140_p4, %p3509_p1 }
  0x13   : > { %p3234_p12 = por %p3233_p11, %p3232_p10 }
  0x14   : > { %p3532_p6 = pneg %p3522_p5 }
  0x16   : > { %p3227_p8 = pnand %p3225_p7, %p3532_p6 }
  0x18   : > { %p3228_p9 = pneg %p3227_p8 }
  0x1a   : > { %p3235_p13 = pnand %p3234_p12, %p3228_p9 }
  0x1c   : > { %3238 = shalt.err (!%p3235_p13)
}
  0x1d   : > { %s3877_s29 = smov 128   ;;  %s3878_s30 = smov 8  }
  0x1e   : > { %s3888_s1 = sld [smem:[#allocation16_spill]]  ;;  %s3250_s17 = scalar_lea.vmem %s3526_s23, 6144 }
  0x1f   : > { %p3251_p0 = scmp.ne.s32.totalorder %s3526_s23, %s3250_s17  ;;  %p3258_p7 = scmp.lt.s32.totalorder %s3526_s23, %s3526_s23 }
  0x20   : > { %p3259_p8 = scmp.lt.s32.totalorder %s3250_s17, %s3250_s17 }
  0x21   : > { %p3253_p2 = pnand %p3251_p0, %p3532_p6 }
  0x22   : > { %p3260_p9 = por %p3259_p8, %p3258_p7 }
  0x23   : > { %p3254_p4 = pneg %p3253_p2 }
  0x24   : > { %3143 = dma.hbm_to_vmem [thread:$0]  (!%p3522_p5), %s3888_s1, 6144, %s285_s18, [#allocation5], %s3877_s29, %s3877_s29, %s3878_s30  }
  0x25   : > { %p3261_p10 = pnand %p3260_p9, %p3254_p4 }
  0x27   : > { %3264 = shalt.err (!%p3261_p10)
}
  0x28   : > { %3149 = dma.hbm_to_vmem [thread:$0]  (!%p3522_p5), %s3870_s5, 6144, %s3526_s23, [#allocation8], %s3877_s29, %s3877_s29, %s3878_s30  }
  0x29   : > { %s3276_s18 = scalar_lea.vmem %s3528_s26, 18432  ;;  %p3284_p0 = scmp.lt.s32.totalorder %s3528_s26, %s3528_s26 }
  0x2a   : > { %p3277_p11 = scmp.ne.s32.totalorder %s3528_s26, %s3276_s18  ;;  %p3285_p2 = scmp.lt.s32.totalorder %s3276_s18, %s3276_s18 }
  0x2c   : > { %p3279_p12 = pnand %p3277_p11, %p3532_p6  ;;  %p3286_p4 = por %p3285_p2, %p3284_p0 }
  0x2e   : > { %p3280_p13 = pneg %p3279_p12 }
  0x30   : > { %p3287_p7 = pnand %p3286_p4, %p3280_p13 }
  0x32   : > { %3290 = shalt.err (!%p3287_p7)
}
  0x33   : > { %3146 = dma.hbm_to_vmem [thread:$0]  (!%p3522_p5), %s3868_s3, 18432, %s3528_s26, [#allocation5], %s3877_s29, %s3877_s29, %s3878_s30  }
  0x34   : > { %s3424_s23 = smov [#allocation9]  }
  0x35   : > { %s332_s12 = sshll.u32 %s3424_s23, 4  ;;  %s333_s12 = int_to_ptr.vmem [resolvable:$true] %s332_s12 }
  0x36   : > { %s3302_s17 = scalar_lea.vmem %s333_s12, 4096  ;;  %p3310_p11 = scmp.lt.s32.totalorder %s333_s12, %s333_s12 }
  0x37   : > { %p3303_p8 = scmp.ne.s32.totalorder %s333_s12, %s3302_s17  ;;  %p3311_p12 = scmp.lt.s32.totalorder %s3302_s17, %s3302_s17 }
  0x39   : > { %p3305_p9 = pnand %p3303_p8, %p3532_p6  ;;  %p3312_p13 = por %p3311_p12, %p3310_p11 }
  0x3b   : > { %p3306_p10 = pneg %p3305_p9 }
  0x3d   : > { %p3313_p0 = pnand %p3312_p13, %p3306_p10 }
  0x3f   : > { %3316 = shalt.err (!%p3313_p0)
}
  0x40   : > { %s3425_s22 = smov 256   ;;  %s3426_s25 = smov 16  }
  0x41   : > { %3152 = dma.hbm_to_vmem [thread:$0]  (!%p3522_p5), %s3872_s7, 4096, %s333_s12, [#allocation8], %s3425_s22, %s3425_s22, %s3426_s25  }
  0x42   : > { %s3427_s28 = smov [#allocation10]  }
  0x43   : > { %s345_s11 = sshll.u32 %s3427_s28, 4  ;;  %s346_s11 = int_to_ptr.vmem [resolvable:$true] %s345_s11 }
  0x44   : > { %s3328_s23 = scalar_lea.vmem %s346_s11, 4096  ;;  %p3336_p8 = scmp.lt.s32.totalorder %s346_s11, %s346_s11 }
  0x45   : > { %p3329_p2 = scmp.ne.s32.totalorder %s346_s11, %s3328_s23  ;;  %p3337_p9 = scmp.lt.s32.totalorder %s3328_s23, %s3328_s23 }
  0x47   : > { %p3331_p4 = pnand %p3329_p2, %p3532_p6  ;;  %p3338_p10 = por %p3337_p9, %p3336_p8 }
  0x49   : > { %p3332_p7 = pneg %p3331_p4 }
  0x4b   : > { %p3339_p11 = pnand %p3338_p10, %p3332_p7 }
  0x4d   : > { %3342 = shalt.err (!%p3339_p11)
}
  0x4e   : > { %3155 = dma.hbm_to_vmem [thread:$0]  (!%p3522_p5), %s3873_s8, 4096, %s346_s11, [#allocation11], %s3877_s29, %s3877_s29, %s3878_s30  }
  0x4f   : > { %s3594_s24 = sadd.s32 1, %s3417_s16   ;;  %s33_s22 = sadd.s32 1, %s3413_s15 }
  0x50   : > { %s30_s27 = ssub.s32 %s3417_s16, %s3594_s24  ;;  %p40_p12 = scmp.ne.s32.totalorder %s3413_s15, %s3409_s14 }
  0x51   : > { %p31_p6 = scmp.eq.s32.totalorder %s30_s27, 0  ;;  %p41_p13 = scmp.eq.s32.totalorder %s3417_s16, 0 }
  0x52   : > { %p46_p0 = scmp.ne.s32.totalorder %s3409_s14, %s3405_s13  ;;  %p3165_p7 = scmp.lt.s32.totalorder %s3417_s16, 2 }
  0x53   : > { %s3605_s25 = scalar_select %p31_p6, %s3413_s15, %s33_s22  }
  0x54   : > { %p42_p2 = por %p41_p13, %p40_p12  ;;  %p3609_p4 = por %p3509_p1, %p46_p0 }
  0x55   : > { %s362_s26 = sand.u32 1, %s3413_s15   ;;  %s2321_s11 = sshll.u32 %s3417_s16, 8 }
  0x56   : > { %s3889_s18 = scalar_select %p3609_p4, 1, 0 }
  0x57   : > { %s2279_s28 = sshll.u32 %s362_s26, 4  ;;  %s3619_s12 = scalar_lea.hbm %s3865_s0, %s2321_s11 }
  0x58   : > { %s366_s13 = scalar_lea.vmem [#allocation2], %s2279_s28  ;;  %p3623_p5 = pnand %p3165_p7, %p42_p2 }
  0x59   : > { %s373_s27 = sshll.u32 %s366_s13, 4  ;;  %s3627_s19 = scalar_lea.sflag [#allocation3], %s362_s26  ;;  %s3621_s27 = int_to_ptr.vmem [resolvable:$true] %s373_s27 }
  0x5a   : > { %s3343_s29 = scalar_lea.hbm %s3619_s12, 256  ;;  %p3345_p9 = pneg %p3623_p5 }
  0x5b   : > { %p3344_p8 = scmp.ne.s32.totalorder %s3619_s12, %s3343_s29  ;;  %s3348_s28 = scalar_lea.hbm %s3865_s0, 512 }
  0x5c   : > { %p3349_p6 = scmp.lt.s32.totalorder %s3619_s12, %s3865_s0  ;;  %p3350_p12 = scmp.lt.s32.totalorder %s3348_s28, %s3343_s29 }
  0x5d   : > { %p3346_p10 = pnand %p3345_p9, %p3344_p8 }
  0x5e   : > { %p3351_p13 = por %p3350_p12, %p3349_p6 }
  0x5f   : > { %p3347_p11 = pneg %p3346_p10 }
  0x61   : > { %p3352_p0 = pnand %p3351_p13, %p3347_p11 }
  0x63   : > { %3355 = shalt.err (!%p3352_p0)
}
  0x64   : > { %s3356_s26 = scalar_lea.vmem %s3621_s27, 256  ;;  %s3428_s30 = smov [#allocation2]  }
  0x65   : > { %p3357_p2 = scmp.ne.s32.totalorder %s3621_s27, %s3356_s26  ;;  %s3361_s1 = sshll.u32 %s3428_s30, 4  ;;  %s3362_s1 = int_to_ptr.vmem [resolvable:$false] %s3361_s1 }
  0x66   : > { %s3363_s11 = scalar_lea.vmem %s3362_s1, 512  ;;  %p3364_p10 = scmp.lt.s32.totalorder %s3621_s27, %s3362_s1 }
  0x67   : > { %p3359_p7 = pnand %p3357_p2, %p3345_p9  ;;  %p3365_p1 = scmp.lt.s32.totalorder %s3363_s11, %s3356_s26 }
  0x69   : > { %p3360_p8 = pneg %p3359_p7  ;;  %p3366_p4 = por %p3365_p1, %p3364_p10 }
  0x6b   : > { %p3367_p3 = pnand %p3366_p4, %p3360_p8 }
  0x6d   : > { %3370 = shalt.err (!%p3367_p3)
}
  0x6e   : > { %s3891_s29 = smov 8   ;;  %s3892_s23 = smov 128  }
  0x6f   : > { %3159 = dma.hbm_to_vmem [thread:$0]  (!%p3623_p5), %s3619_s12, 256, %s3621_s27, %s3627_s19, %s3892_s23, %s3892_s23, %s3891_s29  }
  0x70   : > { %p3893_p9 = scmp.ne.s32.totalorder %s3885_s21, 0 }
  0x71   : > { %s387_s30 = sand.u32 (!%p3893_p9), 1, %s3409_s14   ;;  %p3894_p1 = scmp.ne.s32.totalorder (!%p3893_p9), %s3889_s18, 0 }
  0x72   : > { %385 = sbr.rel (%p3893_p9) target bundleno = 1905 (0x771), region = 60  ;;  %s3654_s1 = sshll.u32 (!%p3893_p9), %s387_s30, 4 }
  0x73   : > { %s388_s28 = scalar_lea.sflag (!%p3893_p9), [#allocation3], %s387_s30  ;;  %s391_s17 = scalar_lea.vmem (!%p3893_p9), [#allocation2], %s3654_s1 }
  0x77   : > { %3388 = dma.done.wait (%p3894_p1), %s388_s28, 256  }
  0x78   : > { %3390 = vsyncadd (%p3894_p1), %s388_s28, 4294967040  ;;  %p3895_p3 = scmp.ne.s32.totalorder %s3884_s20, 0 }
  0x7a   : > { %3392 = dma.done.wait (%p3895_p3), [#allocation5], 24576  }
  0x7b   : > { %3394 = vsyncadd (%p3895_p3), [#allocation5], 4294942720 }
  0x7c   : > { %3396 = dma.done.wait (%p3895_p3), [#allocation8], 10240  }
  0x7d   : > { %3398 = vsyncadd (%p3895_p3), [#allocation8], 4294957056 }
  0x7e   : > { %3400 = dma.done.wait (%p3895_p3), [#allocation11], 4096  }
  0x7f   : > { %3402 = vsyncadd (%p3895_p3), [#allocation11], 4294963200  ;;  %v501_v0 = vld [vmem:[#allocation4 + $0x78] sm:$0xff]  ;;  %v500_v2 = vld [vmem:[#allocation4 + $0x70] sm:$0xff]  ;;  %v457_v18 = vlaneseq  ;;  %s3896_s28 = sadd.s32 4294967295, %s3417_s16  }
  0x80   : > { %v518_v1 = vld [vmem:[#allocation4 + $0xf8] sm:$0xff]  ;;  %2593 = vmatprep.subr.mxu0 %v501_v0  ;;  %v517_v3 = vld [vmem:[#allocation4 + $0xf0] sm:$0xff]  ;;  %v499_v4 = vld [vmem:[#allocation4 + $0x68] sm:$0xff] }
  0x81   : > { %2628 = vmatprep.subr.mxu1 %v518_v1  ;;  %2594 = vmatpush3.msra.mxu0 %v501_v0  ;;  %v516_v5 = vld [vmem:[#allocation4 + $0xe8] sm:$0xff]  ;;  %v498_v6 = vld [vmem:[#allocation4 + $0x60] sm:$0xff]  ;;  %v497_v8 = vld [vmem:[#allocation4 + $0x58] sm:$0xff]  ;;  %v3673_v23 = vshrl.u32 %v457_v18, 7 }
  0x82   : > { %2629 = vmatpush3.msra.mxu1 %v518_v1  ;;  %2595 = vmatprep.subr.mxu0 %v500_v2  ;;  %v515_v7 = vld [vmem:[#allocation4 + $0xe0] sm:$0xff]  ;;  %v514_v9 = vld [vmem:[#allocation4 + $0xd8] sm:$0xff]  ;;  %v496_v10 = vld [vmem:[#allocation4 + $0x50] sm:$0xff] }
  0x83   : > { %2630 = vmatprep.subr.mxu1 %v517_v3  ;;  %2596 = vmatpush3.msra.mxu0 %v500_v2  ;;  %v513_v11 = vld [vmem:[#allocation4 + $0xd0] sm:$0xff]  ;;  %v495_v12 = vld [vmem:[#allocation4 + $0x48] sm:$0xff]  ;;  %v494_v14 = vld [vmem:[#allocation4 + $0x40] sm:$0xff]  ;;  %v459_v30 = vadd.s32 8, %v3673_v23  ;;  %v3685_v33 = vand.u32 7, %v3673_v23  ;;  %vm538_vm0 = vcmp.lt.s32.totalorder %v3673_v23, 1 }
  0x84   : > { %2631 = vmatpush3.msra.mxu1 %v517_v3  ;;  %2597 = vmatprep.subr.mxu0 %v499_v4  ;;  %v512_v13 = vld [vmem:[#allocation4 + $0xc8] sm:$0xff]  ;;  %v511_v15 = vld [vmem:[#allocation4 + $0xc0] sm:$0xff]  ;;  %v493_v16 = vld [vmem:[#allocation4 + $0x38] sm:$0xff]  ;;  %vm551_vm2 = vcmp.lt.s32.totalorder %v3673_v23, 7  ;;  %vm1058_vm6 = vcmp.lt.s32.totalorder %v3673_v23, 3  ;;  %vm1071_vm9 = vcmp.lt.s32.totalorder %v3673_v23, 5 }
  0x85   : > { %2632 = vmatprep.subr.mxu1 %v516_v5  ;;  %2598 = vmatpush3.msra.mxu0 %v499_v4  ;;  %v510_v17 = vld [vmem:[#allocation4 + $0xb8] sm:$0xff]  ;;  %v492_v19 = vld [vmem:[#allocation4 + $0x30] sm:$0xff]  ;;  %v491_v21 = vld [vmem:[#allocation4 + $0x28] sm:$0xff]  ;;  %v3690_v38 = vand.u32 7, %v459_v30  ;;  %vm541_vm1 = vcmp.ge.s32.totalorder %v3685_v33, 1  ;;  %vm554_vm4 = vcmp.lt.s32.totalorder %v3685_v33, 7 }
  0x86   : > { %2633 = vmatpush3.msra.mxu1 %v516_v5  ;;  %2599 = vmatprep.subr.mxu0 %v498_v6  ;;  %v509_v20 = vld [vmem:[#allocation4 + $0xb0] sm:$0xff]  ;;  %v508_v22 = vld [vmem:[#allocation4 + $0xa8] sm:$0xff]  ;;  %v490_v24 = vld [vmem:[#allocation4 + $0x20] sm:$0xff]  ;;  %vm1061_vm7 = vcmp.ge.s32.totalorder %v3685_v33, 3  ;;  %vm1074_vm10 = vcmp.lt.s32.totalorder %v3685_v33, 5 }
  0x87   : > { %2634 = vmatprep.subr.mxu1 %v515_v7  ;;  %2600 = vmatpush3.msra.mxu0 %v498_v6  ;;  %v507_v25 = vld [vmem:[#allocation4 + $0xa0] sm:$0xff]  ;;  %v489_v26 = vld [vmem:[#allocation4 + $0x18] sm:$0xff]  ;;  %v488_v31 = vld [vmem:[#allocation4 + $0x10] sm:$0xff]  ;;  %vm542_vm3 = vcmp.ge.s32.totalorder %v3690_v38, 1  ;;  %vm555_vm5 = vcmp.lt.s32.totalorder %v3690_v38, 7  ;;  %vm1062_vm8 = vcmp.ge.s32.totalorder %v3690_v38, 3 }
  0x88   : > { %2635 = vmatpush3.msra.mxu1 %v515_v7  ;;  %2601 = vmatprep.subr.mxu0 %v497_v8  ;;  %v506_v27 = vld [vmem:[#allocation4 + $0x98] sm:$0xff]  ;;  %v3677_v28 = vld [vmem:[%s391_s17] sm:$0xff]  ;;  %v487_v36 = vld [vmem:[#allocation4 + $0x8] sm:$0xff]  ;;  %vm1075_vm11 = vcmp.lt.s32.totalorder %v3690_v38, 5 }
  0x89   : > { %2636 = vmatprep.subr.mxu1 %v514_v9  ;;  %2602 = vmatpush3.msra.mxu0 %v497_v8  ;;  %v3681_v29 = vld [vmem:[%s391_s17 + $0x8] sm:$0xff]  ;;  %v505_v32 = vld [vmem:[#allocation4 + $0x90] sm:$0xff]  ;;  %v536_v34 = vrot.slane %v3677_v28, 7  ;;  %v486_v39 = vld [vmem:[#allocation4] sm:$0xff]  ;;  %v549_v41 = vrot.slane %v3677_v28, 1  ;;  %s2289_s17 = sshll.u32 %s3896_s28, 1 }
  0x8a   : > { %2637 = vmatpush3.msra.mxu1 %v514_v9  ;;  %2603 = vmatprep.subr.mxu0 %v496_v10  ;;  %v537_v35 = vrot.slane %v3681_v29, 7  ;;  %v504_v37 = vld [vmem:[#allocation4 + $0x88] sm:$0xff]  ;;  %v503_v40 = vld [vmem:[#allocation4 + $0x80] sm:$0xff]  ;;  %v550_v42 = vrot.slane %v3681_v29, 1  ;;  %v535_v45 = vld [vmem:[#allocation4 + $0x178] sm:$0xff]  ;;  %p451_p4 = scmp.lt.s32.totalorder %s2289_s17, 3 }
  0x8b   : > { %2638 = vmatprep.subr.mxu1 %v513_v11  ;;  %2604 = vmatpush3.msra.mxu0 %v496_v10  ;;  %v534_v47 = vld [vmem:[#allocation4 + $0x170] sm:$0xff]  ;;  %v533_v48 = vld [vmem:[#allocation4 + $0x168] sm:$0xff]  ;;  %v532_v49 = vld [vmem:[#allocation4 + $0x160] sm:$0xff] }
  0x8c   : > { %2639 = vmatpush3.msra.mxu1 %v513_v11  ;;  %2605 = vmatprep.subr.mxu0 %v495_v12  ;;  %v540_v43 = vsel %vm538_vm0, %v537_v35, %v536_v34  ;;  %v539_v44 = vsel %vm538_vm0, %v536_v34, %v537_v35  ;;  %v552_v46 = vsel %vm551_vm2, %v549_v41, %v550_v42  ;;  %v531_v50 = vld [vmem:[#allocation4 + $0x158] sm:$0xff]  ;;  %v530_v51 = vld [vmem:[#allocation4 + $0x150] sm:$0xff]  ;;  %v529_v52 = vld [vmem:[#allocation4 + $0x148] sm:$0xff]  ;;  %s3902_s17 = smov (!%p451_p4, %s2289_s17), 3 }
  0x8d   : > { %2640 = vmatprep.subr.mxu1 %v512_v13  ;;  %2606 = vmatpush3.msra.mxu0 %v495_v12  ;;  %v528_v53 = vld [vmem:[#allocation4 + $0x140] sm:$0xff]  ;;  %v527_v54 = vld [vmem:[#allocation4 + $0x138] sm:$0xff]  ;;  %v526_v55 = vld [vmem:[#allocation4 + $0x130] sm:$0xff]  ;;  %v553_v62 = vsel %vm551_vm2, %v550_v42, %v549_v41  ;;  %s2322_s21 = sshll.u32 %s3902_s17, 4 }
  0x8e   : > { %2641 = vmatpush3.msra.mxu1 %v512_v13  ;;  %2607 = vmatprep.subr.mxu0 %v494_v14  ;;  %v525_v56 = vld [vmem:[#allocation4 + $0x128] sm:$0xff]  ;;  %v524_v57 = vld [vmem:[#allocation4 + $0x120] sm:$0xff]  ;;  %v523_v58 = vld [vmem:[#allocation4 + $0x118] sm:$0xff]  ;;  %s455_s12 = scalar_lea.vmem %s3875_s10, %s2322_s21 }
  0x8f   : > { %2642 = vmatprep.subr.mxu1 %v511_v15  ;;  %2608 = vmatpush3.msra.mxu0 %v494_v14  ;;  %v522_v59 = vld [vmem:[#allocation4 + $0x110] sm:$0xff]  ;;  %v521_v60 = vld [vmem:[#allocation4 + $0x108] sm:$0xff]  ;;  %v520_v61 = vld [vmem:[#allocation4 + $0x100] sm:$0xff] }
  0x90   : > { %2643 = vmatpush3.msra.mxu1 %v511_v15  ;;  %2609 = vmatprep.subr.mxu0 %v493_v16  ;;  %v818_v63 = vld [vmem:[#allocation6 + $0xf8] sm:$0xff]  ;;  %v817_v0 = vld [vmem:[#allocation6 + $0xf0] sm:$0xff]  ;;  %v816_v1 = vld [vmem:[#allocation6 + $0xe8] sm:$0xff] }
  0x91   : > { %2644 = vmatprep.subr.mxu1 %v510_v17  ;;  %2610 = vmatpush3.msra.mxu0 %v493_v16  ;;  %v815_v2 = vld [vmem:[#allocation6 + $0xe0] sm:$0xff]  ;;  %v814_v3 = vld [vmem:[#allocation6 + $0xd8] sm:$0xff]  ;;  %v813_v4 = vld [vmem:[#allocation6 + $0xd0] sm:$0xff] }
  0x92   : > { %2645 = vmatpush3.msra.mxu1 %v510_v17  ;;  %2611 = vmatprep.subr.mxu0 %v492_v19  ;;  %v812_v5 = vld [vmem:[#allocation6 + $0xc8] sm:$0xff]  ;;  %v811_v6 = vld [vmem:[#allocation6 + $0xc0] sm:$0xff]  ;;  %v810_v7 = vld [vmem:[#allocation6 + $0xb8] sm:$0xff] }
  0x93   : > { %2646 = vmatprep.subr.mxu1 %v509_v20  ;;  %2612 = vmatpush3.msra.mxu0 %v492_v19  ;;  %v809_v8 = vld [vmem:[#allocation6 + $0xb0] sm:$0xff]  ;;  %v808_v9 = vld [vmem:[#allocation6 + $0xa8] sm:$0xff]  ;;  %v807_v10 = vld [vmem:[#allocation6 + $0xa0] sm:$0xff] }
  0x94   : > { %2647 = vmatpush3.msra.mxu1 %v509_v20  ;;  %2613 = vmatprep.subr.mxu0 %v491_v21  ;;  %v806_v11 = vld [vmem:[#allocation6 + $0x98] sm:$0xff]  ;;  %v805_v12 = vld [vmem:[#allocation6 + $0x90] sm:$0xff]  ;;  %v804_v13 = vld [vmem:[#allocation6 + $0x88] sm:$0xff] }
  0x95   : > { %2648 = vmatprep.subr.mxu1 %v508_v22  ;;  %2614 = vmatpush3.msra.mxu0 %v491_v21  ;;  %v803_v14 = vld [vmem:[#allocation6 + $0x80] sm:$0xff]  ;;  %v918_v15 = vld [vmem:[#allocation7 + $0x78] sm:$0xff]  ;;  %v917_v16 = vld [vmem:[#allocation7 + $0x70] sm:$0xff] }
  0x96   : > { %2649 = vmatpush3.msra.mxu1 %v508_v22  ;;  %2615 = vmatprep.subr.mxu0 %v490_v24  ;;  %v916_v17 = vld [vmem:[#allocation7 + $0x68] sm:$0xff]  ;;  %v915_v18 = vld [vmem:[#allocation7 + $0x60] sm:$0xff]  ;;  %v914_v19 = vld [vmem:[#allocation7 + $0x58] sm:$0xff] }
  0x97   : > { %2650 = vmatprep.subr.mxu1 %v507_v25  ;;  %2616 = vmatpush3.msra.mxu0 %v490_v24  ;;  %v913_v20 = vld [vmem:[#allocation7 + $0x50] sm:$0xff]  ;;  %v912_v21 = vld [vmem:[#allocation7 + $0x48] sm:$0xff]  ;;  %v911_v22 = vld [vmem:[#allocation7 + $0x40] sm:$0xff] }
  0x98   : > { %2651 = vmatpush3.msra.mxu1 %v507_v25  ;;  %2617 = vmatprep.subr.mxu0 %v489_v26  ;;  %v910_v24 = vld [vmem:[#allocation7 + $0x38] sm:$0xff]  ;;  %v909_v25 = vld [vmem:[#allocation7 + $0x30] sm:$0xff]  ;;  %v2296_v35 = vld [vmem:[%s3867_s2] ss:$0 sm:$0xff] }
  0x99   : > { %2652 = vmatprep.subr.mxu1 %v506_v27  ;;  %2618 = vmatpush3.msra.mxu0 %v489_v26  ;;  %v908_v26 = vld [vmem:[#allocation7 + $0x28] sm:$0xff]  ;;  %v2058_v33 = vld [vmem:[#allocation10 + $0xa0] sm:$0xff] }
  0x9a   : > { %2653 = vmatpush3.msra.mxu1 %v506_v27  ;;  %2619 = vmatprep.subr.mxu0 %v488_v31  ;;  %v907_v27 = vld [vmem:[#allocation7 + $0x20] sm:$0xff] }
  0x9b   : > { %2654 = vmatprep.subr.mxu1 %v505_v32  ;;  %2620 = vmatpush3.msra.mxu0 %v488_v31 }
  0x9c   : > { %2655 = vmatpush3.msra.mxu1 %v505_v32  ;;  %2621 = vmatprep.subr.mxu0 %v487_v36 }
  0x9d   : > { %2656 = vmatprep.subr.mxu1 %v504_v37  ;;  %2622 = vmatpush3.msra.mxu0 %v487_v36 }
  0x9e   : > { %2657 = vmatpush3.msra.mxu1 %v504_v37  ;;  %2623 = vmatprep.subr.mxu0 %v486_v39 }
  0x9f   : > { %2658 = vmatprep.subr.mxu1 %v503_v40  ;;  %2624 = vmatpush3.msra.mxu0 %v486_v39 }
  0xa0   : > { %2625 = vmatprep.mubr.msk.f32.mxu0 %vm541_vm1, %v540_v43  ;;  %2659 = vmatpush3.msra.mxu1 %v503_v40 }
  0xa1   : > { %2660 = vmatprep.mubr.f32.mxu1 %v3677_v28  ;;  %2626 = vmatmul.mubr.msk.f32.vlgmr.msra.gmra.mxu0 %vm542_vm3, %v539_v44 }
  0xa2   : > { %2661 = vmatmul.mubr.f32.vlgmr.msra.gmra.mxu1 %v3681_v29  ;;  %2663 = vmatprep.subr.mxu0 %v535_v45 }
  0xa3   : > { %2695 = vmatprep.mubr.msk.f32.mxu0 %vm554_vm4, %v552_v46  ;;  %2664 = vmatpush3.msra.mxu0 %v535_v45 }
  0xa4   : > { %2665 = vmatprep.subr.mxu0 %v534_v47  ;;  %2698 = vmatprep.subr.mxu1 %v818_v63 }
  0xa5   : > { %2666 = vmatpush3.msra.mxu0 %v534_v47  ;;  %2699 = vmatpush3.msra.mxu1 %v818_v63  ;;  %v906_v47 = vld [vmem:[#allocation7 + $0x18] sm:$0xff] }
  0xa6   : > { %2667 = vmatprep.subr.mxu0 %v533_v48  ;;  %2700 = vmatprep.subr.mxu1 %v817_v0 }
  0xa7   : > { %2668 = vmatpush3.msra.mxu0 %v533_v48  ;;  %2701 = vmatpush3.msra.mxu1 %v817_v0  ;;  %v905_v48 = vld [vmem:[#allocation7 + $0x10] sm:$0xff] }
  0xa8   : > { %2669 = vmatprep.subr.mxu0 %v532_v49  ;;  %2702 = vmatprep.subr.mxu1 %v816_v1 }
  0xa9   : > { %2670 = vmatpush3.msra.mxu0 %v532_v49  ;;  %2703 = vmatpush3.msra.mxu1 %v816_v1  ;;  %v904_v49 = vld [vmem:[#allocation7 + $0x8] sm:$0xff] }
  0xaa   : > { %2671 = vmatprep.subr.mxu0 %v531_v50  ;;  %2704 = vmatprep.subr.mxu1 %v815_v2 }
  0xab   : > { %2672 = vmatpush3.msra.mxu0 %v531_v50  ;;  %2705 = vmatpush3.msra.mxu1 %v815_v2  ;;  %v903_v50 = vld [vmem:[#allocation7] sm:$0xff] }
  0xac   : > { %2673 = vmatprep.subr.mxu0 %v530_v51  ;;  %2706 = vmatprep.subr.mxu1 %v814_v3 }
  0xad   : > { %2674 = vmatpush3.msra.mxu0 %v530_v51  ;;  %2707 = vmatpush3.msra.mxu1 %v814_v3  ;;  %v1038_v51 = vld [vmem:[#allocation6 + $0x278] sm:$0xff] }
  0xae   : > { %2675 = vmatprep.subr.mxu0 %v529_v52  ;;  %2708 = vmatprep.subr.mxu1 %v813_v4 }
  0xaf   : > { %2676 = vmatpush3.msra.mxu0 %v529_v52  ;;  %2709 = vmatpush3.msra.mxu1 %v813_v4  ;;  %v1021_v52 = vld [vmem:[#allocation6 + $0x1f8] sm:$0xff] }
  0xb0   : > { %2677 = vmatprep.subr.mxu0 %v528_v53  ;;  %2710 = vmatprep.subr.mxu1 %v812_v5 }
  0xb1   : > { %2678 = vmatpush3.msra.mxu0 %v528_v53  ;;  %2711 = vmatpush3.msra.mxu1 %v812_v5  ;;  %v1020_v53 = vld [vmem:[#allocation6 + $0x1f0] sm:$0xff] }
  0xb2   : > { %2679 = vmatprep.subr.mxu0 %v527_v54  ;;  %2712 = vmatprep.subr.mxu1 %v811_v6  ;;  %v1037_v5 = vld [vmem:[#allocation6 + $0x270] sm:$0xff] }
  0xb3   : > { %2680 = vmatpush3.msra.mxu0 %v527_v54  ;;  %2713 = vmatpush3.msra.mxu1 %v811_v6  ;;  %v1019_v54 = vld [vmem:[#allocation6 + $0x1e8] sm:$0xff] }
  0xb4   : > { %2681 = vmatprep.subr.mxu0 %v526_v55  ;;  %2714 = vmatprep.subr.mxu1 %v810_v7  ;;  %v1036_v6 = vld [vmem:[#allocation6 + $0x268] sm:$0xff] }
  0xb5   : > { %2682 = vmatpush3.msra.mxu0 %v526_v55  ;;  %2715 = vmatpush3.msra.mxu1 %v810_v7  ;;  %v1018_v55 = vld [vmem:[#allocation6 + $0x1e0] sm:$0xff] }
  0xb6   : > { %2683 = vmatprep.subr.mxu0 %v525_v56  ;;  %2716 = vmatprep.subr.mxu1 %v809_v8  ;;  %v1035_v7 = vld [vmem:[#allocation6 + $0x260] sm:$0xff] }
  0xb7   : > { %2684 = vmatpush3.msra.mxu0 %v525_v56  ;;  %2717 = vmatpush3.msra.mxu1 %v809_v8  ;;  %v1017_v56 = vld [vmem:[#allocation6 + $0x1d8] sm:$0xff] }
  0xb8   : > { %2685 = vmatprep.subr.mxu0 %v524_v57  ;;  %2718 = vmatprep.subr.mxu1 %v808_v9  ;;  %v1034_v8 = vld [vmem:[#allocation6 + $0x258] sm:$0xff] }
  0xb9   : > { %2686 = vmatpush3.msra.mxu0 %v524_v57  ;;  %2719 = vmatpush3.msra.mxu1 %v808_v9  ;;  %v1016_v57 = vld [vmem:[#allocation6 + $0x1d0] sm:$0xff] }
  0xba   : > { %2687 = vmatprep.subr.mxu0 %v523_v58  ;;  %2720 = vmatprep.subr.mxu1 %v807_v10  ;;  %v1033_v9 = vld [vmem:[#allocation6 + $0x250] sm:$0xff] }
  0xbb   : > { %2688 = vmatpush3.msra.mxu0 %v523_v58  ;;  %2721 = vmatpush3.msra.mxu1 %v807_v10  ;;  %v1015_v58 = vld [vmem:[#allocation6 + $0x1c8] sm:$0xff] }
  0xbc   : > { %2689 = vmatprep.subr.mxu0 %v522_v59  ;;  %2722 = vmatprep.subr.mxu1 %v806_v11  ;;  %v1032_v10 = vld [vmem:[#allocation6 + $0x248] sm:$0xff] }
  0xbd   : > { %2690 = vmatpush3.msra.mxu0 %v522_v59  ;;  %2723 = vmatpush3.msra.mxu1 %v806_v11  ;;  %v1014_v59 = vld [vmem:[#allocation6 + $0x1c0] sm:$0xff] }
  0xbe   : > { %2691 = vmatprep.subr.mxu0 %v521_v60  ;;  %2724 = vmatprep.subr.mxu1 %v805_v12  ;;  %v1031_v11 = vld [vmem:[#allocation6 + $0x240] sm:$0xff] }
  0xbf   : > { %2692 = vmatpush3.msra.mxu0 %v521_v60  ;;  %2725 = vmatpush3.msra.mxu1 %v805_v12  ;;  %v1013_v60 = vld [vmem:[#allocation6 + $0x1b8] sm:$0xff] }
  0xc0   : > { %2693 = vmatprep.subr.mxu0 %v520_v61  ;;  %2726 = vmatprep.subr.mxu1 %v804_v13  ;;  %v1030_v12 = vld [vmem:[#allocation6 + $0x238] sm:$0xff] }
  0xc1   : > { %2694 = vmatpush3.msra.mxu0 %v520_v61  ;;  %2727 = vmatpush3.msra.mxu1 %v804_v13  ;;  %v1012_v61 = vld [vmem:[#allocation6 + $0x1b0] sm:$0xff] }
  0xc2   : > { %2696 = vmatmul.mubr.msk.f32.vlgmr.msra.gmra.mxu0 %vm555_vm5, %v553_v62  ;;  %2728 = vmatprep.subr.mxu1 %v803_v14  ;;  %v2297_v62 = vld [vmem:[%s3869_s4] ss:$0 sm:$0xff]  ;;  %v1029_v13 = vld [vmem:[#allocation6 + $0x230] sm:$0xff] }
  0xc3   : > { %2729 = vmatpush3.msra.mxu1 %v803_v14  ;;  %2733 = vmatprep.subr.mxu0 %v918_v15  ;;  %v1028_v14 = vld [vmem:[#allocation6 + $0x228] sm:$0xff] }
  0xc4   : > { %2734 = vmatpush3.msra.mxu0 %v918_v15  ;;  %2768 = vmatprep.subr.mxu1 %v1021_v52  ;;  %v1011_v15 = vld [vmem:[#allocation6 + $0x1a8] sm:$0xff] }
  0xc5   : > { %2735 = vmatprep.subr.mxu0 %v917_v16 }
  0xc6   : > { %2736 = vmatpush3.msra.mxu0 %v917_v16  ;;  %v1027_v16 = vld [vmem:[#allocation6 + $0x220] sm:$0xff] }
  0xc7   : > { %2737 = vmatprep.subr.mxu0 %v916_v17 }
  0xc8   : > { %2738 = vmatpush3.msra.mxu0 %v916_v17  ;;  %v1010_v17 = vld [vmem:[#allocation6 + $0x1a0] sm:$0xff] }
  0xc9   : > { %2739 = vmatprep.subr.mxu0 %v915_v18 }
  0xca   : > { %2740 = vmatpush3.msra.mxu0 %v915_v18  ;;  %v1026_v18 = vld [vmem:[#allocation6 + $0x218] sm:$0xff] }
  0xcb   : > { %2741 = vmatprep.subr.mxu0 %v914_v19 }
  0xcc   : > { %2742 = vmatpush3.msra.mxu0 %v914_v19  ;;  %v1009_v19 = vld [vmem:[#allocation6 + $0x198] sm:$0xff] }
  0xcd   : > { %2743 = vmatprep.subr.mxu0 %v913_v20 }
  0xce   : > { %2744 = vmatpush3.msra.mxu0 %v913_v20  ;;  %v1025_v20 = vld [vmem:[#allocation6 + $0x210] sm:$0xff] }
  0xcf   : > { %2745 = vmatprep.subr.mxu0 %v912_v21 }
  0xd0   : > { %2746 = vmatpush3.msra.mxu0 %v912_v21  ;;  %v1008_v21 = vld [vmem:[#allocation6 + $0x190] sm:$0xff] }
  0xd1   : > { %2747 = vmatprep.subr.mxu0 %v911_v22 }
  0xd2   : > { %2748 = vmatpush3.msra.mxu0 %v911_v22  ;;  %v1024_v22 = vld [vmem:[#allocation6 + $0x208] sm:$0xff] }
  0xd3   : > { %2749 = vmatprep.subr.mxu0 %v910_v24 }
  0xd4   : > { %2750 = vmatpush3.msra.mxu0 %v910_v24  ;;  %v1007_v24 = vld [vmem:[#allocation6 + $0x188] sm:$0xff] }
  0xd5   : > { %2751 = vmatprep.subr.mxu0 %v909_v25 }
  0xd6   : > { %2752 = vmatpush3.msra.mxu0 %v909_v25  ;;  %v1023_v25 = vld [vmem:[#allocation6 + $0x200] sm:$0xff] }
  0xd7   : > { %2753 = vmatprep.subr.mxu0 %v908_v26 }
  0xd8   : > { %2754 = vmatpush3.msra.mxu0 %v908_v26  ;;  %v1006_v26 = vld [vmem:[#allocation6 + $0x180] sm:$0xff] }
  0xd9   : > { %2755 = vmatprep.subr.mxu0 %v907_v27 }
  0xda   : > { %2756 = vmatpush3.msra.mxu0 %v907_v27  ;;  %v1055_v27 = vld [vmem:[#allocation6 + $0x2f8] sm:$0xff] }
  0xdb   : > { %2757 = vmatprep.subr.mxu0 %v906_v47 }
  0xdc   : > { %2758 = vmatpush3.msra.mxu0 %v906_v47  ;;  %v1053_v47 = vld [vmem:[#allocation6 + $0x2e8] sm:$0xff] }
  0xdd   : > { %2759 = vmatprep.subr.mxu0 %v905_v48 }
  0xde   : > { %2760 = vmatpush3.msra.mxu0 %v905_v48  ;;  %v1052_v48 = vld [vmem:[#allocation6 + $0x2e0] sm:$0xff] }
  0xdf   : > { %2761 = vmatprep.subr.mxu0 %v904_v49 }
  0xe0   : > { %2762 = vmatpush3.msra.mxu0 %v904_v49  ;;  %v1051_v49 = vld [vmem:[#allocation6 + $0x2d8] sm:$0xff] }
  0xe1   : > { %2763 = vmatprep.subr.mxu0 %v903_v50 }
  0xe2   : > { %2764 = vmatpush3.msra.mxu0 %v903_v50  ;;  %v1050_v50 = vld [vmem:[#allocation6 + $0x2d0] sm:$0xff] }
  0xe3   : > { %2803 = vmatprep.subr.mxu0 %v1038_v51 }
 0x161   : > { %v2627_v28 = vpop.f32.mrf.mxu0 }
 0x162   : > { %v2662_v29 = vpop.f32.mrf.mxu1 }
 0x163   : > { %v628_v30 = vpop.f32.mrf.mxu0  ;;  %v709_v32 = vadd.f32 %v2662_v29, %v2627_v28  ;;  %v2298_v28 = vld [vmem:[%s3871_s6] ss:$0 sm:$0xff] }
 0x164   : > { %v703_v31 = vpop.f32.mrf.mxu1 }
 0x165   : > { %v704_v36 = vadd.f32 %v703_v31, %v628_v30 }
 0x182   : > { %v2697_v34 = vpop.f32.mrf.mxu0 }
 0x183   : > { %v788_v37 = vadd.f32 %v2697_v34, %v709_v32 }
 0x184   : > { %v778_v39 = vpop.f32.mrf.mxu0 }
 0x185   : > { %v3728_v40 = vadd.f32 %v2296_v35, %v788_v37  ;;  %v787_v41 = vadd.f32 %v778_v39, %v704_v36 }
 0x187   : > { %v3730_v42 = vadd.f32 %v2296_v35, %v787_v41  ;;  %v799_v43 = vmax.f32 %v3728_v40, 0.0 }
 0x189   : > { %v798_v44 = vmax.f32 %v3730_v42, 0.0  ;;  %v801_v46 = vmax.f32 %v799_v43, 0.0 }
 0x18b   : > { %v800_v45 = vmax.f32 %v798_v44, 0.0 }
 0x18d   : > { %2730 = vmatprep.mubr.f32.mxu1 %v800_v45  ;;  %v1054_v45 = vld [vmem:[#allocation6 + $0x2f0] sm:$0xff] }
 0x18e   : > { %2731 = vmatmul.mubr.f32.vlgmr.msra.gmra.mxu1 %v801_v46 }
 0x18f   : > { %2769 = vmatpush3.msra.mxu1 %v1021_v52  ;;  %v1048_v52 = vld [vmem:[#allocation6 + $0x2c0] sm:$0xff] }
 0x190   : > { %2770 = vmatprep.subr.mxu1 %v1020_v53 }
 0x191   : > { %2771 = vmatpush3.msra.mxu1 %v1020_v53  ;;  %v1047_v53 = vld [vmem:[#allocation6 + $0x2b8] sm:$0xff] }
 0x192   : > { %2772 = vmatprep.subr.mxu1 %v1019_v54 }
 0x193   : > { %2773 = vmatpush3.msra.mxu1 %v1019_v54  ;;  %v1046_v54 = vld [vmem:[#allocation6 + $0x2b0] sm:$0xff] }
 0x194   : > { %2774 = vmatprep.subr.mxu1 %v1018_v55 }
 0x195   : > { %2775 = vmatpush3.msra.mxu1 %v1018_v55  ;;  %v1045_v55 = vld [vmem:[#allocation6 + $0x2a8] sm:$0xff] }
 0x196   : > { %2776 = vmatprep.subr.mxu1 %v1017_v56 }
 0x197   : > { %2777 = vmatpush3.msra.mxu1 %v1017_v56  ;;  %v1044_v56 = vld [vmem:[#allocation6 + $0x2a0] sm:$0xff] }
 0x198   : > { %2778 = vmatprep.subr.mxu1 %v1016_v57 }
 0x199   : > { %2779 = vmatpush3.msra.mxu1 %v1016_v57  ;;  %v1043_v57 = vld [vmem:[#allocation6 + $0x298] sm:$0xff] }
 0x19a   : > { %2780 = vmatprep.subr.mxu1 %v1015_v58 }
 0x19b   : > { %2781 = vmatpush3.msra.mxu1 %v1015_v58  ;;  %v1042_v58 = vld [vmem:[#allocation6 + $0x290] sm:$0xff] }
 0x19c   : > { %2782 = vmatprep.subr.mxu1 %v1014_v59 }
 0x19d   : > { %2783 = vmatpush3.msra.mxu1 %v1014_v59  ;;  %v1041_v59 = vld [vmem:[#allocation6 + $0x288] sm:$0xff] }
 0x19e   : > { %2784 = vmatprep.subr.mxu1 %v1013_v60 }
 0x19f   : > { %2785 = vmatpush3.msra.mxu1 %v1013_v60  ;;  %v1040_v60 = vld [vmem:[#allocation6 + $0x280] sm:$0xff] }
 0x1a0   : > { %2786 = vmatprep.subr.mxu1 %v1012_v61 }
 0x1a1   : > { %2787 = vmatpush3.msra.mxu1 %v1012_v61 }
 0x1a2   : > { %2788 = vmatprep.subr.mxu1 %v1011_v15 }
 0x1a3   : > { %2789 = vmatpush3.msra.mxu1 %v1011_v15  ;;  %v1441_v15 = vld [vmem:[#allocation6 + $0x378] sm:$0xff] }
 0x1a4   : > { %2790 = vmatprep.subr.mxu1 %v1010_v17 }
 0x1a5   : > { %2791 = vmatpush3.msra.mxu1 %v1010_v17  ;;  %v1439_v17 = vld [vmem:[#allocation6 + $0x368] sm:$0xff] }
 0x1a6   : > { %2792 = vmatprep.subr.mxu1 %v1009_v19 }
 0x1a7   : > { %2793 = vmatpush3.msra.mxu1 %v1009_v19  ;;  %v1437_v19 = vld [vmem:[#allocation6 + $0x358] sm:$0xff] }
 0x1a8   : > { %2794 = vmatprep.subr.mxu1 %v1008_v21 }
 0x1a9   : > { %2795 = vmatpush3.msra.mxu1 %v1008_v21  ;;  %v1435_v21 = vld [vmem:[#allocation6 + $0x348] sm:$0xff] }
 0x1aa   : > { %2796 = vmatprep.subr.mxu1 %v1007_v24 }
 0x1ab   : > { %2797 = vmatpush3.msra.mxu1 %v1007_v24  ;;  %v1433_v24 = vld [vmem:[#allocation6 + $0x338] sm:$0xff] }
 0x1ac   : > { %2798 = vmatprep.subr.mxu1 %v1006_v26 }
 0x1ad   : > { %2799 = vmatpush3.msra.mxu1 %v1006_v26 }
 0x1ae   : > { %2838 = vmatprep.subr.mxu1 %v1055_v27 }
 0x24e   : > { %v2732_v63 = vpop.f32.mrf.mxu1 }
 0x24f   : > { %v898_v0 = vadd.f32 %v2732_v63, %v2297_v62  ;;  %v1336_v63 = vld [vmem:[#allocation7 + $0xf0] sm:$0xff] }
 0x250   : > { %v892_v1 = vpop.f32.mrf.mxu1 }
 0x251   : > { %v893_v2 = vadd.f32 %v2297_v62, %v892_v1  ;;  %v902_v4 = vmax.f32 %v898_v0, 0.0  ;;  %v1337_v62 = vld [vmem:[#allocation7 + $0xf8] sm:$0xff]  ;;  %v1335_v0 = vld [vmem:[#allocation7 + $0xe8] sm:$0xff]  ;;  %v1334_v1 = vld [vmem:[#allocation7 + $0xe0] sm:$0xff] }
 0x253   : > { %v901_v3 = vmax.f32 %v893_v2, 0.0  ;;  %v1333_v2 = vld [vmem:[#allocation7 + $0xd8] sm:$0xff] }
 0x255   : > { %2765 = vmatprep.mubr.f32.mxu0 %v901_v3  ;;  %v1332_v3 = vld [vmem:[#allocation7 + $0xd0] sm:$0xff] }
 0x256   : > { %2766 = vmatmul.mubr.f32.vlgmr.msra.gmra.mxu0 %v902_v4  ;;  %v1331_v4 = vld [vmem:[#allocation7 + $0xc8] sm:$0xff] }
 0x257   : > { %2804 = vmatpush3.msra.mxu0 %v1038_v51  ;;  %v1049_v51 = vld [vmem:[#allocation6 + $0x2c8] sm:$0xff] }
 0x258   : > { %2805 = vmatprep.subr.mxu0 %v1037_v5 }
 0x259   : > { %2806 = vmatpush3.msra.mxu0 %v1037_v5  ;;  %v1330_v5 = vld [vmem:[#allocation7 + $0xc0] sm:$0xff] }
 0x25a   : > { %2807 = vmatprep.subr.mxu0 %v1036_v6 }
 0x25b   : > { %2808 = vmatpush3.msra.mxu0 %v1036_v6  ;;  %v1329_v6 = vld [vmem:[#allocation7 + $0xb8] sm:$0xff] }
 0x25c   : > { %2809 = vmatprep.subr.mxu0 %v1035_v7 }
 0x25d   : > { %2810 = vmatpush3.msra.mxu0 %v1035_v7  ;;  %v1328_v7 = vld [vmem:[#allocation7 + $0xb0] sm:$0xff] }
 0x25e   : > { %2811 = vmatprep.subr.mxu0 %v1034_v8 }
 0x25f   : > { %2812 = vmatpush3.msra.mxu0 %v1034_v8  ;;  %v1327_v8 = vld [vmem:[#allocation7 + $0xa8] sm:$0xff] }
 0x260   : > { %2813 = vmatprep.subr.mxu0 %v1033_v9 }
 0x261   : > { %2814 = vmatpush3.msra.mxu0 %v1033_v9  ;;  %v1326_v9 = vld [vmem:[#allocation7 + $0xa0] sm:$0xff] }
 0x262   : > { %2815 = vmatprep.subr.mxu0 %v1032_v10 }
 0x263   : > { %2816 = vmatpush3.msra.mxu0 %v1032_v10  ;;  %v1325_v10 = vld [vmem:[#allocation7 + $0x98] sm:$0xff] }
 0x264   : > { %2817 = vmatprep.subr.mxu0 %v1031_v11 }
 0x265   : > { %2818 = vmatpush3.msra.mxu0 %v1031_v11  ;;  %v1324_v11 = vld [vmem:[#allocation7 + $0x90] sm:$0xff] }
 0x266   : > { %2819 = vmatprep.subr.mxu0 %v1030_v12 }
 0x267   : > { %2820 = vmatpush3.msra.mxu0 %v1030_v12  ;;  %v1323_v12 = vld [vmem:[#allocation7 + $0x88] sm:$0xff] }
 0x268   : > { %2821 = vmatprep.subr.mxu0 %v1029_v13 }
 0x269   : > { %2822 = vmatpush3.msra.mxu0 %v1029_v13  ;;  %v1322_v13 = vld [vmem:[#allocation7 + $0x80] sm:$0xff] }
 0x26a   : > { %2823 = vmatprep.subr.mxu0 %v1028_v14 }
 0x26b   : > { %2824 = vmatpush3.msra.mxu0 %v1028_v14  ;;  %v1458_v14 = vld [vmem:[#allocation6 + $0x3f8] sm:$0xff] }
 0x26c   : > { %2825 = vmatprep.subr.mxu0 %v1027_v16 }
 0x26d   : > { %2826 = vmatpush3.msra.mxu0 %v1027_v16  ;;  %v1440_v16 = vld [vmem:[#allocation6 + $0x370] sm:$0xff] }
 0x26e   : > { %2827 = vmatprep.subr.mxu0 %v1026_v18 }
 0x26f   : > { %2828 = vmatpush3.msra.mxu0 %v1026_v18  ;;  %v1438_v18 = vld [vmem:[#allocation6 + $0x360] sm:$0xff] }
 0x270   : > { %2829 = vmatprep.subr.mxu0 %v1025_v20 }
 0x271   : > { %2830 = vmatpush3.msra.mxu0 %v1025_v20  ;;  %v1436_v20 = vld [vmem:[#allocation6 + $0x350] sm:$0xff] }
 0x272   : > { %2831 = vmatprep.subr.mxu0 %v1024_v22 }
 0x273   : > { %2832 = vmatpush3.msra.mxu0 %v1024_v22  ;;  %v1434_v22 = vld [vmem:[#allocation6 + $0x340] sm:$0xff] }
 0x274   : > { %2833 = vmatprep.subr.mxu0 %v1023_v25 }
 0x275   : > { %2834 = vmatpush3.msra.mxu0 %v1023_v25  ;;  %v1432_v25 = vld [vmem:[#allocation6 + $0x330] sm:$0xff] }
 0x276   : > { %2873 = vmatprep.subr.mxu0 %v1337_v62 }
 0x316   : > { %v2767_v29 = vpop.f32.mrf.mxu0 }
 0x317   : > { %v998_v30 = vadd.f32 %v2767_v29, %v2298_v28 }
 0x318   : > { %v992_v31 = vpop.f32.mrf.mxu0 }
 0x319   : > { %v3746_v32 = vadd.f32 %v998_v30, %v799_v43  ;;  %v993_v34 = vadd.f32 %v2298_v28, %v992_v31 }
 0x31b   : > { %v3749_v35 = vmax.f32 %v3746_v32, 0.0  ;;  %v3753_v36 = vadd.f32 %v993_v34, %v798_v44 }
 0x31d   : > { %v3756_v37 = vmax.f32 %v3753_v36, 0.0  ;;  %v1057_v40 = vrot.slane %v3749_v35, 5  ;;  %v1070_v44 = vrot.slane %v3749_v35, 3 }
 0x31f   : > { %2835 = vmatprep.mubr.f32.mxu0 %v3756_v37  ;;  %v1056_v39 = vrot.slane %v3756_v37, 5  ;;  %v1069_v41 = vrot.slane %v3756_v37, 3  ;;  %v2304_v37 = vld [vmem:[%s3869_s4 + $0x1] ss:$0 sm:$0xff] }
 0x320   : > { %2836 = vmatmul.mubr.f32.vlgmr.msra.gmra.mxu0 %v3749_v35 }
 0x321   : > { %v1060_v42 = vsel %vm1058_vm6, %v1057_v40, %v1056_v39  ;;  %v1059_v43 = vsel %vm1058_vm6, %v1056_v39, %v1057_v40  ;;  %v1072_v46 = vsel %vm1071_vm9, %v1069_v41, %v1070_v44  ;;  %v1073_v61 = vsel %vm1071_vm9, %v1070_v44, %v1069_v41  ;;  %2874 = vmatpush3.msra.mxu0 %v1337_v62  ;;  %v1444_v62 = vld [vmem:[#allocation6 + $0x388] sm:$0xff] }
 0x322   : > { %2800 = vmatprep.mubr.msk.f32.mxu1 %vm1061_vm7, %v1060_v42  ;;  %2875 = vmatprep.subr.mxu0 %v1336_v63 }
 0x323   : > { %2801 = vmatmul.mubr.msk.f32.vlgmr.msra.gmra.mxu1 %vm1062_vm8, %v1059_v43  ;;  %2876 = vmatpush3.msra.mxu0 %v1336_v63  ;;  %v1427_v63 = vld [vmem:[#allocation6 + $0x308] sm:$0xff] }
 0x324   : > { %2839 = vmatpush3.msra.mxu1 %v1055_v27  ;;  %2870 = vmatprep.mubr.msk.f32.mxu1 %vm1074_vm10, %v1072_v46  ;;  %v1456_v46 = vld [vmem:[#allocation6 + $0x3e8] sm:$0xff] }
 0x325   : > { %2840 = vmatprep.subr.mxu1 %v1054_v45  ;;  %2877 = vmatprep.subr.mxu0 %v1335_v0 }
 0x326   : > { %2841 = vmatpush3.msra.mxu1 %v1054_v45  ;;  %2878 = vmatpush3.msra.mxu0 %v1335_v0  ;;  %v1457_v45 = vld [vmem:[#allocation6 + $0x3f0] sm:$0xff]  ;;  %v1443_v0 = vld [vmem:[#allocation6 + $0x380] sm:$0xff] }
 0x327   : > { %2842 = vmatprep.subr.mxu1 %v1053_v47  ;;  %2879 = vmatprep.subr.mxu0 %v1334_v1 }
 0x328   : > { %2843 = vmatpush3.msra.mxu1 %v1053_v47  ;;  %2880 = vmatpush3.msra.mxu0 %v1334_v1  ;;  %v1455_v47 = vld [vmem:[#allocation6 + $0x3e0] sm:$0xff] }
 0x329   : > { %2844 = vmatprep.subr.mxu1 %v1052_v48  ;;  %2881 = vmatprep.subr.mxu0 %v1333_v2  ;;  %v1426_v1 = vld [vmem:[#allocation6 + $0x300] sm:$0xff] }
 0x32a   : > { %2845 = vmatpush3.msra.mxu1 %v1052_v48  ;;  %2882 = vmatpush3.msra.mxu0 %v1333_v2  ;;  %v1454_v48 = vld [vmem:[#allocation6 + $0x3d8] sm:$0xff] }
 0x32b   : > { %2846 = vmatprep.subr.mxu1 %v1051_v49  ;;  %2883 = vmatprep.subr.mxu0 %v1332_v3  ;;  %v1475_v2 = vld [vmem:[#allocation6 + $0x478] sm:$0xff] }
 0x32c   : > { %2847 = vmatpush3.msra.mxu1 %v1051_v49  ;;  %2884 = vmatpush3.msra.mxu0 %v1332_v3  ;;  %v1453_v49 = vld [vmem:[#allocation6 + $0x3d0] sm:$0xff]  ;;  %v2306_v3 = vld [vmem:[%s3871_s6 + $0x1] ss:$0 sm:$0xff] }
 0x32d   : > { %2848 = vmatprep.subr.mxu1 %v1050_v50  ;;  %2885 = vmatprep.subr.mxu0 %v1331_v4 }
 0x32e   : > { %2849 = vmatpush3.msra.mxu1 %v1050_v50  ;;  %2886 = vmatpush3.msra.mxu0 %v1331_v4  ;;  %v1452_v50 = vld [vmem:[#allocation6 + $0x3c8] sm:$0xff] }
 0x32f   : > { %2850 = vmatprep.subr.mxu1 %v1049_v51  ;;  %2887 = vmatprep.subr.mxu0 %v1330_v5 }
 0x330   : > { %2851 = vmatpush3.msra.mxu1 %v1049_v51  ;;  %2888 = vmatpush3.msra.mxu0 %v1330_v5  ;;  %v1451_v51 = vld [vmem:[#allocation6 + $0x3c0] sm:$0xff] }
 0x331   : > { %2852 = vmatprep.subr.mxu1 %v1048_v52  ;;  %2889 = vmatprep.subr.mxu0 %v1329_v6 }
 0x332   : > { %2853 = vmatpush3.msra.mxu1 %v1048_v52  ;;  %2890 = vmatpush3.msra.mxu0 %v1329_v6  ;;  %v1450_v52 = vld [vmem:[#allocation6 + $0x3b8] sm:$0xff] }
 0x333   : > { %2854 = vmatprep.subr.mxu1 %v1047_v53  ;;  %2891 = vmatprep.subr.mxu0 %v1328_v7 }
 0x334   : > { %2855 = vmatpush3.msra.mxu1 %v1047_v53  ;;  %2892 = vmatpush3.msra.mxu0 %v1328_v7  ;;  %v1449_v53 = vld [vmem:[#allocation6 + $0x3b0] sm:$0xff] }
 0x335   : > { %2856 = vmatprep.subr.mxu1 %v1046_v54  ;;  %2893 = vmatprep.subr.mxu0 %v1327_v8 }
 0x336   : > { %2857 = vmatpush3.msra.mxu1 %v1046_v54  ;;  %2894 = vmatpush3.msra.mxu0 %v1327_v8  ;;  %v1448_v54 = vld [vmem:[#allocation6 + $0x3a8] sm:$0xff] }
 0x337   : > { %2858 = vmatprep.subr.mxu1 %v1045_v55  ;;  %2895 = vmatprep.subr.mxu0 %v1326_v9 }
 0x338   : > { %2859 = vmatpush3.msra.mxu1 %v1045_v55  ;;  %2896 = vmatpush3.msra.mxu0 %v1326_v9  ;;  %v1431_v55 = vld [vmem:[#allocation6 + $0x328] sm:$0xff] }
 0x339   : > { %2860 = vmatprep.subr.mxu1 %v1044_v56  ;;  %2897 = vmatprep.subr.mxu0 %v1325_v10 }
 0x33a   : > { %2861 = vmatpush3.msra.mxu1 %v1044_v56  ;;  %2898 = vmatpush3.msra.mxu0 %v1325_v10  ;;  %v1447_v56 = vld [vmem:[#allocation6 + $0x3a0] sm:$0xff] }
 0x33b   : > { %2862 = vmatprep.subr.mxu1 %v1043_v57  ;;  %2899 = vmatprep.subr.mxu0 %v1324_v11 }
 0x33c   : > { %2863 = vmatpush3.msra.mxu1 %v1043_v57  ;;  %2900 = vmatpush3.msra.mxu0 %v1324_v11  ;;  %v1430_v57 = vld [vmem:[#allocation6 + $0x320] sm:$0xff] }
 0x33d   : > { %2864 = vmatprep.subr.mxu1 %v1042_v58  ;;  %2901 = vmatprep.subr.mxu0 %v1323_v12 }
 0x33e   : > { %2865 = vmatpush3.msra.mxu1 %v1042_v58  ;;  %2902 = vmatpush3.msra.mxu0 %v1323_v12  ;;  %v1446_v58 = vld [vmem:[#allocation6 + $0x398] sm:$0xff] }
 0x33f   : > { %2866 = vmatprep.subr.mxu1 %v1041_v59  ;;  %2903 = vmatprep.subr.mxu0 %v1322_v13 }
 0x340   : > { %2867 = vmatpush3.msra.mxu1 %v1041_v59  ;;  %2904 = vmatpush3.msra.mxu0 %v1322_v13  ;;  %v1429_v59 = vld [vmem:[#allocation6 + $0x318] sm:$0xff] }
 0x341   : > { %2868 = vmatprep.subr.mxu1 %v1040_v60  ;;  %2943 = vmatprep.subr.mxu0 %v1458_v14 }
 0x342   : > { %2869 = vmatpush3.msra.mxu1 %v1040_v60  ;;  %v1445_v60 = vld [vmem:[#allocation6 + $0x390] sm:$0xff] }
 0x343   : > { %2871 = vmatmul.mubr.msk.f32.vlgmr.msra.gmra.mxu1 %vm1075_vm11, %v1073_v61  ;;  %2908 = vmatprep.subr.mxu1 %v1441_v15  ;;  %v1428_v61 = vld [vmem:[#allocation6 + $0x310] sm:$0xff] }
 0x344   : > { %2909 = vmatpush3.msra.mxu1 %v1441_v15 }
 0x345   : > { %2910 = vmatprep.subr.mxu1 %v1440_v16 }
 0x346   : > { %2911 = vmatpush3.msra.mxu1 %v1440_v16 }
 0x347   : > { %2912 = vmatprep.subr.mxu1 %v1439_v17 }
 0x348   : > { %2913 = vmatpush3.msra.mxu1 %v1439_v17 }
 0x349   : > { %2914 = vmatprep.subr.mxu1 %v1438_v18 }
 0x34a   : > { %2915 = vmatpush3.msra.mxu1 %v1438_v18  ;;  %v1473_v18 = vld [vmem:[#allocation6 + $0x468] sm:$0xff] }
 0x34b   : > { %2916 = vmatprep.subr.mxu1 %v1437_v19 }
 0x34c   : > { %2917 = vmatpush3.msra.mxu1 %v1437_v19  ;;  %v1472_v19 = vld [vmem:[#allocation6 + $0x460] sm:$0xff] }
 0x34d   : > { %2918 = vmatprep.subr.mxu1 %v1436_v20 }
 0x34e   : > { %2919 = vmatpush3.msra.mxu1 %v1436_v20  ;;  %v1471_v20 = vld [vmem:[#allocation6 + $0x458] sm:$0xff] }
 0x34f   : > { %2920 = vmatprep.subr.mxu1 %v1435_v21 }
 0x350   : > { %2921 = vmatpush3.msra.mxu1 %v1435_v21  ;;  %v1470_v21 = vld [vmem:[#allocation6 + $0x450] sm:$0xff] }
 0x351   : > { %2922 = vmatprep.subr.mxu1 %v1434_v22 }
 0x352   : > { %2923 = vmatpush3.msra.mxu1 %v1434_v22  ;;  %v1469_v22 = vld [vmem:[#allocation6 + $0x448] sm:$0xff] }
 0x353   : > { %2924 = vmatprep.subr.mxu1 %v1433_v24 }
 0x354   : > { %2925 = vmatpush3.msra.mxu1 %v1433_v24  ;;  %v1468_v24 = vld [vmem:[#allocation6 + $0x440] sm:$0xff] }
 0x355   : > { %2926 = vmatprep.subr.mxu1 %v1432_v25 }
 0x356   : > { %2927 = vmatpush3.msra.mxu1 %v1432_v25  ;;  %v1467_v25 = vld [vmem:[#allocation6 + $0x438] sm:$0xff] }
 0x357   : > { %2928 = vmatprep.subr.mxu1 %v1431_v55 }
 0x358   : > { %2929 = vmatpush3.msra.mxu1 %v1431_v55  ;;  %v1859_v55 = vld [vmem:[#allocation9 + $0xf0] sm:$0xff] }
 0x359   : > { %2930 = vmatprep.subr.mxu1 %v1430_v57 }
 0x35a   : > { %2931 = vmatpush3.msra.mxu1 %v1430_v57  ;;  %v1857_v57 = vld [vmem:[#allocation9 + $0xe0] sm:$0xff] }
 0x35b   : > { %2932 = vmatprep.subr.mxu1 %v1429_v59 }
 0x35c   : > { %2933 = vmatpush3.msra.mxu1 %v1429_v59  ;;  %v3809_v59 = vld [vmem:[#allocation10 + $0x78] sm:$0xff] }
 0x35d   : > { %2934 = vmatprep.subr.mxu1 %v1428_v61 }
 0x35e   : > { %2935 = vmatpush3.msra.mxu1 %v1428_v61  ;;  %v1854_v61 = vld [vmem:[#allocation9 + $0xc8] sm:$0xff] }
 0x35f   : > { %2936 = vmatprep.subr.mxu1 %v1427_v63 }
 0x360   : > { %2937 = vmatpush3.msra.mxu1 %v1427_v63  ;;  %v1852_v63 = vld [vmem:[#allocation9 + $0xb8] sm:$0xff] }
 0x361   : > { %2938 = vmatprep.subr.mxu1 %v1426_v1 }
 0x362   : > { %2939 = vmatpush3.msra.mxu1 %v1426_v1  ;;  %v1850_v1 = vld [vmem:[#allocation9 + $0xa8] sm:$0xff] }
 0x363   : > { %2978 = vmatprep.subr.mxu1 %v1475_v2 }
 0x3e0   : > { %v2837_v27 = vpop.f32.mrf.mxu0 }
 0x3e2   : > { %v1223_v30 = vpop.f32.mrf.mxu0 }
 0x3e3   : > { %v2802_v26 = vpop.f32.mrf.mxu1 }
 0x3e4   : > { %v1229_v29 = vadd.f32 %v2837_v27, %v2802_v26  ;;  %v1466_v26 = vld [vmem:[#allocation6 + $0x430] sm:$0xff]  ;;  %v1465_v27 = vld [vmem:[#allocation6 + $0x428] sm:$0xff] }
 0x3e5   : > { %v1148_v28 = vpop.f32.mrf.mxu1 }
 0x3e6   : > { %v1224_v34 = vadd.f32 %v1223_v30, %v1148_v28  ;;  %v1464_v28 = vld [vmem:[#allocation6 + $0x420] sm:$0xff]  ;;  %v1462_v30 = vld [vmem:[#allocation6 + $0x410] sm:$0xff] }
 0x403   : > { %v2872_v31 = vpop.f32.mrf.mxu1 }
 0x404   : > { %v1308_v35 = vadd.f32 %v2872_v31, %v1229_v29  ;;  %v1463_v29 = vld [vmem:[#allocation6 + $0x418] sm:$0xff]  ;;  %v1461_v31 = vld [vmem:[#allocation6 + $0x408] sm:$0xff] }
 0x405   : > { %v1298_v39 = vpop.f32.mrf.mxu1 }
 0x406   : > { %v1307_v40 = vadd.f32 %v1298_v39, %v1224_v34  ;;  %v1318_v41 = vadd.f32 %v2304_v37, %v1308_v35  ;;  %v1460_v34 = vld [vmem:[#allocation6 + $0x400] sm:$0xff]  ;;  %v1742_v39 = vld [vmem:[#allocation7 + $0x170] sm:$0xff] }
 0x408   : > { %v1317_v42 = vadd.f32 %v2304_v37, %v1307_v40  ;;  %v1320_v44 = vmax.f32 %v1318_v41, 0.0  ;;  %v1743_v37 = vld [vmem:[#allocation7 + $0x178] sm:$0xff]  ;;  %v1741_v40 = vld [vmem:[#allocation7 + $0x168] sm:$0xff]  ;;  %v1740_v41 = vld [vmem:[#allocation7 + $0x160] sm:$0xff] }
 0x40a   : > { %v1319_v43 = vmax.f32 %v1317_v42, 0.0  ;;  %v1739_v42 = vld [vmem:[#allocation7 + $0x158] sm:$0xff] }
 0x40c   : > { %2905 = vmatprep.mubr.f32.mxu0 %v1319_v43  ;;  %v1738_v43 = vld [vmem:[#allocation7 + $0x150] sm:$0xff] }
 0x40d   : > { %2906 = vmatmul.mubr.f32.vlgmr.msra.gmra.mxu0 %v1320_v44  ;;  %v1737_v44 = vld [vmem:[#allocation7 + $0x148] sm:$0xff] }
 0x40e   : > { %2944 = vmatpush3.msra.mxu0 %v1458_v14 }
 0x40f   : > { %2945 = vmatprep.subr.mxu0 %v1457_v45 }
 0x410   : > { %2946 = vmatpush3.msra.mxu0 %v1457_v45  ;;  %v1736_v45 = vld [vmem:[#allocation7 + $0x140] sm:$0xff] }
 0x411   : > { %2947 = vmatprep.subr.mxu0 %v1456_v46 }
 0x412   : > { %2948 = vmatpush3.msra.mxu0 %v1456_v46  ;;  %v1735_v46 = vld [vmem:[#allocation7 + $0x138] sm:$0xff] }
 0x413   : > { %2949 = vmatprep.subr.mxu0 %v1455_v47 }
 0x414   : > { %2950 = vmatpush3.msra.mxu0 %v1455_v47  ;;  %v1734_v47 = vld [vmem:[#allocation7 + $0x130] sm:$0xff] }
 0x415   : > { %2951 = vmatprep.subr.mxu0 %v1454_v48 }
 0x416   : > { %2952 = vmatpush3.msra.mxu0 %v1454_v48  ;;  %v1733_v48 = vld [vmem:[#allocation7 + $0x128] sm:$0xff] }
 0x417   : > { %2953 = vmatprep.subr.mxu0 %v1453_v49 }
 0x418   : > { %2954 = vmatpush3.msra.mxu0 %v1453_v49  ;;  %v1732_v49 = vld [vmem:[#allocation7 + $0x120] sm:$0xff] }
 0x419   : > { %2955 = vmatprep.subr.mxu0 %v1452_v50 }
 0x41a   : > { %2956 = vmatpush3.msra.mxu0 %v1452_v50  ;;  %v1731_v50 = vld [vmem:[#allocation7 + $0x118] sm:$0xff] }
 0x41b   : > { %2957 = vmatprep.subr.mxu0 %v1451_v51 }
 0x41c   : > { %2958 = vmatpush3.msra.mxu0 %v1451_v51  ;;  %v1730_v51 = vld [vmem:[#allocation7 + $0x110] sm:$0xff] }
 0x41d   : > { %2959 = vmatprep.subr.mxu0 %v1450_v52 }
 0x41e   : > { %2960 = vmatpush3.msra.mxu0 %v1450_v52  ;;  %v1729_v52 = vld [vmem:[#allocation7 + $0x108] sm:$0xff] }
 0x41f   : > { %2961 = vmatprep.subr.mxu0 %v1449_v53 }
 0x420   : > { %2962 = vmatpush3.msra.mxu0 %v1449_v53  ;;  %v1728_v53 = vld [vmem:[#allocation7 + $0x100] sm:$0xff] }
 0x421   : > { %2963 = vmatprep.subr.mxu0 %v1448_v54 }
 0x422   : > { %2964 = vmatpush3.msra.mxu0 %v1448_v54  ;;  %v1860_v54 = vld [vmem:[#allocation9 + $0xf8] sm:$0xff] }
 0x423   : > { %2965 = vmatprep.subr.mxu0 %v1447_v56 }
 0x424   : > { %2966 = vmatpush3.msra.mxu0 %v1447_v56  ;;  %v1858_v56 = vld [vmem:[#allocation9 + $0xe8] sm:$0xff] }
 0x425   : > { %2967 = vmatprep.subr.mxu0 %v1446_v58 }
 0x426   : > { %2968 = vmatpush3.msra.mxu0 %v1446_v58  ;;  %v1856_v58 = vld [vmem:[#allocation9 + $0xd8] sm:$0xff] }
 0x427   : > { %2969 = vmatprep.subr.mxu0 %v1445_v60 }
 0x428   : > { %2970 = vmatpush3.msra.mxu0 %v1445_v60  ;;  %v1855_v60 = vld [vmem:[#allocation9 + $0xd0] sm:$0xff] }
 0x429   : > { %2971 = vmatprep.subr.mxu0 %v1444_v62 }
 0x42a   : > { %2972 = vmatpush3.msra.mxu0 %v1444_v62  ;;  %v1853_v62 = vld [vmem:[#allocation9 + $0xc0] sm:$0xff] }
 0x42b   : > { %2973 = vmatprep.subr.mxu0 %v1443_v0 }
 0x42c   : > { %2974 = vmatpush3.msra.mxu0 %v1443_v0  ;;  %v1851_v0 = vld [vmem:[#allocation9 + $0xb0] sm:$0xff] }
 0x42d   : > { %3013 = vmatprep.subr.mxu0 %v1743_v37 }
 0x4cd   : > { %v2907_v4 = vpop.f32.mrf.mxu0 }
 0x4ce   : > { %v1418_v5 = vadd.f32 %v2907_v4, %v2306_v3  ;;  %v1847_v4 = vld [vmem:[#allocation9 + $0x90] sm:$0xff] }
 0x4cf   : > { %v1412_v6 = vpop.f32.mrf.mxu0 }
 0x4d0   : > { %v3781_v7 = vadd.f32 %v1418_v5, %v3746_v32  ;;  %v1413_v8 = vadd.f32 %v2306_v3, %v1412_v6  ;;  %v1848_v3 = vld [vmem:[#allocation9 + $0x98] sm:$0xff]  ;;  %v1846_v5 = vld [vmem:[#allocation9 + $0x88] sm:$0xff]  ;;  %v1845_v6 = vld [vmem:[#allocation9 + $0x80] sm:$0xff] }
 0x4d2   : > { %v3784_v9 = vmax.f32 %v3781_v7, 0.0  ;;  %v3787_v10 = vadd.f32 %v1413_v8, %v3753_v36  ;;  %v1474_v36 = vld [vmem:[#allocation6 + $0x470] sm:$0xff]  ;;  %v1844_v8 = vld [vmem:[#allocation9 + $0x78] sm:$0xff] }
 0x4d4   : > { %v1423_v11 = vmax.f32 %v3787_v10, 0.0  ;;  %v1477_v13 = vrot.slane %v3784_v9, 7  ;;  %v1483_v16 = vrot.slane %v3784_v9, 1 }
 0x4d6   : > { %2975 = vmatprep.mubr.f32.mxu0 %v1423_v11  ;;  %v1476_v12 = vrot.slane %v1423_v11, 7  ;;  %v1482_v14 = vrot.slane %v1423_v11, 1  ;;  %v1842_v11 = vld [vmem:[#allocation9 + $0x68] sm:$0xff] }
 0x4d7   : > { %2976 = vmatmul.mubr.f32.vlgmr.msra.gmra.mxu0 %v3784_v9  ;;  %v1843_v9 = vld [vmem:[#allocation9 + $0x70] sm:$0xff] }
 0x4d8   : > { %v1479_v32 = vsel %vm538_vm0, %v1477_v13, %v1476_v12  ;;  %v1478_v15 = vsel %vm538_vm0, %v1476_v12, %v1477_v13  ;;  %v1484_v17 = vsel %vm551_vm2, %v1482_v14, %v1483_v16  ;;  %v1485_v35 = vsel %vm551_vm2, %v1483_v16, %v1482_v14  ;;  %3014 = vmatpush3.msra.mxu0 %v1743_v37  ;;  %v1841_v12 = vld [vmem:[#allocation9 + $0x60] sm:$0xff]  ;;  %v1840_v13 = vld [vmem:[#allocation9 + $0x58] sm:$0xff]  ;;  %v1839_v14 = vld [vmem:[#allocation9 + $0x50] sm:$0xff] }
 0x4d9   : > { %2940 = vmatprep.mubr.msk.f32.mxu1 %vm541_vm1, %v1479_v32  ;;  %3015 = vmatprep.subr.mxu0 %v1742_v39  ;;  %v1838_v32 = vld [vmem:[#allocation9 + $0x48] sm:$0xff]  ;;  %v1836_v16 = vld [vmem:[#allocation9 + $0x38] sm:$0xff] }
 0x4da   : > { %2941 = vmatmul.mubr.msk.f32.vlgmr.msra.gmra.mxu1 %vm542_vm3, %v1478_v15  ;;  %3016 = vmatpush3.msra.mxu0 %v1742_v39  ;;  %v1837_v15 = vld [vmem:[#allocation9 + $0x40] sm:$0xff]  ;;  %v1975_v37 = vld [vmem:[#allocation10 + $0x68] sm:$0xff] }
 0x4db   : > { %2979 = vmatpush3.msra.mxu1 %v1475_v2  ;;  %3010 = vmatprep.mubr.msk.f32.mxu1 %vm554_vm4, %v1484_v17  ;;  %v1849_v2 = vld [vmem:[#allocation9 + $0xa0] sm:$0xff] }
 0x4dc   : > { %2980 = vmatprep.subr.mxu1 %v1474_v36  ;;  %3017 = vmatprep.subr.mxu0 %v1741_v40  ;;  %v1974_v39 = vld [vmem:[#allocation10 + $0x60] sm:$0xff] }
 0x4dd   : > { %2981 = vmatpush3.msra.mxu1 %v1474_v36  ;;  %3018 = vmatpush3.msra.mxu0 %v1741_v40  ;;  %v1835_v36 = vld [vmem:[#allocation9 + $0x30] sm:$0xff]  ;;  %v1973_v40 = vld [vmem:[#allocation10 + $0x58] sm:$0xff] }
 0x4de   : > { %2982 = vmatprep.subr.mxu1 %v1473_v18  ;;  %3019 = vmatprep.subr.mxu0 %v1740_v41 }
 0x4df   : > { %2983 = vmatpush3.msra.mxu1 %v1473_v18  ;;  %3020 = vmatpush3.msra.mxu0 %v1740_v41  ;;  %v1972_v41 = vld [vmem:[#allocation10 + $0x50] sm:$0xff] }
 0x4e0   : > { %2984 = vmatprep.subr.mxu1 %v1472_v19  ;;  %3021 = vmatprep.subr.mxu0 %v1739_v42 }
 0x4e1   : > { %2985 = vmatpush3.msra.mxu1 %v1472_v19  ;;  %3022 = vmatpush3.msra.mxu0 %v1739_v42  ;;  %v1971_v42 = vld [vmem:[#allocation10 + $0x48] sm:$0xff] }
 0x4e2   : > { %2986 = vmatprep.subr.mxu1 %v1471_v20  ;;  %3023 = vmatprep.subr.mxu0 %v1738_v43 }
 0x4e3   : > { %2987 = vmatpush3.msra.mxu1 %v1471_v20  ;;  %3024 = vmatpush3.msra.mxu0 %v1738_v43  ;;  %v1970_v43 = vld [vmem:[#allocation10 + $0x40] sm:$0xff] }
 0x4e4   : > { %2988 = vmatprep.subr.mxu1 %v1470_v21  ;;  %3025 = vmatprep.subr.mxu0 %v1737_v44 }
 0x4e5   : > { %2989 = vmatpush3.msra.mxu1 %v1470_v21  ;;  %3026 = vmatpush3.msra.mxu0 %v1737_v44  ;;  %v1969_v44 = vld [vmem:[#allocation10 + $0x38] sm:$0xff] }
 0x4e6   : > { %2990 = vmatprep.subr.mxu1 %v1469_v22  ;;  %3027 = vmatprep.subr.mxu0 %v1736_v45 }
 0x4e7   : > { %2991 = vmatpush3.msra.mxu1 %v1469_v22  ;;  %3028 = vmatpush3.msra.mxu0 %v1736_v45  ;;  %v1968_v45 = vld [vmem:[#allocation10 + $0x30] sm:$0xff] }
 0x4e8   : > { %2992 = vmatprep.subr.mxu1 %v1468_v24  ;;  %3029 = vmatprep.subr.mxu0 %v1735_v46 }
 0x4e9   : > { %2993 = vmatpush3.msra.mxu1 %v1468_v24  ;;  %3030 = vmatpush3.msra.mxu0 %v1735_v46  ;;  %v1967_v46 = vld [vmem:[#allocation10 + $0x28] sm:$0xff] }
 0x4ea   : > { %2994 = vmatprep.subr.mxu1 %v1467_v25  ;;  %3031 = vmatprep.subr.mxu0 %v1734_v47 }
 0x4eb   : > { %2995 = vmatpush3.msra.mxu1 %v1467_v25  ;;  %3032 = vmatpush3.msra.mxu0 %v1734_v47  ;;  %v1834_v47 = vld [vmem:[#allocation9 + $0x28] sm:$0xff] }
 0x4ec   : > { %2996 = vmatprep.subr.mxu1 %v1466_v26  ;;  %3033 = vmatprep.subr.mxu0 %v1733_v48 }
 0x4ed   : > { %2997 = vmatpush3.msra.mxu1 %v1466_v26  ;;  %3034 = vmatpush3.msra.mxu0 %v1733_v48  ;;  %v2312_v26 = vld [vmem:[%s3869_s4 + $0x2] ss:$0 sm:$0xff] }
 0x4ee   : > { %2998 = vmatprep.subr.mxu1 %v1465_v27  ;;  %3035 = vmatprep.subr.mxu0 %v1732_v49  ;;  %v1833_v48 = vld [vmem:[#allocation9 + $0x20] sm:$0xff] }
 0x4ef   : > { %2999 = vmatpush3.msra.mxu1 %v1465_v27  ;;  %3036 = vmatpush3.msra.mxu0 %v1732_v49  ;;  %v1966_v49 = vld [vmem:[#allocation10 + $0x20] sm:$0xff] }
 0x4f0   : > { %3000 = vmatprep.subr.mxu1 %v1464_v28  ;;  %3037 = vmatprep.subr.mxu0 %v1731_v50 }
 0x4f1   : > { %3001 = vmatpush3.msra.mxu1 %v1464_v28  ;;  %3038 = vmatpush3.msra.mxu0 %v1731_v50  ;;  %v1832_v50 = vld [vmem:[#allocation9 + $0x18] sm:$0xff] }
 0x4f2   : > { %3002 = vmatprep.subr.mxu1 %v1463_v29  ;;  %3039 = vmatprep.subr.mxu0 %v1730_v51 }
 0x4f3   : > { %3003 = vmatpush3.msra.mxu1 %v1463_v29  ;;  %3040 = vmatpush3.msra.mxu0 %v1730_v51  ;;  %v1831_v51 = vld [vmem:[#allocation9 + $0x10] sm:$0xff] }
 0x4f4   : > { %3004 = vmatprep.subr.mxu1 %v1462_v30  ;;  %3041 = vmatprep.subr.mxu0 %v1729_v52 }
 0x4f5   : > { %3005 = vmatpush3.msra.mxu1 %v1462_v30  ;;  %3042 = vmatpush3.msra.mxu0 %v1729_v52  ;;  %v1965_v52 = vld [vmem:[#allocation10 + $0x18] sm:$0xff] }
 0x4f6   : > { %3006 = vmatprep.subr.mxu1 %v1461_v31  ;;  %3043 = vmatprep.subr.mxu0 %v1728_v53 }
 0x4f7   : > { %3007 = vmatpush3.msra.mxu1 %v1461_v31  ;;  %3044 = vmatpush3.msra.mxu0 %v1728_v53  ;;  %v1830_v53 = vld [vmem:[#allocation9 + $0x8] sm:$0xff] }
 0x4f8   : > { %3008 = vmatprep.subr.mxu1 %v1460_v34  ;;  %3048 = vmatprep.subr.mxu0 %v3809_v59 }
 0x4f9   : > { %3009 = vmatpush3.msra.mxu1 %v1460_v34 }
 0x4fa   : > { %3011 = vmatmul.mubr.msk.f32.vlgmr.msra.gmra.mxu1 %vm555_vm5, %v1485_v35  ;;  %1873 = vmatprep.subr.mxu1 %v1860_v54  ;;  %v1976_v35 = vld [vmem:[#allocation10 + $0x70] sm:$0xff]  ;;  %v1829_v54 = vld [vmem:[#allocation9] sm:$0xff] }
 0x4fb   : > { %1874 = vmatpush1.msra.mxu1 %v1859_v55  ;;  %v1964_v55 = vld [vmem:[#allocation10 + $0x10] sm:$0xff] }
 0x4fc   : > { %1875 = vmatprep.subr.mxu1 %v1858_v56  ;;  %v2069_v56 = vld [vmem:[#allocation10 + $0xf8] sm:$0xff] }
 0x4fd   : > { %1876 = vmatpush1.msra.mxu1 %v1857_v57  ;;  %v3429_v57 = vmov 0.0  }
 0x4fe   : > { %1877 = vmatprep.subr.mxu1 %v1856_v58  ;;  %1937 = vmatprep.mubr.f32.mxu1 %v3429_v57  ;;  %v1963_v58 = vld [vmem:[#allocation10 + $0x8] sm:$0xff] }
 0x4ff   : > { %1878 = vmatpush1.msra.mxu1 %v1855_v60  ;;  %v2314_v60 = vld [vmem:[%s3871_s6 + $0x2] ss:$0 sm:$0xff] }
 0x500   : > { %1879 = vmatprep.subr.mxu1 %v1854_v61 }
 0x501   : > { %1880 = vmatpush1.msra.mxu1 %v1853_v62 }
 0x502   : > { %1881 = vmatprep.subr.mxu1 %v1852_v63 }
 0x503   : > { %1882 = vmatpush1.msra.mxu1 %v1851_v0 }
 0x504   : > { %1883 = vmatprep.subr.mxu1 %v1850_v1 }
 0x505   : > { %1884 = vmatpush1.msra.mxu1 %v1849_v2 }
 0x506   : > { %1885 = vmatprep.subr.mxu1 %v1848_v3  ;;  %v2068_v3 = vld [vmem:[#allocation10 + $0xf0] sm:$0xff] }
 0x507   : > { %1886 = vmatpush1.msra.mxu1 %v1847_v4 }
 0x508   : > { %1887 = vmatprep.subr.mxu1 %v1846_v5 }
 0x509   : > { %1888 = vmatpush1.msra.mxu1 %v1845_v6 }
 0x50a   : > { %1889 = vmatprep.subr.mxu1 %v1844_v8  ;;  %v2067_v8 = vld [vmem:[#allocation10 + $0xe8] sm:$0xff] }
 0x50b   : > { %1890 = vmatpush1.msra.mxu1 %v1843_v9 }
 0x50c   : > { %1891 = vmatprep.subr.mxu1 %v1842_v11 }
 0x50d   : > { %1892 = vmatpush1.msra.mxu1 %v1841_v12 }
 0x50e   : > { %1893 = vmatprep.subr.mxu1 %v1840_v13  ;;  %v2065_v13 = vld [vmem:[#allocation10 + $0xd8] sm:$0xff] }
 0x50f   : > { %1894 = vmatpush1.msra.mxu1 %v1839_v14  ;;  %v2064_v14 = vld [vmem:[#allocation10 + $0xd0] sm:$0xff] }
 0x510   : > { %1895 = vmatprep.subr.mxu1 %v1838_v32  ;;  %v2063_v32 = vld [vmem:[#allocation10 + $0xc8] sm:$0xff] }
 0x511   : > { %1896 = vmatpush1.msra.mxu1 %v1837_v15  ;;  %v2062_v15 = vld [vmem:[#allocation10 + $0xc0] sm:$0xff] }
 0x512   : > { %1897 = vmatprep.subr.mxu1 %v1836_v16  ;;  %v2061_v16 = vld [vmem:[#allocation10 + $0xb8] sm:$0xff] }
 0x513   : > { %1898 = vmatpush1.msra.mxu1 %v1835_v36  ;;  %v2060_v36 = vld [vmem:[#allocation10 + $0xb0] sm:$0xff] }
 0x514   : > { %1899 = vmatprep.subr.mxu1 %v1834_v47 }
 0x515   : > { %1900 = vmatpush1.msra.mxu1 %v1833_v48 }
 0x516   : > { %1901 = vmatprep.subr.mxu1 %v1832_v50 }
 0x517   : > { %1902 = vmatpush1.msra.mxu1 %v1831_v51 }
 0x518   : > { %1903 = vmatprep.subr.mxu1 %v1830_v53 }
 0x519   : > { %1904 = vmatpush1.msra.mxu1 %v1829_v54 }
 0x51a   : > { %3083 = vmatprep.subr.mxu1 %v2069_v56 }
 0x597   : > { %v2977_v18 = vpop.f32.mrf.mxu0 }
 0x599   : > { %v1629_v21 = vpop.f32.mrf.mxu0 }
 0x59a   : > { %v2942_v17 = vpop.f32.mrf.mxu1 }
 0x59b   : > { %v1635_v20 = vadd.f32 %v2977_v18, %v2942_v17  ;;  %v2059_v17 = vld [vmem:[#allocation10 + $0xa8] sm:$0xff]  ;;  %v2057_v18 = vld [vmem:[#allocation10 + $0x98] sm:$0xff] }
 0x59c   : > { %v1554_v19 = vpop.f32.mrf.mxu1 }
 0x59d   : > { %v1630_v24 = vadd.f32 %v1629_v21, %v1554_v19  ;;  %v2056_v19 = vld [vmem:[#allocation10 + $0x90] sm:$0xff]  ;;  %v2054_v21 = vld [vmem:[#allocation10 + $0x80] sm:$0xff] }
 0x5ba   : > { %v3012_v22 = vpop.f32.mrf.mxu1 }
 0x5bb   : > { %v1714_v25 = vadd.f32 %v3012_v22, %v1635_v20  ;;  %v2055_v20 = vld [vmem:[#allocation10 + $0x88] sm:$0xff] }
 0x5bc   : > { %v1704_v27 = vpop.f32.mrf.mxu1 }
 0x5bd   : > { %v1713_v28 = vadd.f32 %v1704_v27, %v1630_v24  ;;  %v1724_v29 = vadd.f32 %v2312_v26, %v1714_v25  ;;  %v1865_v24 = vsub.s32 0, %v3673_v23  ;;  %v1861_v25 = vld [vmem:[%s3874_s9] sm:$0x3] }
 0x5bf   : > { %v1723_v30 = vadd.f32 %v2312_v26, %v1713_v28  ;;  %v1726_v34 = vmax.f32 %v1724_v29, 0.0  ;;  %v1866_v27 = vrot.slane %v1861_v25, %v1865_v24 }
 0x5c1   : > { %v1725_v31 = vmax.f32 %v1723_v30, 0.0 }
 0x5c3   : > { %3045 = vmatprep.mubr.f32.mxu0 %v1725_v31 }
 0x5c4   : > { %3046 = vmatmul.mubr.f32.vlgmr.msra.gmra.mxu0 %v1726_v34 }
 0x5c5   : > { %3049 = vmatpush3.msra.mxu0 %v3809_v59  ;;  %v1962_v59 = vld [vmem:[#allocation10] sm:$0xff] }
 0x5c6   : > { %3050 = vmatprep.subr.mxu0 %v1976_v35 }
 0x5c7   : > { %3051 = vmatpush3.msra.mxu0 %v1976_v35 }
 0x5c8   : > { %3052 = vmatprep.subr.mxu0 %v1975_v37 }
 0x5c9   : > { %3053 = vmatpush3.msra.mxu0 %v1975_v37 }
 0x5ca   : > { %3054 = vmatprep.subr.mxu0 %v1974_v39 }
 0x5cb   : > { %3055 = vmatpush3.msra.mxu0 %v1974_v39  ;;  %v1869_v39 = vsub.s32 1, %v3673_v23 }
 0x5cc   : > { %3056 = vmatprep.subr.mxu0 %v1973_v40 }
 0x5cd   : > { %3057 = vmatpush3.msra.mxu0 %v1973_v40  ;;  %v1870_v40 = vrot.slane %v1861_v25, %v1869_v39 }
 0x5ce   : > { %3058 = vmatprep.subr.mxu0 %v1972_v41 }
 0x5cf   : > { %3059 = vmatpush3.msra.mxu0 %v1972_v41 }
 0x5d0   : > { %3060 = vmatprep.subr.mxu0 %v1971_v42 }
 0x5d1   : > { %3061 = vmatpush3.msra.mxu0 %v1971_v42 }
 0x5d2   : > { %3062 = vmatprep.subr.mxu0 %v1970_v43 }
 0x5d3   : > { %3063 = vmatpush3.msra.mxu0 %v1970_v43 }
 0x5d4   : > { %3064 = vmatprep.subr.mxu0 %v1969_v44 }
 0x5d5   : > { %3065 = vmatpush3.msra.mxu0 %v1969_v44 }
 0x5d6   : > { %3066 = vmatprep.subr.mxu0 %v1968_v45 }
 0x5d7   : > { %3067 = vmatpush3.msra.mxu0 %v1968_v45 }
 0x5d8   : > { %3068 = vmatprep.subr.mxu0 %v1967_v46 }
 0x5d9   : > { %3069 = vmatpush3.msra.mxu0 %v1967_v46 }
 0x5da   : > { %3070 = vmatprep.subr.mxu0 %v1966_v49 }
 0x5db   : > { %3071 = vmatpush3.msra.mxu0 %v1966_v49 }
 0x5dc   : > { %3072 = vmatprep.subr.mxu0 %v1965_v52 }
 0x5dd   : > { %3073 = vmatpush3.msra.mxu0 %v1965_v52 }
 0x5de   : > { %3074 = vmatprep.subr.mxu0 %v1964_v55 }
 0x5df   : > { %3075 = vmatpush3.msra.mxu0 %v1964_v55 }
 0x5e0   : > { %3076 = vmatprep.subr.mxu0 %v1963_v58 }
 0x5e1   : > { %3077 = vmatpush3.msra.mxu0 %v1963_v58 }
 0x5e2   : > { %3078 = vmatprep.subr.mxu0 %v1962_v59 }
 0x5e3   : > { %3079 = vmatpush3.msra.mxu0 %v1962_v59 }
 0x684   : > { %v3047_v61 = vpop.f32.mrf.mxu0 }
 0x685   : > { %v1824_v62 = vadd.f32 %v3047_v61, %v2314_v60 }
 0x686   : > { %v1818_v63 = vpop.f32.mrf.mxu0 }
 0x687   : > { %v3820_v0 = vadd.f32 %v1824_v62, %v3781_v7  ;;  %v1819_v1 = vadd.f32 %v2314_v60, %v1818_v63 }
 0x689   : > { %v1827_v2 = vadd.f32 %v1819_v1, %v3787_v10  ;;  %v1951_v4 = vrot.slane %v3820_v0, 7  ;;  %v1957_v11 = vrot.slane %v3820_v0, 1  ;;  %v2066_v10 = vld [vmem:[#allocation10 + $0xe0] sm:$0xff] }
 0x68b   : > { %v1950_v5 = vrot.slane %v1827_v2, 7  ;;  %1938 = vmatmul.mubr.f32.vlgmr.msra.gmra.mxu1 %v1827_v2  ;;  %v1956_v6 = vrot.slane %v1827_v2, 1 }
 0x68c   : > { %3084 = vmatpush3.msra.mxu1 %v2069_v56  ;;  %1943 = vmatprep.mubr.f32.mxu1 %v3429_v57 }
 0x68d   : > { %3085 = vmatprep.subr.mxu1 %v2068_v3  ;;  %v1953_v9 = vsel %vm538_vm0, %v1951_v4, %v1950_v5  ;;  %v1952_v7 = vsel %vm538_vm0, %v1950_v5, %v1951_v4  ;;  %v1958_v12 = vsel %vm551_vm2, %v1956_v6, %v1957_v11  ;;  %v1959_v22 = vsel %vm551_vm2, %v1957_v11, %v1956_v6 }
 0x68e   : > { %3086 = vmatpush3.msra.mxu1 %v2068_v3  ;;  %3080 = vmatprep.mubr.msk.f32.mxu0 %vm541_vm1, %v1953_v9 }
 0x68f   : > { %3087 = vmatprep.subr.mxu1 %v2067_v8  ;;  %1944 = vmatmul.mubr.f32.gmra.mxu1 %v3820_v0 }
 0x690   : > { %3081 = vmatmul.mubr.msk.f32.vlgmr.msra.gmra.mxu0 %vm542_vm3, %v1952_v7  ;;  %3088 = vmatpush3.msra.mxu1 %v2067_v8 }
 0x691   : > { %3089 = vmatprep.subr.mxu1 %v2066_v10  ;;  %3115 = vmatprep.mubr.msk.f32.mxu1 %vm554_vm4, %v1958_v12 }
 0x692   : > { %3090 = vmatpush3.msra.mxu1 %v2066_v10 }
 0x693   : > { %3091 = vmatprep.subr.mxu1 %v2065_v13 }
 0x694   : > { %3092 = vmatpush3.msra.mxu1 %v2065_v13 }
 0x695   : > { %3093 = vmatprep.subr.mxu1 %v2064_v14 }
 0x696   : > { %3094 = vmatpush3.msra.mxu1 %v2064_v14 }
 0x697   : > { %3095 = vmatprep.subr.mxu1 %v2063_v32 }
 0x698   : > { %3096 = vmatpush3.msra.mxu1 %v2063_v32 }
 0x699   : > { %3097 = vmatprep.subr.mxu1 %v2062_v15 }
 0x69a   : > { %3098 = vmatpush3.msra.mxu1 %v2062_v15 }
 0x69b   : > { %3099 = vmatprep.subr.mxu1 %v2061_v16 }
 0x69c   : > { %3100 = vmatpush3.msra.mxu1 %v2061_v16 }
 0x69d   : > { %3101 = vmatprep.subr.mxu1 %v2060_v36 }
 0x69e   : > { %3102 = vmatpush3.msra.mxu1 %v2060_v36 }
 0x69f   : > { %3103 = vmatprep.subr.mxu1 %v2059_v17 }
 0x6a0   : > { %3104 = vmatpush3.msra.mxu1 %v2059_v17 }
 0x6a1   : > { %3105 = vmatprep.subr.mxu1 %v2058_v33 }
 0x6a2   : > { %3106 = vmatpush3.msra.mxu1 %v2058_v33 }
 0x6a3   : > { %3107 = vmatprep.subr.mxu1 %v2057_v18 }
 0x6a4   : > { %3108 = vmatpush3.msra.mxu1 %v2057_v18 }
 0x6a5   : > { %3109 = vmatprep.subr.mxu1 %v2056_v19 }
 0x6a6   : > { %3110 = vmatpush3.msra.mxu1 %v2056_v19 }
 0x6a7   : > { %3111 = vmatprep.subr.mxu1 %v2055_v20 }
 0x6a8   : > { %3112 = vmatpush3.msra.mxu1 %v2055_v20 }
 0x6a9   : > { %3113 = vmatprep.subr.mxu1 %v2054_v21 }
 0x6aa   : > { %3114 = vmatpush3.msra.mxu1 %v2054_v21 }
 0x6ab   : > { %3116 = vmatmul.mubr.msk.f32.vlgmr.msra.gmra.mxu1 %vm555_vm5, %v1959_v22 }
 0x74b   : > { %v1939_v26 = vpop.f32.mrf.mxu1 }
 0x74c   : > { %v1940_v34 = vadd.f32 %v1939_v26, %v1866_v27 }
 0x74d   : > { %v1941_v28 = vpop.f32.mrf.mxu1 }
 0x74e   : > { %v1942_v43 = vadd.f32 %v1941_v28, %v1870_v40 }
 0x74f   : > { %v1945_v29 = vpop.f32.mrf.mxu1 }
 0x750   : > { %v1946_v30 = vadd.f32 %v1945_v29, %v1866_v27  ;;  %v3082_v31 = vpop.f32.mrf.mxu0 }
 0x751   : > { %v1947_v41 = vpop.f32.mrf.mxu1 }
 0x752   : > { %v2147_v38 = vadd.f32 %v3082_v31, %v1946_v30  ;;  %v2044_v35 = vpop.f32.mrf.mxu0  ;;  %v1948_v44 = vadd.f32 %v1947_v41, %v1870_v40 }
 0x753   : > { %v2145_v37 = vadd.f32 %v2044_v35, %v1940_v34 }
 0x754   : > { %2151 = vst [vmem:[%s455_s12 + $0x10] sm:$0xff] %v2147_v38 }
 0x755   : > { %2149 = vst [vmem:[%s455_s12] sm:$0xff] %v2145_v37 }
 0x76b   : > { %v3117_v42 = vpop.f32.mrf.mxu1 }
 0x76c   : > { %v2148_v47 = vadd.f32 %v3117_v42, %v1948_v44 }
 0x76d   : > { %v2136_v45 = vpop.f32.mrf.mxu1 }
 0x76e   : > { %v2146_v46 = vadd.f32 %v2136_v45, %v1942_v43  ;;  %2152 = vst [vmem:[%s455_s12 + $0x18] sm:$0xff] %v2148_v47 }
 0x770   : > { %2150 = vst [vmem:[%s455_s12 + $0x8] sm:$0xff] %v2146_v46 }
 0x771 PF: > { %p23_p5 = scmp.ge.s32.totalorder %s3594_s24, 4   ;;  %s3897_s13 = smov %s3409_s14 }
 0x772   : > { %s3898_s14 = smov %s3413_s15  ;;  %s3899_s15 = smov %s3605_s25 }
 0x773   : > { %s3900_s16 = smov %s3594_s24  ;;  %25 = sbr.rel (!%p23_p5) target bundleno = 8 (0x8), region = 136 }
 0x778   :  { %2177 = vsyncpa [#allocation3], 1 }
 0x779   :  { %2179 = vsyncpa [#allocation3 + $0x1], 1 }
 0x77a   :  { %2180 = vsyncpa [#allocation5], 1 }
 0x77b   :  { %2181 = vsyncpa [#allocation8], 1 }
 0x77c   :  { %2182 = vsyncpa [#allocation11], 1 }

// kernel: _lambda_.3
= control target key start
LH: loop header
LB: loop body
LE: loop exit
PB: predicated region body
PF: predicated region fallthrough
CT: control target
= control target key end

     0   :  { %17 = vsyncpa [#allocation3], 0  ;;  %s4945_s21 = smov 0   ;;  %s6747_s0 = inlined_call_operand.vmem [shape: f32[64,128], index: 0, kind: input, shape index: {}]   ;;  %s6748_s1 = inlined_call_operand.vmem [shape: f32[3,3,128,128], index: 1, kind: input, shape index: {}]   ;;  %s6749_s2 = inlined_call_operand.vmem [shape: f32[3,1,128], index: 2, kind: input, shape index: {}]   ;;  %s6750_s3 = inlined_call_operand.vmem [shape: f32[3,128,128], index: 3, kind: input, shape index: {}]   ;;  %s6751_s4 = inlined_call_operand.vmem [shape: f32[3,1,128], index: 4, kind: input, shape index: {}]   ;;  %s6752_s5 = inlined_call_operand.vmem [shape: f32[128,256], index: 5, kind: input, shape index: {}]   ;;  %s6753_s6 = inlined_call_operand.hbm [shape: f32[2,128,128], index: 6, kind: input, shape index: {}]   ;;  %s6754_s7 = inlined_call_operand.vmem [shape: f32[1,256], index: 7, kind: input, shape index: {}]   ;;  %s6755_s8 = inlined_call_operand.vmem [shape: f32[3,128,128], index: 8, kind: input, shape index: {}]   ;;  %s6756_s9 = inlined_call_operand.vmem [shape: f32[1,128], index: 9, kind: input, shape index: {}]   ;;  %s6757_s10 = inlined_call_operand.vmem [shape: f32[3,128,3], index: 10, kind: input, shape index: {}]   ;;  %s6758_s11 = inlined_call_operand.vmem [shape: f32[1,3], index: 11, kind: input, shape index: {}]   ;;  %s6759_s12 = inlined_call_operand.vmem [shape: f32[64,6], index: 12, kind: output, shape index: {}]  }
   0x1 LB: > { %s3175_s22 = sadd.s32 4294967295, %s4873_s21   ;;  %p3177_p0 = scmp.ge.s32.totalorder %s4873_s21, 1  ;;  %s4873_s21 = sphi %s4945_s21, %s23_s21  }
   0x2   : > { %p311_p1 = scmp.lt.s32.totalorder %s4873_s21, 5  ;;  %s4875_s23 = smov [#allocation2]  }
   0x3   : > { %s338_s24 = sshll.u32 %s4875_s23, 4  ;;  %p4959_p3 = scmp.eq.s32.totalorder %s3175_s22, 0  ;;  %s339_s24 = int_to_ptr.vmem [resolvable:$true] %s338_s24 }
   0x4   : > { %p4953_p2 = pnand %p3177_p0, %p311_p1  ;;  %s4848_s27 = scalar_lea.vmem %s339_s24, 4096 }
   0x5   : > { %p4849_p7 = scmp.ne.s32.totalorder %s339_s24, %s4848_s27  ;;  %p4856_p10 = scmp.lt.s32.totalorder %s339_s24, %s339_s24 }
   0x6   : > { %p4818_p4 = pneg %p4953_p2  ;;  %p4857_p11 = scmp.lt.s32.totalorder %s4848_s27, %s4848_s27 }
   0x8   : > { %p4819_p5 = pnand %p4959_p3, %p4818_p4  ;;  %p4858_p12 = por %p4857_p11, %p4856_p10 }
   0xa   : > { %p4839_p6 = pneg %p4819_p5 }
   0xc   : > { %p4851_p8 = pnand %p4849_p7, %p4839_p6 }
   0xe   : > { %p4852_p9 = pneg %p4851_p8 }
  0x10   : > { %p4859_p13 = pnand %p4858_p12, %p4852_p9 }
  0x12   : > { %4862 = shalt.err (!%p4859_p13)
}
  0x13   : > { %s4876_s28 = smov 128   ;;  %s4877_s29 = smov 8  }
  0x14   : > { %4821 = dma.hbm_to_vmem [thread:$0]  (!%p4819_p5), %s6753_s6, 4096, %s339_s24, [#allocation3], %s4876_s28, %s4876_s28, %s4877_s29  }
  0x15   : > { %378 = sbr.rel (%p4953_p2) target bundleno = 2262 (0x8d6), region = 68 }
  0x1a   : > { %4868 = dma.done.wait (%p4959_p3), [#allocation3], 4096  }
  0x1b   : > { %4870 = vsyncadd (%p4959_p3), [#allocation3], 4294963200  ;;  %v4878_v0 = vmov 0.0   ;;  %v478_v1 = vld [vmem:[%s6748_s1 + $0x78] sm:$0xff]  ;;  %v477_v3 = vld [vmem:[%s6748_s1 + $0x70] sm:$0xff]  ;;  %s3182_s28 = sshll.u32 %s3175_s22, 1  ;;  %v432_v19 = vlaneseq }
  0x1c   : > { %3936 = vmatprep.mubr.f32.mxu0 %v4878_v0  ;;  %v3201_v2 = vld [vmem:[%s6748_s1 + $0xf8] sm:$0xff]  ;;  %3904 = vmatprep.subr.mxu0 %v478_v1  ;;  %v3200_v4 = vld [vmem:[%s6748_s1 + $0xf0] sm:$0xff]  ;;  %v476_v5 = vld [vmem:[%s6748_s1 + $0x68] sm:$0xff]  ;;  %p421_p0 = scmp.lt.s32.totalorder %s3182_s28, 7  ;;  %s4879_s14 = smov 3   ;;  %vm3101_vm10 = vcmask 23552  }
  0x1d   : > { %3939 = vmatprep.subr.mxu1 %v3201_v2  ;;  %3905 = vmatpush3.msra.mxu0 %v478_v1  ;;  %v3199_v6 = vld [vmem:[%s6748_s1 + $0xe8] sm:$0xff]  ;;  %v475_v7 = vld [vmem:[%s6748_s1 + $0x60] sm:$0xff]  ;;  %v474_v9 = vld [vmem:[%s6748_s1 + $0x58] sm:$0xff]  ;;  %v5053_v24 = vshrl.u32 %v432_v19, 7  ;;  %vm3104_vm11 = vcmask 48128  }
  0x1e   : > { %3940 = vmatpush3.msra.mxu1 %v3201_v2  ;;  %3906 = vmatprep.subr.mxu0 %v477_v3  ;;  %v3198_v8 = vld [vmem:[%s6748_s1 + $0xe0] sm:$0xff]  ;;  %v3197_v10 = vld [vmem:[%s6748_s1 + $0xd8] sm:$0xff]  ;;  %v473_v11 = vld [vmem:[%s6748_s1 + $0x50] sm:$0xff]  ;;  %s6786_s28 = smov (!%p421_p0, %s3182_s28), 7 }
  0x1f   : > { %3941 = vmatprep.subr.mxu1 %v3200_v4  ;;  %3907 = vmatpush3.msra.mxu0 %v477_v3  ;;  %v3196_v12 = vld [vmem:[%s6748_s1 + $0xd0] sm:$0xff]  ;;  %v472_v13 = vld [vmem:[%s6748_s1 + $0x48] sm:$0xff]  ;;  %v471_v15 = vld [vmem:[%s6748_s1 + $0x40] sm:$0xff]  ;;  %s3183_s15 = sshll.u32 %s6786_s28, 3  ;;  %v434_v33 = vadd.s32 8, %v5053_v24  ;;  %vm515_vm0 = vcmp.lt.s32.totalorder %v5053_v24, 1 }
  0x20   : > { %3942 = vmatpush3.msra.mxu1 %v3200_v4  ;;  %3908 = vmatprep.subr.mxu0 %v476_v5  ;;  %v3195_v14 = vld [vmem:[%s6748_s1 + $0xc8] sm:$0xff]  ;;  %v3194_v16 = vld [vmem:[%s6748_s1 + $0xc0] sm:$0xff]  ;;  %v470_v17 = vld [vmem:[%s6748_s1 + $0x38] sm:$0xff]  ;;  %s424_s27 = scalar_lea.vmem %s6747_s0, %s3183_s15  ;;  %v5096_v43 = vand.u32 15, %v5053_v24  ;;  %vm528_vm1 = vcmp.lt.s32.totalorder %v5053_v24, 7  ;;  %vm932_vm4 = vcmp.lt.s32.totalorder %v5053_v24, 3  ;;  %s430_s17 = scalar_lea.vmem %s6759_s12, %s3183_s15 }
  0x21   : > { %3943 = vmatprep.subr.mxu1 %v3199_v6  ;;  %3909 = vmatpush3.msra.mxu0 %v476_v5  ;;  %v3193_v18 = vld [vmem:[%s6748_s1 + $0xb8] sm:$0xff]  ;;  %v469_v20 = vld [vmem:[%s6748_s1 + $0x30] sm:$0xff]  ;;  %v468_v22 = vld [vmem:[%s6748_s1 + $0x28] sm:$0xff]  ;;  %v5086_v38 = vand.u32 15, %v434_v33  ;;  %vm945_vm6 = vcmp.lt.s32.totalorder %v5053_v24, 5 }
  0x22   : > { %3944 = vmatpush3.msra.mxu1 %v3199_v6  ;;  %3910 = vmatprep.subr.mxu0 %v475_v7  ;;  %v3192_v21 = vld [vmem:[%s6748_s1 + $0xb0] sm:$0xff]  ;;  %v3191_v23 = vld [vmem:[%s6748_s1 + $0xa8] sm:$0xff]  ;;  %v5055_v25 = vld [vmem:[%s424_s27] sm:$0xff]  ;;  %vm531_vm3 = vcmp.lt.s32.totalorder %v5096_v43, 7  ;;  %vm935_vm5 = vcmp.ge.s32.totalorder %v5096_v43, 3  ;;  %vm1354_vm8 = vcmp.ge.s32.totalorder %v5096_v43, 1 }
  0x23   : > { %3945 = vmatprep.subr.mxu1 %v3198_v8  ;;  %3911 = vmatpush3.msra.mxu0 %v475_v7  ;;  %v5057_v26 = vld [vmem:[%s424_s27 + $0x8] sm:$0xff]  ;;  %v467_v27 = vld [vmem:[%s6748_s1 + $0x20] sm:$0xff]  ;;  %v466_v29 = vld [vmem:[%s6748_s1 + $0x18] sm:$0xff]  ;;  %v461_v31 = vmax.f32 %v5055_v25, 0.0  ;;  %6773 = vst [vmem:[#allocation5_spill] sm:$0xff] %v5086_v38  ;;  %vm519_vm2 = vcmp.ge.s32.totalorder %v5086_v38, 9 }
  0x24   : > { %3946 = vmatpush3.msra.mxu1 %v3198_v8  ;;  %3912 = vmatprep.subr.mxu0 %v474_v9  ;;  %v3190_v28 = vld [vmem:[%s6748_s1 + $0xa0] sm:$0xff]  ;;  %v3189_v30 = vld [vmem:[%s6748_s1 + $0x98] sm:$0xff]  ;;  %v462_v32 = vmax.f32 %v5057_v26, 0.0  ;;  %v465_v34 = vld [vmem:[%s6748_s1 + $0x10] sm:$0xff]  ;;  %vm949_vm7 = vcmp.lt.s32.totalorder %v5086_v38, 13  ;;  %vm1367_vm9 = vcmp.lt.s32.totalorder %v5086_v38, 15 }
  0x25   : > { %3947 = vmatprep.subr.mxu1 %v3197_v10  ;;  %3913 = vmatpush3.msra.mxu0 %v474_v9  ;;  %v3188_v35 = vld [vmem:[%s6748_s1 + $0x90] sm:$0xff]  ;;  %v464_v36 = vld [vmem:[%s6748_s1 + $0x8] sm:$0xff]  ;;  %v513_v39 = vrot.slane %v461_v31, 7  ;;  %v463_v41 = vld [vmem:[%s6748_s1] sm:$0xff]  ;;  %v526_v44 = vrot.slane %v461_v31, 1 }
  0x26   : > { %3948 = vmatpush3.msra.mxu1 %v3197_v10  ;;  %3914 = vmatprep.subr.mxu0 %v473_v11  ;;  %v3187_v37 = vld [vmem:[%s6748_s1 + $0x88] sm:$0xff]  ;;  %v514_v40 = vrot.slane %v462_v32, 7  ;;  %v3186_v42 = vld [vmem:[%s6748_s1 + $0x80] sm:$0xff]  ;;  %v527_v45 = vrot.slane %v462_v32, 1  ;;  %v3217_v47 = vld [vmem:[%s6748_s1 + $0x178] sm:$0xff] }
  0x27   : > { %3949 = vmatprep.subr.mxu1 %v3196_v12  ;;  %3915 = vmatpush3.msra.mxu0 %v473_v11  ;;  %v3216_v49 = vld [vmem:[%s6748_s1 + $0x170] sm:$0xff]  ;;  %v3215_v50 = vld [vmem:[%s6748_s1 + $0x168] sm:$0xff]  ;;  %v3214_v51 = vld [vmem:[%s6748_s1 + $0x160] sm:$0xff] }
  0x28   : > { %3950 = vmatpush3.msra.mxu1 %v3196_v12  ;;  %3916 = vmatprep.subr.mxu0 %v472_v13  ;;  %v517_v46 = vsel %vm515_vm0, %v514_v40, %v513_v39  ;;  %v530_v48 = vsel %vm528_vm1, %v527_v45, %v526_v44  ;;  %v3213_v52 = vld [vmem:[%s6748_s1 + $0x158] sm:$0xff]  ;;  %v3212_v53 = vld [vmem:[%s6748_s1 + $0x150] sm:$0xff]  ;;  %v3211_v54 = vld [vmem:[%s6748_s1 + $0x148] sm:$0xff] }
  0x29   : > { %3951 = vmatprep.subr.mxu1 %v3195_v14  ;;  %3917 = vmatpush3.msra.mxu0 %v472_v13  ;;  %v3210_v55 = vld [vmem:[%s6748_s1 + $0x140] sm:$0xff]  ;;  %v3209_v56 = vld [vmem:[%s6748_s1 + $0x138] sm:$0xff]  ;;  %v3208_v57 = vld [vmem:[%s6748_s1 + $0x130] sm:$0xff] }
  0x2a   : > { %3952 = vmatpush3.msra.mxu1 %v3195_v14  ;;  %3918 = vmatprep.subr.mxu0 %v471_v15  ;;  %v3207_v58 = vld [vmem:[%s6748_s1 + $0x128] sm:$0xff]  ;;  %v3206_v59 = vld [vmem:[%s6748_s1 + $0x120] sm:$0xff]  ;;  %v3205_v60 = vld [vmem:[%s6748_s1 + $0x118] sm:$0xff] }
  0x2b   : > { %3953 = vmatprep.subr.mxu1 %v3194_v16  ;;  %3919 = vmatpush3.msra.mxu0 %v471_v15  ;;  %v3204_v61 = vld [vmem:[%s6748_s1 + $0x110] sm:$0xff]  ;;  %v3203_v62 = vld [vmem:[%s6748_s1 + $0x108] sm:$0xff]  ;;  %v3202_v63 = vld [vmem:[%s6748_s1 + $0x100] sm:$0xff] }
  0x2c   : > { %3954 = vmatpush3.msra.mxu1 %v3194_v16  ;;  %3920 = vmatprep.subr.mxu0 %v470_v17  ;;  %v792_v1 = vld [vmem:[%s6750_s3 + $0x78] sm:$0xff]  ;;  %v791_v2 = vld [vmem:[%s6750_s3 + $0x70] sm:$0xff]  ;;  %v790_v3 = vld [vmem:[%s6750_s3 + $0x68] sm:$0xff] }
  0x2d   : > { %3955 = vmatprep.subr.mxu1 %v3193_v18  ;;  %3921 = vmatpush3.msra.mxu0 %v470_v17  ;;  %v789_v4 = vld [vmem:[%s6750_s3 + $0x60] sm:$0xff]  ;;  %v788_v5 = vld [vmem:[%s6750_s3 + $0x58] sm:$0xff]  ;;  %v787_v6 = vld [vmem:[%s6750_s3 + $0x50] sm:$0xff] }
  0x2e   : > { %3956 = vmatpush3.msra.mxu1 %v3193_v18  ;;  %3922 = vmatprep.subr.mxu0 %v469_v20  ;;  %v786_v7 = vld [vmem:[%s6750_s3 + $0x48] sm:$0xff]  ;;  %v785_v8 = vld [vmem:[%s6750_s3 + $0x40] sm:$0xff]  ;;  %v784_v9 = vld [vmem:[%s6750_s3 + $0x38] sm:$0xff] }
  0x2f   : > { %3957 = vmatprep.subr.mxu1 %v3192_v21  ;;  %3923 = vmatpush3.msra.mxu0 %v469_v20  ;;  %v783_v10 = vld [vmem:[%s6750_s3 + $0x30] sm:$0xff]  ;;  %v782_v11 = vld [vmem:[%s6750_s3 + $0x28] sm:$0xff]  ;;  %v781_v12 = vld [vmem:[%s6750_s3 + $0x20] sm:$0xff] }
  0x30   : > { %3958 = vmatpush3.msra.mxu1 %v3192_v21  ;;  %3924 = vmatprep.subr.mxu0 %v468_v22  ;;  %v780_v13 = vld [vmem:[%s6750_s3 + $0x18] sm:$0xff]  ;;  %v779_v14 = vld [vmem:[%s6750_s3 + $0x10] sm:$0xff]  ;;  %v778_v15 = vld [vmem:[%s6750_s3 + $0x8] sm:$0xff] }
  0x31   : > { %3959 = vmatprep.subr.mxu1 %v3191_v23  ;;  %3925 = vmatpush3.msra.mxu0 %v468_v22  ;;  %v777_v16 = vld [vmem:[%s6750_s3] sm:$0xff]  ;;  %v3253_v17 = vld [vmem:[%s6748_s1 + $0x278] sm:$0xff]  ;;  %v3236_v19 = vld [vmem:[%s6748_s1 + $0x1f0] sm:$0xff] }
  0x32   : > { %3960 = vmatpush3.msra.mxu1 %v3191_v23  ;;  %3926 = vmatprep.subr.mxu0 %v467_v27  ;;  %v3237_v18 = vld [vmem:[%s6748_s1 + $0x1f8] sm:$0xff]  ;;  %v3235_v20 = vld [vmem:[%s6748_s1 + $0x1e8] sm:$0xff]  ;;  %v3234_v21 = vld [vmem:[%s6748_s1 + $0x1e0] sm:$0xff] }
  0x33   : > { %3961 = vmatprep.subr.mxu1 %v3190_v28  ;;  %3927 = vmatpush3.msra.mxu0 %v467_v27  ;;  %v3233_v22 = vld [vmem:[%s6748_s1 + $0x1d8] sm:$0xff]  ;;  %v3232_v23 = vld [vmem:[%s6748_s1 + $0x1d0] sm:$0xff]  ;;  %v3231_v27 = vld [vmem:[%s6748_s1 + $0x1c8] sm:$0xff] }
  0x34   : > { %3962 = vmatpush3.msra.mxu1 %v3190_v28  ;;  %3928 = vmatprep.subr.mxu0 %v466_v29  ;;  %v3230_v28 = vld [vmem:[%s6748_s1 + $0x1c0] sm:$0xff] }
  0x35   : > { %3963 = vmatprep.subr.mxu1 %v3189_v30  ;;  %3929 = vmatpush3.msra.mxu0 %v466_v29  ;;  %v3229_v29 = vld [vmem:[%s6748_s1 + $0x1b8] sm:$0xff]  ;;  %v3220_v40 = vld [vmem:[%s6749_s2] ss:$0 sm:$0xff] }
  0x36   : > { %3964 = vmatpush3.msra.mxu1 %v3189_v30  ;;  %3930 = vmatprep.subr.mxu0 %v465_v34  ;;  %v3228_v30 = vld [vmem:[%s6748_s1 + $0x1b0] sm:$0xff] }
  0x37   : > { %3965 = vmatprep.subr.mxu1 %v3188_v35  ;;  %3931 = vmatpush3.msra.mxu0 %v465_v34 }
  0x38   : > { %3966 = vmatpush3.msra.mxu1 %v3188_v35  ;;  %3932 = vmatprep.subr.mxu0 %v464_v36 }
  0x39   : > { %3967 = vmatprep.subr.mxu1 %v3187_v37  ;;  %3933 = vmatpush3.msra.mxu0 %v464_v36 }
  0x3a   : > { %3968 = vmatpush3.msra.mxu1 %v3187_v37  ;;  %3934 = vmatprep.subr.mxu0 %v463_v41 }
  0x3b   : > { %3969 = vmatprep.subr.mxu1 %v3186_v42  ;;  %3935 = vmatpush3.msra.mxu0 %v463_v41 }
  0x3c   : > { %3970 = vmatpush3.msra.mxu1 %v3186_v42  ;;  %3971 = vmatprep.mubr.f32.mxu1 %v461_v31 }
  0x3d   : > { %3937 = vmatmul.mubr.msk.f32.vlgmr.msra.gmra.mxu0 %vm519_vm2, %v517_v46  ;;  %3972 = vmatmul.mubr.f32.vlgmr.msra.gmra.mxu1 %v462_v32 }
  0x3e   : > { %3974 = vmatprep.subr.mxu0 %v3217_v47  ;;  %4006 = vmatprep.mubr.msk.f32.mxu0 %vm531_vm3, %v530_v48  ;;  %v3252_v48 = vld [vmem:[%s6748_s1 + $0x270] sm:$0xff] }
  0x3f   : > { %3975 = vmatpush3.msra.mxu0 %v3217_v47  ;;  %4009 = vmatprep.subr.mxu1 %v792_v1 }
  0x40   : > { %3976 = vmatprep.subr.mxu0 %v3216_v49  ;;  %4010 = vmatpush3.msra.mxu1 %v792_v1  ;;  %v3224_v1 = vld [vmem:[%s6748_s1 + $0x190] sm:$0xff] }
  0x41   : > { %3977 = vmatpush3.msra.mxu0 %v3216_v49  ;;  %4011 = vmatprep.subr.mxu1 %v791_v2  ;;  %v3251_v49 = vld [vmem:[%s6748_s1 + $0x268] sm:$0xff] }
  0x42   : > { %3978 = vmatprep.subr.mxu0 %v3215_v50  ;;  %4012 = vmatpush3.msra.mxu1 %v791_v2  ;;  %v3239_v2 = vld [vmem:[%s6748_s1 + $0x208] sm:$0xff] }
  0x43   : > { %3979 = vmatpush3.msra.mxu0 %v3215_v50  ;;  %4013 = vmatprep.subr.mxu1 %v790_v3  ;;  %v3250_v50 = vld [vmem:[%s6748_s1 + $0x260] sm:$0xff] }
  0x44   : > { %3980 = vmatprep.subr.mxu0 %v3214_v51  ;;  %4014 = vmatpush3.msra.mxu1 %v790_v3  ;;  %v3223_v3 = vld [vmem:[%s6748_s1 + $0x188] sm:$0xff] }
  0x45   : > { %3981 = vmatpush3.msra.mxu0 %v3214_v51  ;;  %4015 = vmatprep.subr.mxu1 %v789_v4  ;;  %v3249_v51 = vld [vmem:[%s6748_s1 + $0x258] sm:$0xff] }
  0x46   : > { %3982 = vmatprep.subr.mxu0 %v3213_v52  ;;  %4016 = vmatpush3.msra.mxu1 %v789_v4  ;;  %v3238_v4 = vld [vmem:[%s6748_s1 + $0x200] sm:$0xff] }
  0x47   : > { %3983 = vmatpush3.msra.mxu0 %v3213_v52  ;;  %4017 = vmatprep.subr.mxu1 %v788_v5  ;;  %v3248_v52 = vld [vmem:[%s6748_s1 + $0x250] sm:$0xff] }
  0x48   : > { %3984 = vmatprep.subr.mxu0 %v3212_v53  ;;  %4018 = vmatpush3.msra.mxu1 %v788_v5  ;;  %v3222_v5 = vld [vmem:[%s6748_s1 + $0x180] sm:$0xff] }
  0x49   : > { %3985 = vmatpush3.msra.mxu0 %v3212_v53  ;;  %4019 = vmatprep.subr.mxu1 %v787_v6  ;;  %v3247_v53 = vld [vmem:[%s6748_s1 + $0x248] sm:$0xff] }
  0x4a   : > { %3986 = vmatprep.subr.mxu0 %v3211_v54  ;;  %4020 = vmatpush3.msra.mxu1 %v787_v6  ;;  %v3269_v6 = vld [vmem:[%s6748_s1 + $0x2f8] sm:$0xff] }
  0x4b   : > { %3987 = vmatpush3.msra.mxu0 %v3211_v54  ;;  %4021 = vmatprep.subr.mxu1 %v786_v7  ;;  %v3246_v54 = vld [vmem:[%s6748_s1 + $0x240] sm:$0xff] }
  0x4c   : > { %3988 = vmatprep.subr.mxu0 %v3210_v55  ;;  %4022 = vmatpush3.msra.mxu1 %v786_v7  ;;  %v3221_v7 = vld [vmem:[%s6751_s4] ss:$0 sm:$0xff] }
  0x4d   : > { %3989 = vmatpush3.msra.mxu0 %v3210_v55  ;;  %4023 = vmatprep.subr.mxu1 %v785_v8  ;;  %v3245_v55 = vld [vmem:[%s6748_s1 + $0x238] sm:$0xff] }
  0x4e   : > { %3990 = vmatprep.subr.mxu0 %v3209_v56  ;;  %4024 = vmatpush3.msra.mxu1 %v785_v8 }
  0x4f   : > { %3991 = vmatpush3.msra.mxu0 %v3209_v56  ;;  %4025 = vmatprep.subr.mxu1 %v784_v9  ;;  %v3244_v56 = vld [vmem:[%s6748_s1 + $0x230] sm:$0xff] }
  0x50   : > { %3992 = vmatprep.subr.mxu0 %v3208_v57  ;;  %4026 = vmatpush3.msra.mxu1 %v784_v9 }
  0x51   : > { %3993 = vmatpush3.msra.mxu0 %v3208_v57  ;;  %4027 = vmatprep.subr.mxu1 %v783_v10  ;;  %v3243_v57 = vld [vmem:[%s6748_s1 + $0x228] sm:$0xff] }
  0x52   : > { %3994 = vmatprep.subr.mxu0 %v3207_v58  ;;  %4028 = vmatpush3.msra.mxu1 %v783_v10 }
  0x53   : > { %3995 = vmatpush3.msra.mxu0 %v3207_v58  ;;  %4029 = vmatprep.subr.mxu1 %v782_v11  ;;  %v3227_v58 = vld [vmem:[%s6748_s1 + $0x1a8] sm:$0xff] }
  0x54   : > { %3996 = vmatprep.subr.mxu0 %v3206_v59  ;;  %4030 = vmatpush3.msra.mxu1 %v782_v11 }
  0x55   : > { %3997 = vmatpush3.msra.mxu0 %v3206_v59  ;;  %4031 = vmatprep.subr.mxu1 %v781_v12  ;;  %v3242_v59 = vld [vmem:[%s6748_s1 + $0x220] sm:$0xff] }
  0x56   : > { %3998 = vmatprep.subr.mxu0 %v3205_v60  ;;  %4032 = vmatpush3.msra.mxu1 %v781_v12 }
  0x57   : > { %3999 = vmatpush3.msra.mxu0 %v3205_v60  ;;  %4033 = vmatprep.subr.mxu1 %v780_v13  ;;  %v3226_v60 = vld [vmem:[%s6748_s1 + $0x1a0] sm:$0xff] }
  0x58   : > { %4000 = vmatprep.subr.mxu0 %v3204_v61  ;;  %4034 = vmatpush3.msra.mxu1 %v780_v13 }
  0x59   : > { %4001 = vmatpush3.msra.mxu0 %v3204_v61  ;;  %4035 = vmatprep.subr.mxu1 %v779_v14  ;;  %v3241_v61 = vld [vmem:[%s6748_s1 + $0x218] sm:$0xff] }
  0x5a   : > { %4002 = vmatprep.subr.mxu0 %v3203_v62  ;;  %4036 = vmatpush3.msra.mxu1 %v779_v14 }
  0x5b   : > { %4003 = vmatpush3.msra.mxu0 %v3203_v62  ;;  %4037 = vmatprep.subr.mxu1 %v778_v15  ;;  %v3225_v62 = vld [vmem:[%s6748_s1 + $0x198] sm:$0xff] }
  0x5c   : > { %4004 = vmatprep.subr.mxu0 %v3202_v63  ;;  %4038 = vmatpush3.msra.mxu1 %v778_v15 }
  0x5d   : > { %4005 = vmatpush3.msra.mxu0 %v3202_v63  ;;  %4039 = vmatprep.subr.mxu1 %v777_v16  ;;  %v3240_v63 = vld [vmem:[%s6748_s1 + $0x210] sm:$0xff] }
  0x5e   : > { %4007 = vmatmul.mubr.f32.vlgmr.msra.gmra.mxu0 %v4878_v0  ;;  %4040 = vmatpush3.msra.mxu1 %v777_v16 }
  0x5f   : > { %4079 = vmatprep.subr.mxu1 %v3253_v17  ;;  %4044 = vmatprep.subr.mxu0 %v3237_v18 }
  0x60   : > { %4045 = vmatpush3.msra.mxu0 %v3237_v18 }
  0x61   : > { %4046 = vmatprep.subr.mxu0 %v3236_v19 }
  0x62   : > { %4047 = vmatpush3.msra.mxu0 %v3236_v19 }
  0x63   : > { %4048 = vmatprep.subr.mxu0 %v3235_v20 }
  0x64   : > { %4049 = vmatpush3.msra.mxu0 %v3235_v20  ;;  %v3268_v20 = vld [vmem:[%s6748_s1 + $0x2f0] sm:$0xff] }
  0x65   : > { %4050 = vmatprep.subr.mxu0 %v3234_v21 }
  0x66   : > { %4051 = vmatpush3.msra.mxu0 %v3234_v21 }
  0x67   : > { %4052 = vmatprep.subr.mxu0 %v3233_v22 }
  0x68   : > { %4053 = vmatpush3.msra.mxu0 %v3233_v22  ;;  %v3267_v22 = vld [vmem:[%s6748_s1 + $0x2e8] sm:$0xff] }
  0x69   : > { %4054 = vmatprep.subr.mxu0 %v3232_v23 }
  0x6a   : > { %4055 = vmatpush3.msra.mxu0 %v3232_v23  ;;  %v3266_v23 = vld [vmem:[%s6748_s1 + $0x2e0] sm:$0xff] }
  0x6b   : > { %4056 = vmatprep.subr.mxu0 %v3231_v27 }
  0x6c   : > { %4057 = vmatpush3.msra.mxu0 %v3231_v27  ;;  %v3265_v27 = vld [vmem:[%s6748_s1 + $0x2d8] sm:$0xff] }
  0x6d   : > { %4058 = vmatprep.subr.mxu0 %v3230_v28 }
  0x6e   : > { %4059 = vmatpush3.msra.mxu0 %v3230_v28  ;;  %v3264_v28 = vld [vmem:[%s6748_s1 + $0x2d0] sm:$0xff] }
  0x6f   : > { %4060 = vmatprep.subr.mxu0 %v3229_v29 }
  0x70   : > { %4061 = vmatpush3.msra.mxu0 %v3229_v29  ;;  %v3263_v29 = vld [vmem:[%s6748_s1 + $0x2c8] sm:$0xff] }
  0x71   : > { %4062 = vmatprep.subr.mxu0 %v3228_v30 }
  0x72   : > { %4063 = vmatpush3.msra.mxu0 %v3228_v30  ;;  %v3262_v30 = vld [vmem:[%s6748_s1 + $0x2c0] sm:$0xff] }
  0x73   : > { %4064 = vmatprep.subr.mxu0 %v3227_v58 }
  0x74   : > { %4065 = vmatpush3.msra.mxu0 %v3227_v58  ;;  %v3323_v58 = vld [vmem:[%s6748_s1 + $0x3f8] sm:$0xff] }
  0x75   : > { %4066 = vmatprep.subr.mxu0 %v3226_v60 }
  0x76   : > { %4067 = vmatpush3.msra.mxu0 %v3226_v60  ;;  %v3306_v60 = vld [vmem:[%s6748_s1 + $0x370] sm:$0xff] }
  0x77   : > { %4068 = vmatprep.subr.mxu0 %v3225_v62 }
  0x78   : > { %4069 = vmatpush3.msra.mxu0 %v3225_v62  ;;  %v3304_v62 = vld [vmem:[%s6748_s1 + $0x360] sm:$0xff] }
  0x79   : > { %4070 = vmatprep.subr.mxu0 %v3224_v1 }
  0x7a   : > { %4071 = vmatpush3.msra.mxu0 %v3224_v1  ;;  %v3302_v1 = vld [vmem:[%s6748_s1 + $0x350] sm:$0xff] }
  0x7b   : > { %4072 = vmatprep.subr.mxu0 %v3223_v3 }
  0x7c   : > { %4073 = vmatpush3.msra.mxu0 %v3223_v3  ;;  %v3300_v3 = vld [vmem:[%s6748_s1 + $0x340] sm:$0xff] }
  0x7d   : > { %4074 = vmatprep.subr.mxu0 %v3222_v5 }
  0x7e   : > { %4075 = vmatpush3.msra.mxu0 %v3222_v5  ;;  %v3298_v5 = vld [vmem:[%s6748_s1 + $0x330] sm:$0xff] }
  0x7f   : > { %4114 = vmatprep.subr.mxu0 %v3269_v6 }
  0xfd   : > { %v3938_v31 = vpop.f32.mrf.mxu0  ;;  %v3973_v32 = vpop.f32.mrf.mxu1 }
  0xfe   : > { %v686_v35 = vadd.f32 %v3973_v32, %v3938_v31  ;;  %v3261_v31 = vld [vmem:[%s6748_s1 + $0x2b8] sm:$0xff]  ;;  %v3260_v32 = vld [vmem:[%s6748_s1 + $0x2b0] sm:$0xff] }
  0xff   : > { %v605_v33 = vpop.f32.mrf.mxu0  ;;  %v680_v34 = vpop.f32.mrf.mxu1 }
 0x100   : > { %v681_v37 = vadd.f32 %v680_v34, %v605_v33  ;;  %v3259_v33 = vld [vmem:[%s6748_s1 + $0x2a8] sm:$0xff]  ;;  %v3258_v34 = vld [vmem:[%s6748_s1 + $0x2a0] sm:$0xff] }
 0x11e   : > { %v4008_v36 = vpop.f32.mrf.mxu0 }
 0x11f   : > { %v765_v39 = vadd.f32 %v4008_v36, %v686_v35  ;;  %v3257_v35 = vld [vmem:[%s6748_s1 + $0x298] sm:$0xff]  ;;  %v3256_v36 = vld [vmem:[%s6748_s1 + $0x290] sm:$0xff] }
 0x120   : > { %v755_v41 = vpop.f32.mrf.mxu0 }
 0x121   : > { %v764_v42 = vadd.f32 %v755_v41, %v681_v37  ;;  %v774_v44 = vadd.f32 %v3220_v40, %v765_v39  ;;  %v3255_v37 = vld [vmem:[%s6748_s1 + $0x288] sm:$0xff]  ;;  %v3254_v39 = vld [vmem:[%s6748_s1 + $0x280] sm:$0xff]  ;;  %v3289_v41 = vld [vmem:[%s6750_s3 + $0xf8] sm:$0xff] }
 0x123   : > { %v773_v45 = vadd.f32 %v3220_v40, %v764_v42  ;;  %v776_v47 = vmax.f32 %v774_v44, 0.0  ;;  %v3288_v42 = vld [vmem:[%s6750_s3 + $0xf0] sm:$0xff]  ;;  %v3287_v44 = vld [vmem:[%s6750_s3 + $0xe8] sm:$0xff] }
 0x125   : > { %v775_v46 = vmax.f32 %v773_v45, 0.0  ;;  %v3286_v45 = vld [vmem:[%s6750_s3 + $0xe0] sm:$0xff] }
 0x127   : > { %4041 = vmatprep.mubr.f32.mxu1 %v775_v46  ;;  %v3285_v46 = vld [vmem:[%s6750_s3 + $0xd8] sm:$0xff] }
 0x128   : > { %4042 = vmatmul.mubr.f32.vlgmr.msra.gmra.mxu1 %v776_v47  ;;  %v3284_v47 = vld [vmem:[%s6750_s3 + $0xd0] sm:$0xff] }
 0x129   : > { %4080 = vmatpush3.msra.mxu1 %v3253_v17 }
 0x12a   : > { %4081 = vmatprep.subr.mxu1 %v3252_v48 }
 0x12b   : > { %4082 = vmatpush3.msra.mxu1 %v3252_v48  ;;  %v3283_v48 = vld [vmem:[%s6750_s3 + $0xc8] sm:$0xff] }
 0x12c   : > { %4083 = vmatprep.subr.mxu1 %v3251_v49 }
 0x12d   : > { %4084 = vmatpush3.msra.mxu1 %v3251_v49  ;;  %v3282_v49 = vld [vmem:[%s6750_s3 + $0xc0] sm:$0xff] }
 0x12e   : > { %4085 = vmatprep.subr.mxu1 %v3250_v50 }
 0x12f   : > { %4086 = vmatpush3.msra.mxu1 %v3250_v50  ;;  %v3281_v50 = vld [vmem:[%s6750_s3 + $0xb8] sm:$0xff] }
 0x130   : > { %4087 = vmatprep.subr.mxu1 %v3249_v51 }
 0x131   : > { %4088 = vmatpush3.msra.mxu1 %v3249_v51  ;;  %v3280_v51 = vld [vmem:[%s6750_s3 + $0xb0] sm:$0xff] }
 0x132   : > { %4089 = vmatprep.subr.mxu1 %v3248_v52 }
 0x133   : > { %4090 = vmatpush3.msra.mxu1 %v3248_v52  ;;  %v3279_v52 = vld [vmem:[%s6750_s3 + $0xa8] sm:$0xff] }
 0x134   : > { %4091 = vmatprep.subr.mxu1 %v3247_v53 }
 0x135   : > { %4092 = vmatpush3.msra.mxu1 %v3247_v53  ;;  %v3278_v53 = vld [vmem:[%s6750_s3 + $0xa0] sm:$0xff] }
 0x136   : > { %4093 = vmatprep.subr.mxu1 %v3246_v54 }
 0x137   : > { %4094 = vmatpush3.msra.mxu1 %v3246_v54  ;;  %v3277_v54 = vld [vmem:[%s6750_s3 + $0x98] sm:$0xff] }
 0x138   : > { %4095 = vmatprep.subr.mxu1 %v3245_v55 }
 0x139   : > { %4096 = vmatpush3.msra.mxu1 %v3245_v55  ;;  %v3276_v55 = vld [vmem:[%s6750_s3 + $0x90] sm:$0xff] }
 0x13a   : > { %4097 = vmatprep.subr.mxu1 %v3244_v56 }
 0x13b   : > { %4098 = vmatpush3.msra.mxu1 %v3244_v56  ;;  %v3275_v56 = vld [vmem:[%s6750_s3 + $0x88] sm:$0xff] }
 0x13c   : > { %4099 = vmatprep.subr.mxu1 %v3243_v57 }
 0x13d   : > { %4100 = vmatpush3.msra.mxu1 %v3243_v57  ;;  %v3274_v57 = vld [vmem:[%s6750_s3 + $0x80] sm:$0xff] }
 0x13e   : > { %4101 = vmatprep.subr.mxu1 %v3242_v59 }
 0x13f   : > { %4102 = vmatpush3.msra.mxu1 %v3242_v59  ;;  %v3307_v59 = vld [vmem:[%s6748_s1 + $0x378] sm:$0xff] }
 0x140   : > { %4103 = vmatprep.subr.mxu1 %v3241_v61 }
 0x141   : > { %4104 = vmatpush3.msra.mxu1 %v3241_v61  ;;  %v3305_v61 = vld [vmem:[%s6748_s1 + $0x368] sm:$0xff] }
 0x142   : > { %4105 = vmatprep.subr.mxu1 %v3240_v63 }
 0x143   : > { %4106 = vmatpush3.msra.mxu1 %v3240_v63  ;;  %v3303_v63 = vld [vmem:[%s6748_s1 + $0x358] sm:$0xff] }
 0x144   : > { %4107 = vmatprep.subr.mxu1 %v3239_v2 }
 0x145   : > { %4108 = vmatpush3.msra.mxu1 %v3239_v2  ;;  %v3301_v2 = vld [vmem:[%s6748_s1 + $0x348] sm:$0xff] }
 0x146   : > { %4109 = vmatprep.subr.mxu1 %v3238_v4 }
 0x147   : > { %4110 = vmatpush3.msra.mxu1 %v3238_v4  ;;  %v3299_v4 = vld [vmem:[%s6748_s1 + $0x338] sm:$0xff] }
 0x148   : > { %4149 = vmatprep.subr.mxu1 %v3289_v41 }
 0x1e8   : > { %v4043_v8 = vpop.f32.mrf.mxu1 }
 0x1e9   : > { %v872_v9 = vadd.f32 %v4043_v8, %v3221_v7 }
 0x1ea   : > { %v866_v10 = vpop.f32.mrf.mxu1 }
 0x1eb   : > { %v5308_v11 = vadd.f32 %v872_v9, %v5057_v26  ;;  %v867_v12 = vadd.f32 %v3221_v7, %v866_v10 }
 0x1ed   : > { %v5311_v13 = vmax.f32 %v5308_v11, 0.0  ;;  %v5314_v14 = vadd.f32 %v867_v12, %v5055_v25 }
 0x1ef   : > { %v5317_v15 = vmax.f32 %v5314_v14, 0.0  ;;  %v931_v17 = vrot.slane %v5311_v13, 5  ;;  %v944_v19 = vrot.slane %v5311_v13, 3 }
 0x1f1   : > { %4111 = vmatprep.mubr.f32.mxu1 %v5317_v15  ;;  %v930_v16 = vrot.slane %v5317_v15, 5  ;;  %v943_v26 = vrot.slane %v5317_v15, 3 }
 0x1f2   : > { %4112 = vmatmul.mubr.f32.vlgmr.msra.gmra.mxu1 %v5311_v13 }
 0x1f3   : > { %v934_v25 = vsel %vm932_vm4, %v931_v17, %v930_v16  ;;  %v933_v18 = vsel %vm932_vm4, %v930_v16, %v931_v17  ;;  %v946_v21 = vsel %vm945_vm6, %v943_v26, %v944_v19  ;;  %v947_v40 = vsel %vm945_vm6, %v944_v19, %v943_v26  ;;  %4150 = vmatpush3.msra.mxu1 %v3289_v41  ;;  %v3273_v16 = vld [vmem:[%s6749_s2 + $0x1] ss:$0 sm:$0xff]  ;;  %v3294_v41 = vld [vmem:[%s6748_s1 + $0x310] sm:$0xff] }
 0x1f4   : > { %4076 = vmatprep.mubr.msk.f32.mxu0 %vm935_vm5, %v934_v25  ;;  %4151 = vmatprep.subr.mxu1 %v3288_v42 }
 0x1f5   : > { %4077 = vmatmul.mubr.f32.vlgmr.msra.gmra.mxu0 %v933_v18  ;;  %4152 = vmatpush3.msra.mxu1 %v3288_v42  ;;  %v3309_v42 = vld [vmem:[%s6748_s1 + $0x388] sm:$0xff] }
 0x1f6   : > { %4115 = vmatpush3.msra.mxu0 %v3269_v6  ;;  %4146 = vmatprep.mubr.f32.mxu0 %v946_v21  ;;  %v3322_v21 = vld [vmem:[%s6748_s1 + $0x3f0] sm:$0xff] }
 0x1f7   : > { %4116 = vmatprep.subr.mxu0 %v3268_v20  ;;  %4153 = vmatprep.subr.mxu1 %v3287_v44 }
 0x1f8   : > { %4117 = vmatpush3.msra.mxu0 %v3268_v20  ;;  %4154 = vmatpush3.msra.mxu1 %v3287_v44  ;;  %v3293_v44 = vld [vmem:[%s6748_s1 + $0x308] sm:$0xff] }
 0x1f9   : > { %4118 = vmatprep.subr.mxu0 %v3267_v22  ;;  %4155 = vmatprep.subr.mxu1 %v3286_v45 }
 0x1fa   : > { %4119 = vmatpush3.msra.mxu0 %v3267_v22  ;;  %4156 = vmatpush3.msra.mxu1 %v3286_v45  ;;  %v3321_v22 = vld [vmem:[%s6748_s1 + $0x3e8] sm:$0xff]  ;;  %v3308_v45 = vld [vmem:[%s6748_s1 + $0x380] sm:$0xff] }
 0x1fb   : > { %4120 = vmatprep.subr.mxu0 %v3266_v23  ;;  %4157 = vmatprep.subr.mxu1 %v3285_v46 }
 0x1fc   : > { %4121 = vmatpush3.msra.mxu0 %v3266_v23  ;;  %4158 = vmatpush3.msra.mxu1 %v3285_v46  ;;  %v3320_v23 = vld [vmem:[%s6748_s1 + $0x3e0] sm:$0xff] }
 0x1fd   : > { %4122 = vmatprep.subr.mxu0 %v3265_v27  ;;  %4159 = vmatprep.subr.mxu1 %v3284_v47  ;;  %v3292_v46 = vld [vmem:[%s6748_s1 + $0x300] sm:$0xff] }
 0x1fe   : > { %4123 = vmatpush3.msra.mxu0 %v3265_v27  ;;  %4160 = vmatpush3.msra.mxu1 %v3284_v47  ;;  %v3319_v27 = vld [vmem:[%s6748_s1 + $0x3d8] sm:$0xff] }
 0x1ff   : > { %4124 = vmatprep.subr.mxu0 %v3264_v28  ;;  %4161 = vmatprep.subr.mxu1 %v3283_v48  ;;  %v3339_v47 = vld [vmem:[%s6748_s1 + $0x478] sm:$0xff] }
 0x200   : > { %4125 = vmatpush3.msra.mxu0 %v3264_v28  ;;  %4162 = vmatpush3.msra.mxu1 %v3283_v48  ;;  %v3318_v28 = vld [vmem:[%s6748_s1 + $0x3d0] sm:$0xff]  ;;  %v3291_v48 = vld [vmem:[%s6751_s4 + $0x1] ss:$0 sm:$0xff] }
 0x201   : > { %4126 = vmatprep.subr.mxu0 %v3263_v29  ;;  %4163 = vmatprep.subr.mxu1 %v3282_v49 }
 0x202   : > { %4127 = vmatpush3.msra.mxu0 %v3263_v29  ;;  %4164 = vmatpush3.msra.mxu1 %v3282_v49  ;;  %v3317_v29 = vld [vmem:[%s6748_s1 + $0x3c8] sm:$0xff] }
 0x203   : > { %4128 = vmatprep.subr.mxu0 %v3262_v30  ;;  %4165 = vmatprep.subr.mxu1 %v3281_v50 }
 0x204   : > { %4129 = vmatpush3.msra.mxu0 %v3262_v30  ;;  %4166 = vmatpush3.msra.mxu1 %v3281_v50  ;;  %v3316_v30 = vld [vmem:[%s6748_s1 + $0x3c0] sm:$0xff] }
 0x205   : > { %4130 = vmatprep.subr.mxu0 %v3261_v31  ;;  %4167 = vmatprep.subr.mxu1 %v3280_v51 }
 0x206   : > { %4131 = vmatpush3.msra.mxu0 %v3261_v31  ;;  %4168 = vmatpush3.msra.mxu1 %v3280_v51  ;;  %v3315_v31 = vld [vmem:[%s6748_s1 + $0x3b8] sm:$0xff] }
 0x207   : > { %4132 = vmatprep.subr.mxu0 %v3260_v32  ;;  %4169 = vmatprep.subr.mxu1 %v3279_v52 }
 0x208   : > { %4133 = vmatpush3.msra.mxu0 %v3260_v32  ;;  %4170 = vmatpush3.msra.mxu1 %v3279_v52  ;;  %v3314_v32 = vld [vmem:[%s6748_s1 + $0x3b0] sm:$0xff] }
 0x209   : > { %4134 = vmatprep.subr.mxu0 %v3259_v33  ;;  %4171 = vmatprep.subr.mxu1 %v3278_v53 }
 0x20a   : > { %4135 = vmatpush3.msra.mxu0 %v3259_v33  ;;  %4172 = vmatpush3.msra.mxu1 %v3278_v53  ;;  %v3313_v33 = vld [vmem:[%s6748_s1 + $0x3a8] sm:$0xff] }
 0x20b   : > { %4136 = vmatprep.subr.mxu0 %v3258_v34  ;;  %4173 = vmatprep.subr.mxu1 %v3277_v54 }
 0x20c   : > { %4137 = vmatpush3.msra.mxu0 %v3258_v34  ;;  %4174 = vmatpush3.msra.mxu1 %v3277_v54  ;;  %v3297_v34 = vld [vmem:[%s6748_s1 + $0x328] sm:$0xff] }
 0x20d   : > { %4138 = vmatprep.subr.mxu0 %v3257_v35  ;;  %4175 = vmatprep.subr.mxu1 %v3276_v55 }
 0x20e   : > { %4139 = vmatpush3.msra.mxu0 %v3257_v35  ;;  %4176 = vmatpush3.msra.mxu1 %v3276_v55  ;;  %v3312_v35 = vld [vmem:[%s6748_s1 + $0x3a0] sm:$0xff] }
 0x20f   : > { %4140 = vmatprep.subr.mxu0 %v3256_v36  ;;  %4177 = vmatprep.subr.mxu1 %v3275_v56 }
 0x210   : > { %4141 = vmatpush3.msra.mxu0 %v3256_v36  ;;  %4178 = vmatpush3.msra.mxu1 %v3275_v56  ;;  %v3296_v36 = vld [vmem:[%s6748_s1 + $0x320] sm:$0xff] }
 0x211   : > { %4142 = vmatprep.subr.mxu0 %v3255_v37  ;;  %4179 = vmatprep.subr.mxu1 %v3274_v57 }
 0x212   : > { %4143 = vmatpush3.msra.mxu0 %v3255_v37  ;;  %4180 = vmatpush3.msra.mxu1 %v3274_v57  ;;  %v3311_v37 = vld [vmem:[%s6748_s1 + $0x398] sm:$0xff] }
 0x213   : > { %4144 = vmatprep.subr.mxu0 %v3254_v39  ;;  %4219 = vmatprep.subr.mxu1 %v3323_v58 }
 0x214   : > { %4145 = vmatpush3.msra.mxu0 %v3254_v39  ;;  %v3295_v39 = vld [vmem:[%s6748_s1 + $0x318] sm:$0xff] }
 0x215   : > { %4147 = vmatmul.mubr.msk.f32.vlgmr.msra.gmra.mxu0 %vm949_vm7, %v947_v40  ;;  %4184 = vmatprep.subr.mxu0 %v3307_v59  ;;  %v3310_v40 = vld [vmem:[%s6748_s1 + $0x390] sm:$0xff] }
 0x216   : > { %4185 = vmatpush3.msra.mxu0 %v3307_v59 }
 0x217   : > { %4186 = vmatprep.subr.mxu0 %v3306_v60 }
 0x218   : > { %4187 = vmatpush3.msra.mxu0 %v3306_v60 }
 0x219   : > { %4188 = vmatprep.subr.mxu0 %v3305_v61 }
 0x21a   : > { %4189 = vmatpush3.msra.mxu0 %v3305_v61  ;;  %v3338_v61 = vld [vmem:[%s6748_s1 + $0x470] sm:$0xff] }
 0x21b   : > { %4190 = vmatprep.subr.mxu0 %v3304_v62 }
 0x21c   : > { %4191 = vmatpush3.msra.mxu0 %v3304_v62 }
 0x21d   : > { %4192 = vmatprep.subr.mxu0 %v3303_v63 }
 0x21e   : > { %4193 = vmatpush3.msra.mxu0 %v3303_v63  ;;  %v3337_v63 = vld [vmem:[%s6748_s1 + $0x468] sm:$0xff] }
 0x21f   : > { %4194 = vmatprep.subr.mxu0 %v3302_v1 }
 0x220   : > { %4195 = vmatpush3.msra.mxu0 %v3302_v1  ;;  %v3336_v1 = vld [vmem:[%s6748_s1 + $0x460] sm:$0xff] }
 0x221   : > { %4196 = vmatprep.subr.mxu0 %v3301_v2 }
 0x222   : > { %4197 = vmatpush3.msra.mxu0 %v3301_v2  ;;  %v3335_v2 = vld [vmem:[%s6748_s1 + $0x458] sm:$0xff] }
 0x223   : > { %4198 = vmatprep.subr.mxu0 %v3300_v3 }
 0x224   : > { %4199 = vmatpush3.msra.mxu0 %v3300_v3  ;;  %v3334_v3 = vld [vmem:[%s6748_s1 + $0x450] sm:$0xff] }
 0x225   : > { %4200 = vmatprep.subr.mxu0 %v3299_v4 }
 0x226   : > { %4201 = vmatpush3.msra.mxu0 %v3299_v4  ;;  %v3333_v4 = vld [vmem:[%s6748_s1 + $0x448] sm:$0xff] }
 0x227   : > { %4202 = vmatprep.subr.mxu0 %v3298_v5 }
 0x228   : > { %4203 = vmatpush3.msra.mxu0 %v3298_v5  ;;  %v3332_v5 = vld [vmem:[%s6748_s1 + $0x440] sm:$0xff] }
 0x229   : > { %4204 = vmatprep.subr.mxu0 %v3297_v34 }
 0x22a   : > { %4205 = vmatpush3.msra.mxu0 %v3297_v34  ;;  %v1746_v34 = vld [vmem:[%s6752_s5 + $0xf8] sm:$0xff] }
 0x22b   : > { %4206 = vmatprep.subr.mxu0 %v3296_v36 }
 0x22c   : > { %4207 = vmatpush3.msra.mxu0 %v3296_v36  ;;  %v1744_v36 = vld [vmem:[%s6752_s5 + $0xe8] sm:$0xff] }
 0x22d   : > { %4208 = vmatprep.subr.mxu0 %v3295_v39 }
 0x22e   : > { %4209 = vmatpush3.msra.mxu0 %v3295_v39  ;;  %v1742_v39 = vld [vmem:[%s6752_s5 + $0xd8] sm:$0xff] }
 0x22f   : > { %4210 = vmatprep.subr.mxu0 %v3294_v41 }
 0x230   : > { %4211 = vmatpush3.msra.mxu0 %v3294_v41  ;;  %v1741_v41 = vld [vmem:[%s6752_s5 + $0xd0] sm:$0xff] }
 0x231   : > { %4212 = vmatprep.subr.mxu0 %v3293_v44 }
 0x232   : > { %4213 = vmatpush3.msra.mxu0 %v3293_v44  ;;  %v1739_v44 = vld [vmem:[%s6752_s5 + $0xc0] sm:$0xff] }
 0x233   : > { %4214 = vmatprep.subr.mxu0 %v3292_v46 }
 0x234   : > { %4215 = vmatpush3.msra.mxu0 %v3292_v46  ;;  %v1737_v46 = vld [vmem:[%s6752_s5 + $0xb0] sm:$0xff] }
 0x235   : > { %4254 = vmatprep.subr.mxu0 %v3339_v47 }
 0x2b2   : > { %v4113_v7 = vpop.f32.mrf.mxu1 }
 0x2b4   : > { %v1097_v10 = vpop.f32.mrf.mxu1 }
 0x2b5   : > { %v4078_v6 = vpop.f32.mrf.mxu0 }
 0x2b6   : > { %v1103_v9 = vadd.f32 %v4113_v7, %v4078_v6  ;;  %v3331_v6 = vld [vmem:[%s6748_s1 + $0x438] sm:$0xff]  ;;  %v3330_v7 = vld [vmem:[%s6748_s1 + $0x430] sm:$0xff] }
 0x2b7   : > { %v1022_v8 = vpop.f32.mrf.mxu0 }
 0x2b8   : > { %v1098_v13 = vadd.f32 %v1097_v10, %v1022_v8  ;;  %v3329_v8 = vld [vmem:[%s6748_s1 + $0x428] sm:$0xff]  ;;  %v3327_v10 = vld [vmem:[%s6748_s1 + $0x418] sm:$0xff] }
 0x2d5   : > { %v4148_v12 = vpop.f32.mrf.mxu0 }
 0x2d6   : > { %v1182_v15 = vadd.f32 %v4148_v12, %v1103_v9  ;;  %v3328_v9 = vld [vmem:[%s6748_s1 + $0x420] sm:$0xff]  ;;  %v3326_v12 = vld [vmem:[%s6748_s1 + $0x410] sm:$0xff] }
 0x2d7   : > { %v1172_v17 = vpop.f32.mrf.mxu0 }
 0x2d8   : > { %v1181_v26 = vadd.f32 %v1172_v17, %v1098_v13  ;;  %v1192_v25 = vadd.f32 %v3273_v16, %v1182_v15  ;;  %v3325_v13 = vld [vmem:[%s6748_s1 + $0x408] sm:$0xff]  ;;  %v3324_v15 = vld [vmem:[%s6748_s1 + $0x400] sm:$0xff]  ;;  %v3359_v17 = vld [vmem:[%s6750_s3 + $0x178] sm:$0xff] }
 0x2da   : > { %v1191_v18 = vadd.f32 %v3273_v16, %v1181_v26  ;;  %v1194_v20 = vmax.f32 %v1192_v25, 0.0  ;;  %v3358_v26 = vld [vmem:[%s6750_s3 + $0x170] sm:$0xff]  ;;  %v3357_v25 = vld [vmem:[%s6750_s3 + $0x168] sm:$0xff] }
 0x2dc   : > { %v1193_v19 = vmax.f32 %v1191_v18, 0.0  ;;  %v3356_v18 = vld [vmem:[%s6750_s3 + $0x160] sm:$0xff] }
 0x2de   : > { %4181 = vmatprep.mubr.f32.mxu1 %v1193_v19  ;;  %v3355_v19 = vld [vmem:[%s6750_s3 + $0x158] sm:$0xff] }
 0x2df   : > { %4182 = vmatmul.mubr.f32.vlgmr.msra.gmra.mxu1 %v1194_v20  ;;  %v3354_v20 = vld [vmem:[%s6750_s3 + $0x150] sm:$0xff] }
 0x2e0   : > { %4220 = vmatpush3.msra.mxu1 %v3323_v58 }
 0x2e1   : > { %4221 = vmatprep.subr.mxu1 %v3322_v21 }
 0x2e2   : > { %4222 = vmatpush3.msra.mxu1 %v3322_v21  ;;  %v3353_v21 = vld [vmem:[%s6750_s3 + $0x148] sm:$0xff] }
 0x2e3   : > { %4223 = vmatprep.subr.mxu1 %v3321_v22 }
 0x2e4   : > { %4224 = vmatpush3.msra.mxu1 %v3321_v22  ;;  %v3352_v22 = vld [vmem:[%s6750_s3 + $0x140] sm:$0xff] }
 0x2e5   : > { %4225 = vmatprep.subr.mxu1 %v3320_v23 }
 0x2e6   : > { %4226 = vmatpush3.msra.mxu1 %v3320_v23  ;;  %v3351_v23 = vld [vmem:[%s6750_s3 + $0x138] sm:$0xff] }
 0x2e7   : > { %4227 = vmatprep.subr.mxu1 %v3319_v27 }
 0x2e8   : > { %4228 = vmatpush3.msra.mxu1 %v3319_v27  ;;  %v3350_v27 = vld [vmem:[%s6750_s3 + $0x130] sm:$0xff] }
 0x2e9   : > { %4229 = vmatprep.subr.mxu1 %v3318_v28 }
 0x2ea   : > { %4230 = vmatpush3.msra.mxu1 %v3318_v28  ;;  %v3349_v28 = vld [vmem:[%s6750_s3 + $0x128] sm:$0xff] }
 0x2eb   : > { %4231 = vmatprep.subr.mxu1 %v3317_v29 }
 0x2ec   : > { %4232 = vmatpush3.msra.mxu1 %v3317_v29  ;;  %v3348_v29 = vld [vmem:[%s6750_s3 + $0x120] sm:$0xff] }
 0x2ed   : > { %4233 = vmatprep.subr.mxu1 %v3316_v30 }
 0x2ee   : > { %4234 = vmatpush3.msra.mxu1 %v3316_v30  ;;  %v3347_v30 = vld [vmem:[%s6750_s3 + $0x118] sm:$0xff] }
 0x2ef   : > { %4235 = vmatprep.subr.mxu1 %v3315_v31 }
 0x2f0   : > { %4236 = vmatpush3.msra.mxu1 %v3315_v31  ;;  %v3346_v31 = vld [vmem:[%s6750_s3 + $0x110] sm:$0xff] }
 0x2f1   : > { %4237 = vmatprep.subr.mxu1 %v3314_v32 }
 0x2f2   : > { %4238 = vmatpush3.msra.mxu1 %v3314_v32  ;;  %v3345_v32 = vld [vmem:[%s6750_s3 + $0x108] sm:$0xff] }
 0x2f3   : > { %4239 = vmatprep.subr.mxu1 %v3313_v33 }
 0x2f4   : > { %4240 = vmatpush3.msra.mxu1 %v3313_v33  ;;  %v3344_v33 = vld [vmem:[%s6750_s3 + $0x100] sm:$0xff] }
 0x2f5   : > { %4241 = vmatprep.subr.mxu1 %v3312_v35 }
 0x2f6   : > { %4242 = vmatpush3.msra.mxu1 %v3312_v35  ;;  %v1745_v35 = vld [vmem:[%s6752_s5 + $0xf0] sm:$0xff] }
 0x2f7   : > { %4243 = vmatprep.subr.mxu1 %v3311_v37 }
 0x2f8   : > { %4244 = vmatpush3.msra.mxu1 %v3311_v37  ;;  %v1743_v37 = vld [vmem:[%s6752_s5 + $0xe0] sm:$0xff] }
 0x2f9   : > { %4245 = vmatprep.subr.mxu1 %v3310_v40 }
 0x2fa   : > { %4246 = vmatpush3.msra.mxu1 %v3310_v40  ;;  %v5672_v40 = vld [vmem:[#allocation2 + $0x78] sm:$0xff] }
 0x2fb   : > { %4247 = vmatprep.subr.mxu1 %v3309_v42 }
 0x2fc   : > { %4248 = vmatpush3.msra.mxu1 %v3309_v42  ;;  %v1740_v42 = vld [vmem:[%s6752_s5 + $0xc8] sm:$0xff] }
 0x2fd   : > { %4249 = vmatprep.subr.mxu1 %v3308_v45 }
 0x2fe   : > { %4250 = vmatpush3.msra.mxu1 %v3308_v45  ;;  %v1738_v45 = vld [vmem:[%s6752_s5 + $0xb8] sm:$0xff] }
 0x2ff   : > { %4289 = vmatprep.subr.mxu1 %v3359_v17 }
 0x39f   : > { %v4183_v49 = vpop.f32.mrf.mxu1 }
 0x3a0   : > { %v1292_v50 = vadd.f32 %v4183_v49, %v3291_v48  ;;  %v1734_v49 = vld [vmem:[%s6752_s5 + $0x98] sm:$0xff] }
 0x3a1   : > { %v1286_v51 = vpop.f32.mrf.mxu1 }
 0x3a2   : > { %v5532_v52 = vadd.f32 %v1292_v50, %v5308_v11  ;;  %v1287_v53 = vadd.f32 %v3291_v48, %v1286_v51  ;;  %v1735_v48 = vld [vmem:[%s6752_s5 + $0xa0] sm:$0xff]  ;;  %v1733_v50 = vld [vmem:[%s6752_s5 + $0x90] sm:$0xff]  ;;  %v1732_v51 = vld [vmem:[%s6752_s5 + $0x88] sm:$0xff] }
 0x3a4   : > { %v5535_v54 = vmax.f32 %v5532_v52, 0.0  ;;  %v5538_v55 = vadd.f32 %v1287_v53, %v5314_v14  ;;  %v1731_v53 = vld [vmem:[%s6752_s5 + $0x80] sm:$0xff] }
 0x3a6   : > { %v5541_v56 = vmax.f32 %v5538_v55, 0.0  ;;  %v1351_v58 = vrot.slane %v5535_v54, 7  ;;  %v1363_v60 = vrot.slane %v5535_v54, 1 }
 0x3a8   : > { %4251 = vmatprep.mubr.f32.mxu1 %v5541_v56  ;;  %v1350_v57 = vrot.slane %v5541_v56, 7  ;;  %v1362_v11 = vrot.slane %v5541_v56, 1  ;;  %v1729_v56 = vld [vmem:[%s6752_s5 + $0x70] sm:$0xff] }
 0x3a9   : > { %4252 = vmatmul.mubr.f32.vlgmr.msra.gmra.mxu1 %v5535_v54  ;;  %v1730_v54 = vld [vmem:[%s6752_s5 + $0x78] sm:$0xff] }
 0x3aa   : > { %v1353_v59 = vsel %vm515_vm0, %v1351_v58, %v1350_v57  ;;  %v1352_v14 = vsel %vm515_vm0, %v1350_v57, %v1351_v58  ;;  %v1364_v62 = vsel %vm528_vm1, %v1362_v11, %v1363_v60  ;;  %v1365_v16 = vsel %vm528_vm1, %v1363_v60, %v1362_v11  ;;  %4290 = vmatpush3.msra.mxu1 %v3359_v17  ;;  %v1728_v57 = vld [vmem:[%s6752_s5 + $0x68] sm:$0xff]  ;;  %v1727_v58 = vld [vmem:[%s6752_s5 + $0x60] sm:$0xff]  ;;  %v1726_v11 = vld [vmem:[%s6752_s5 + $0x58] sm:$0xff] }
 0x3ab   : > { %4216 = vmatprep.mubr.msk.f32.mxu0 %vm1354_vm8, %v1353_v59  ;;  %4291 = vmatprep.subr.mxu1 %v3358_v26  ;;  %v1725_v59 = vld [vmem:[%s6752_s5 + $0x50] sm:$0xff]  ;;  %v1723_v60 = vld [vmem:[%s6752_s5 + $0x40] sm:$0xff] }
 0x3ac   : > { %4217 = vmatmul.mubr.f32.vlgmr.msra.gmra.mxu0 %v1352_v14  ;;  %4292 = vmatpush3.msra.mxu1 %v3358_v26  ;;  %v1724_v14 = vld [vmem:[%s6752_s5 + $0x48] sm:$0xff]  ;;  %v1862_v17 = vld [vmem:[#allocation2 + $0x70] sm:$0xff] }
 0x3ad   : > { %4255 = vmatpush3.msra.mxu0 %v3339_v47  ;;  %4286 = vmatprep.mubr.f32.mxu0 %v1364_v62  ;;  %v1736_v47 = vld [vmem:[%s6752_s5 + $0xa8] sm:$0xff]  ;;  %v1721_v62 = vld [vmem:[%s6752_s5 + $0x30] sm:$0xff] }
 0x3ae   : > { %4256 = vmatprep.subr.mxu0 %v3338_v61  ;;  %4293 = vmatprep.subr.mxu1 %v3357_v25  ;;  %v1861_v26 = vld [vmem:[#allocation2 + $0x68] sm:$0xff] }
 0x3af   : > { %4257 = vmatpush3.msra.mxu0 %v3338_v61  ;;  %4294 = vmatpush3.msra.mxu1 %v3357_v25  ;;  %v1722_v61 = vld [vmem:[%s6752_s5 + $0x38] sm:$0xff]  ;;  %v1860_v25 = vld [vmem:[#allocation2 + $0x60] sm:$0xff] }
 0x3b0   : > { %4258 = vmatprep.subr.mxu0 %v3337_v63  ;;  %4295 = vmatprep.subr.mxu1 %v3356_v18 }
 0x3b1   : > { %4259 = vmatpush3.msra.mxu0 %v3337_v63  ;;  %4296 = vmatpush3.msra.mxu1 %v3356_v18  ;;  %v1859_v18 = vld [vmem:[#allocation2 + $0x58] sm:$0xff] }
 0x3b2   : > { %4260 = vmatprep.subr.mxu0 %v3336_v1  ;;  %4297 = vmatprep.subr.mxu1 %v3355_v19 }
 0x3b3   : > { %4261 = vmatpush3.msra.mxu0 %v3336_v1  ;;  %4298 = vmatpush3.msra.mxu1 %v3355_v19  ;;  %v1858_v19 = vld [vmem:[#allocation2 + $0x50] sm:$0xff] }
 0x3b4   : > { %4262 = vmatprep.subr.mxu0 %v3335_v2  ;;  %4299 = vmatprep.subr.mxu1 %v3354_v20 }
 0x3b5   : > { %4263 = vmatpush3.msra.mxu0 %v3335_v2  ;;  %4300 = vmatpush3.msra.mxu1 %v3354_v20  ;;  %v1857_v20 = vld [vmem:[#allocation2 + $0x48] sm:$0xff] }
 0x3b6   : > { %4264 = vmatprep.subr.mxu0 %v3334_v3  ;;  %4301 = vmatprep.subr.mxu1 %v3353_v21 }
 0x3b7   : > { %4265 = vmatpush3.msra.mxu0 %v3334_v3  ;;  %4302 = vmatpush3.msra.mxu1 %v3353_v21  ;;  %v1856_v21 = vld [vmem:[#allocation2 + $0x40] sm:$0xff] }
 0x3b8   : > { %4266 = vmatprep.subr.mxu0 %v3333_v4  ;;  %4303 = vmatprep.subr.mxu1 %v3352_v22 }
 0x3b9   : > { %4267 = vmatpush3.msra.mxu0 %v3333_v4  ;;  %4304 = vmatpush3.msra.mxu1 %v3352_v22  ;;  %v1855_v22 = vld [vmem:[#allocation2 + $0x38] sm:$0xff] }
 0x3ba   : > { %4268 = vmatprep.subr.mxu0 %v3332_v5  ;;  %4305 = vmatprep.subr.mxu1 %v3351_v23 }
 0x3bb   : > { %4269 = vmatpush3.msra.mxu0 %v3332_v5  ;;  %4306 = vmatpush3.msra.mxu1 %v3351_v23  ;;  %v1854_v23 = vld [vmem:[#allocation2 + $0x30] sm:$0xff] }
 0x3bc   : > { %4270 = vmatprep.subr.mxu0 %v3331_v6  ;;  %4307 = vmatprep.subr.mxu1 %v3350_v27 }
 0x3bd   : > { %4271 = vmatpush3.msra.mxu0 %v3331_v6  ;;  %4308 = vmatpush3.msra.mxu1 %v3350_v27  ;;  %v1853_v27 = vld [vmem:[#allocation2 + $0x28] sm:$0xff] }
 0x3be   : > { %4272 = vmatprep.subr.mxu0 %v3330_v7  ;;  %4309 = vmatprep.subr.mxu1 %v3349_v28 }
 0x3bf   : > { %4273 = vmatpush3.msra.mxu0 %v3330_v7  ;;  %4310 = vmatpush3.msra.mxu1 %v3349_v28  ;;  %v1720_v28 = vld [vmem:[%s6752_s5 + $0x28] sm:$0xff] }
 0x3c0   : > { %4274 = vmatprep.subr.mxu0 %v3329_v8  ;;  %4311 = vmatprep.subr.mxu1 %v3348_v29 }
 0x3c1   : > { %4275 = vmatpush3.msra.mxu0 %v3329_v8  ;;  %4312 = vmatpush3.msra.mxu1 %v3348_v29  ;;  %v3343_v8 = vld [vmem:[%s6749_s2 + $0x2] ss:$0 sm:$0xff] }
 0x3c2   : > { %4276 = vmatprep.subr.mxu0 %v3328_v9  ;;  %4313 = vmatprep.subr.mxu1 %v3347_v30  ;;  %v1719_v29 = vld [vmem:[%s6752_s5 + $0x20] sm:$0xff] }
 0x3c3   : > { %4277 = vmatpush3.msra.mxu0 %v3328_v9  ;;  %4314 = vmatpush3.msra.mxu1 %v3347_v30  ;;  %v1852_v30 = vld [vmem:[#allocation2 + $0x20] sm:$0xff] }
 0x3c4   : > { %4278 = vmatprep.subr.mxu0 %v3327_v10  ;;  %4315 = vmatprep.subr.mxu1 %v3346_v31 }
 0x3c5   : > { %4279 = vmatpush3.msra.mxu0 %v3327_v10  ;;  %4316 = vmatpush3.msra.mxu1 %v3346_v31  ;;  %v1718_v31 = vld [vmem:[%s6752_s5 + $0x18] sm:$0xff] }
 0x3c6   : > { %4280 = vmatprep.subr.mxu0 %v3326_v12  ;;  %4317 = vmatprep.subr.mxu1 %v3345_v32 }
 0x3c7   : > { %4281 = vmatpush3.msra.mxu0 %v3326_v12  ;;  %4318 = vmatpush3.msra.mxu1 %v3345_v32  ;;  %v1717_v32 = vld [vmem:[%s6752_s5 + $0x10] sm:$0xff] }
 0x3c8   : > { %4282 = vmatprep.subr.mxu0 %v3325_v13  ;;  %4319 = vmatprep.subr.mxu1 %v3344_v33 }
 0x3c9   : > { %4283 = vmatpush3.msra.mxu0 %v3325_v13  ;;  %4320 = vmatpush3.msra.mxu1 %v3344_v33  ;;  %v1851_v33 = vld [vmem:[#allocation2 + $0x18] sm:$0xff] }
 0x3ca   : > { %4284 = vmatprep.subr.mxu0 %v3324_v15  ;;  %4324 = vmatprep.subr.mxu1 %v5672_v40 }
 0x3cb   : > { %4285 = vmatpush3.msra.mxu0 %v3324_v15 }
 0x3cc   : > { %4287 = vmatmul.mubr.msk.f32.vlgmr.msra.gmra.mxu0 %vm1367_vm9, %v1365_v16  ;;  %1759 = vmatprep.subr.mxu0 %v1746_v34  ;;  %v1716_v34 = vld [vmem:[%s6752_s5 + $0x8] sm:$0xff] }
 0x3cd   : > { %1823 = vmatprep.mubr.f32.mxu0 %v4878_v0  ;;  %1760 = vmatpush1.msra.mxu0 %v1745_v35  ;;  %v1715_v35 = vld [vmem:[%s6752_s5] sm:$0xff] }
 0x3ce   : > { %1761 = vmatprep.subr.mxu0 %v1744_v36  ;;  %v1850_v36 = vld [vmem:[#allocation2 + $0x10] sm:$0xff] }
 0x3cf   : > { %1762 = vmatpush1.msra.mxu0 %v1743_v37  ;;  %v1955_v37 = vld [vmem:[#allocation2 + $0xf8] sm:$0xff] }
 0x3d0   : > { %1763 = vmatprep.subr.mxu0 %v1742_v39  ;;  %v1849_v39 = vld [vmem:[#allocation2 + $0x8] sm:$0xff] }
 0x3d1   : > { %1764 = vmatpush1.msra.mxu0 %v1741_v41  ;;  %v5763_v41 = vld [vmem:[%s6755_s8 + $0xf8] sm:$0xff] }
 0x3d2   : > { %1765 = vmatprep.subr.mxu0 %v1740_v42  ;;  %v3361_v42 = vld [vmem:[%s6751_s4 + $0x2] ss:$0 sm:$0xff] }
 0x3d3   : > { %1766 = vmatpush1.msra.mxu0 %v1739_v44 }
 0x3d4   : > { %1767 = vmatprep.subr.mxu0 %v1738_v45 }
 0x3d5   : > { %1768 = vmatpush1.msra.mxu0 %v1737_v46 }
 0x3d6   : > { %1769 = vmatprep.subr.mxu0 %v1736_v47 }
 0x3d7   : > { %1770 = vmatpush1.msra.mxu0 %v1735_v48 }
 0x3d8   : > { %1771 = vmatprep.subr.mxu0 %v1734_v49 }
 0x3d9   : > { %1772 = vmatpush1.msra.mxu0 %v1733_v50  ;;  %v1954_v50 = vld [vmem:[#allocation2 + $0xf0] sm:$0xff] }
 0x3da   : > { %1773 = vmatprep.subr.mxu0 %v1732_v51 }
 0x3db   : > { %1774 = vmatpush1.msra.mxu0 %v1731_v53 }
 0x3dc   : > { %1775 = vmatprep.subr.mxu0 %v1730_v54  ;;  %v1953_v54 = vld [vmem:[#allocation2 + $0xe8] sm:$0xff] }
 0x3dd   : > { %1776 = vmatpush1.msra.mxu0 %v1729_v56 }
 0x3de   : > { %1777 = vmatprep.subr.mxu0 %v1728_v57  ;;  %v1952_v57 = vld [vmem:[#allocation2 + $0xe0] sm:$0xff] }
 0x3df   : > { %1778 = vmatpush1.msra.mxu0 %v1727_v58 }
 0x3e0   : > { %1779 = vmatprep.subr.mxu0 %v1726_v11  ;;  %v1951_v11 = vld [vmem:[#allocation2 + $0xd8] sm:$0xff] }
 0x3e1   : > { %1780 = vmatpush1.msra.mxu0 %v1725_v59  ;;  %v5797_v59 = vld [vmem:[%s6755_s8 + $0xf0] sm:$0xff] }
 0x3e2   : > { %1781 = vmatprep.subr.mxu0 %v1724_v14  ;;  %v1950_v14 = vld [vmem:[#allocation2 + $0xd0] sm:$0xff] }
 0x3e3   : > { %1782 = vmatpush1.msra.mxu0 %v1723_v60  ;;  %v5803_v60 = vld [vmem:[%s6755_s8 + $0xe8] sm:$0xff] }
 0x3e4   : > { %1783 = vmatprep.subr.mxu0 %v1722_v61  ;;  %v1949_v61 = vld [vmem:[#allocation2 + $0xc8] sm:$0xff] }
 0x3e5   : > { %1784 = vmatpush1.msra.mxu0 %v1721_v62  ;;  %v5810_v62 = vld [vmem:[%s6755_s8 + $0xe0] sm:$0xff] }
 0x3e6   : > { %1785 = vmatprep.subr.mxu0 %v1720_v28  ;;  %v5931_v28 = vld [vmem:[%s6755_s8 + $0x68] sm:$0xff] }
 0x3e7   : > { %1786 = vmatpush1.msra.mxu0 %v1719_v29  ;;  %v5938_v29 = vld [vmem:[%s6755_s8 + $0x60] sm:$0xff] }
 0x3e8   : > { %1787 = vmatprep.subr.mxu0 %v1718_v31  ;;  %v5952_v31 = vld [vmem:[%s6755_s8 + $0x50] sm:$0xff] }
 0x3e9   : > { %1788 = vmatpush1.msra.mxu0 %v1717_v32  ;;  %v5959_v32 = vld [vmem:[%s6755_s8 + $0x48] sm:$0xff] }
 0x3ea   : > { %1789 = vmatprep.subr.mxu0 %v1716_v34  ;;  %v5973_v34 = vld [vmem:[%s6755_s8 + $0x38] sm:$0xff] }
 0x3eb   : > { %1790 = vmatpush1.msra.mxu0 %v1715_v35  ;;  %v5980_v35 = vld [vmem:[%s6755_s8 + $0x30] sm:$0xff] }
 0x3ec   : > { %4359 = vmatprep.subr.mxu0 %v1955_v37 }
 0x469   : > { %v4253_v1 = vpop.f32.mrf.mxu1 }
 0x46b   : > { %v1515_v4 = vpop.f32.mrf.mxu1 }
 0x46c   : > { %v4218_v63 = vpop.f32.mrf.mxu0 }
 0x46d   : > { %v1521_v3 = vadd.f32 %v4253_v1, %v4218_v63  ;;  %v1948_v63 = vld [vmem:[#allocation2 + $0xc0] sm:$0xff]  ;;  %v5817_v1 = vld [vmem:[%s6755_s8 + $0xd8] sm:$0xff] }
 0x46e   : > { %v1440_v2 = vpop.f32.mrf.mxu0 }
 0x46f   : > { %v1516_v6 = vadd.f32 %v1515_v4, %v1440_v2  ;;  %v1947_v2 = vld [vmem:[#allocation2 + $0xb8] sm:$0xff]  ;;  %v1946_v4 = vld [vmem:[#allocation2 + $0xb0] sm:$0xff] }
 0x48c   : > { %v4288_v5 = vpop.f32.mrf.mxu0 }
 0x48d   : > { %v1600_v7 = vadd.f32 %v4288_v5, %v1521_v3  ;;  %v5824_v3 = vld [vmem:[%s6755_s8 + $0xd0] sm:$0xff]  ;;  %v5831_v5 = vld [vmem:[%s6755_s8 + $0xc8] sm:$0xff] }
 0x48e   : > { %v1590_v9 = vpop.f32.mrf.mxu0 }
 0x48f   : > { %v1599_v10 = vadd.f32 %v1590_v9, %v1516_v6  ;;  %v1610_v12 = vadd.f32 %v3343_v8, %v1600_v7  ;;  %v1945_v6 = vld [vmem:[#allocation2 + $0xa8] sm:$0xff]  ;;  %v5838_v7 = vld [vmem:[%s6755_s8 + $0xc0] sm:$0xff]  ;;  %v5845_v9 = vld [vmem:[%s6755_s8 + $0xb8] sm:$0xff] }
 0x491   : > { %v1609_v13 = vadd.f32 %v3343_v8, %v1599_v10  ;;  %v1612_v16 = vmax.f32 %v1610_v12, 0.0  ;;  %v1944_v8 = vld [vmem:[#allocation2 + $0xa0] sm:$0xff]  ;;  %v1943_v10 = vld [vmem:[#allocation2 + $0x98] sm:$0xff]  ;;  %v5852_v12 = vld [vmem:[%s6755_s8 + $0xb0] sm:$0xff] }
 0x493   : > { %v1611_v15 = vmax.f32 %v1609_v13, 0.0  ;;  %v1942_v13 = vld [vmem:[#allocation2 + $0x90] sm:$0xff] }
 0x495   : > { %4321 = vmatprep.mubr.f32.mxu1 %v1611_v15  ;;  %v5859_v15 = vld [vmem:[%s6755_s8 + $0xa8] sm:$0xff] }
 0x496   : > { %4322 = vmatmul.mubr.f32.vlgmr.msra.gmra.mxu1 %v1612_v16  ;;  %v1941_v16 = vld [vmem:[#allocation2 + $0x88] sm:$0xff] }
 0x497   : > { %4325 = vmatpush3.msra.mxu1 %v5672_v40  ;;  %v1848_v40 = vld [vmem:[#allocation2] sm:$0xff] }
 0x498   : > { %4326 = vmatprep.subr.mxu1 %v1862_v17 }
 0x499   : > { %4327 = vmatpush3.msra.mxu1 %v1862_v17  ;;  %v5866_v17 = vld [vmem:[%s6755_s8 + $0xa0] sm:$0xff] }
 0x49a   : > { %4328 = vmatprep.subr.mxu1 %v1861_v26 }
 0x49b   : > { %4329 = vmatpush3.msra.mxu1 %v1861_v26  ;;  %v1940_v26 = vld [vmem:[#allocation2 + $0x80] sm:$0xff] }
 0x49c   : > { %4330 = vmatprep.subr.mxu1 %v1860_v25 }
 0x49d   : > { %4331 = vmatpush3.msra.mxu1 %v1860_v25 }
 0x49e   : > { %4332 = vmatprep.subr.mxu1 %v1859_v18 }
 0x49f   : > { %4333 = vmatpush3.msra.mxu1 %v1859_v18  ;;  %v5883_v18 = vld [vmem:[%s6755_s8 + $0x98] sm:$0xff] }
 0x4a0   : > { %4334 = vmatprep.subr.mxu1 %v1858_v19 }
 0x4a1   : > { %4335 = vmatpush3.msra.mxu1 %v1858_v19  ;;  %v5890_v19 = vld [vmem:[%s6755_s8 + $0x90] sm:$0xff] }
 0x4a2   : > { %4336 = vmatprep.subr.mxu1 %v1857_v20 }
 0x4a3   : > { %4337 = vmatpush3.msra.mxu1 %v1857_v20  ;;  %v5897_v20 = vld [vmem:[%s6755_s8 + $0x88] sm:$0xff] }
 0x4a4   : > { %4338 = vmatprep.subr.mxu1 %v1856_v21 }
 0x4a5   : > { %4339 = vmatpush3.msra.mxu1 %v1856_v21  ;;  %v5904_v21 = vld [vmem:[%s6755_s8 + $0x80] sm:$0xff] }
 0x4a6   : > { %4340 = vmatprep.subr.mxu1 %v1855_v22 }
 0x4a7   : > { %4341 = vmatpush3.msra.mxu1 %v1855_v22  ;;  %v5909_v22 = vld [vmem:[%s6755_s8 + $0x78] sm:$0xff] }
 0x4a8   : > { %4342 = vmatprep.subr.mxu1 %v1854_v23 }
 0x4a9   : > { %4343 = vmatpush3.msra.mxu1 %v1854_v23  ;;  %v5918_v23 = vld [vmem:[%s6755_s8 + $0x70] sm:$0xff] }
 0x4aa   : > { %4344 = vmatprep.subr.mxu1 %v1853_v27 }
 0x4ab   : > { %4345 = vmatpush3.msra.mxu1 %v1853_v27  ;;  %v5923_v27 = vld [vmem:[%s6755_s8 + $0x178] sm:$0xff] }
 0x4ac   : > { %4346 = vmatprep.subr.mxu1 %v1852_v30 }
 0x4ad   : > { %4347 = vmatpush3.msra.mxu1 %v1852_v30  ;;  %v5945_v30 = vld [vmem:[%s6755_s8 + $0x58] sm:$0xff] }
 0x4ae   : > { %4348 = vmatprep.subr.mxu1 %v1851_v33 }
 0x4af   : > { %4349 = vmatpush3.msra.mxu1 %v1851_v33  ;;  %v5966_v33 = vld [vmem:[%s6755_s8 + $0x40] sm:$0xff] }
 0x4b0   : > { %4350 = vmatprep.subr.mxu1 %v1850_v36 }
 0x4b1   : > { %4351 = vmatpush3.msra.mxu1 %v1850_v36  ;;  %v5987_v36 = vld [vmem:[%s6755_s8 + $0x28] sm:$0xff] }
 0x4b2   : > { %4352 = vmatprep.subr.mxu1 %v1849_v39 }
 0x4b3   : > { %4353 = vmatpush3.msra.mxu1 %v1849_v39  ;;  %v6001_v39 = vld [vmem:[%s6755_s8 + $0x18] sm:$0xff] }
 0x4b4   : > { %4354 = vmatprep.subr.mxu1 %v1848_v40 }
 0x4b5   : > { %4355 = vmatpush3.msra.mxu1 %v1848_v40  ;;  %v6008_v40 = vld [vmem:[%s6755_s8 + $0x10] sm:$0xff] }
 0x4b6   : > { %4394 = vmatprep.subr.mxu1 %v5763_v41 }
 0x556   : > { %v4323_v44 = vpop.f32.mrf.mxu1 }
 0x557   : > { %v1710_v45 = vadd.f32 %v4323_v44, %v3361_v42  ;;  %v6022_v44 = vld [vmem:[%s6755_s8] sm:$0xff] }
 0x558   : > { %v1704_v46 = vpop.f32.mrf.mxu1 }
 0x559   : > { %v5770_v47 = vadd.f32 %v1710_v45, %v5532_v52  ;;  %v1705_v48 = vadd.f32 %v3361_v42, %v1704_v46  ;;  %v6015_v42 = vld [vmem:[%s6755_s8 + $0x8] sm:$0xff]  ;;  %v1751_v45 = vsub.s32 0, %v5053_v24  ;;  %v1747_v46 = vld [vmem:[%s6754_s7] sm:$0x3] }
 0x55b   : > { %v5773_v49 = vadd.f32 %v1705_v48, %v5538_v55  ;;  %v1837_v51 = vrot.slane %v5770_v47, 7  ;;  %v1843_v58 = vrot.slane %v5770_v47, 1  ;;  %v1752_v48 = vrot.slane %v1747_v46, %v1751_v45  ;;  %v6117_v45 = vld [vmem:[%s6755_s8 + $0x118] sm:$0xff] }
 0x55d   : > { %v1836_v53 = vrot.slane %v5773_v49, 7  ;;  %1824 = vmatmul.mubr.f32.vlgmr.msra.gmra.mxu0 %v5773_v49  ;;  %v1842_v56 = vrot.slane %v5773_v49, 1 }
 0x55e   : > { %4360 = vmatpush3.msra.mxu0 %v1955_v37  ;;  %1829 = vmatprep.mubr.f32.mxu0 %v4878_v0  ;;  %v5994_v37 = vld [vmem:[%s6755_s8 + $0x20] sm:$0xff] }
 0x55f   : > { %4361 = vmatprep.subr.mxu0 %v1954_v50  ;;  %v1839_v52 = vsel %vm515_vm0, %v1837_v51, %v1836_v53  ;;  %v1838_v55 = vsel %vm515_vm0, %v1836_v53, %v1837_v51  ;;  %v1844_v0 = vsel %vm528_vm1, %v1842_v56, %v1843_v58  ;;  %v1845_v25 = vsel %vm528_vm1, %v1843_v58, %v1842_v56  ;;  %v6046_v58 = vld [vmem:[%s6755_s8 + $0x168] sm:$0xff] }
 0x560   : > { %4362 = vmatpush3.msra.mxu0 %v1954_v50  ;;  %4356 = vmatprep.mubr.msk.f32.mxu1 %vm1354_vm8, %v1839_v52 }
 0x561   : > { %4363 = vmatprep.subr.mxu0 %v1953_v54  ;;  %1830 = vmatmul.mubr.f32.gmra.mxu0 %v5770_v47 }
 0x562   : > { %4357 = vmatmul.mubr.f32.vlgmr.msra.gmra.mxu1 %v1838_v55  ;;  %4364 = vmatpush3.msra.mxu0 %v1953_v54 }
 0x563   : > { %4365 = vmatprep.subr.mxu0 %v1952_v57  ;;  %4391 = vmatprep.mubr.f32.mxu0 %v1844_v0  ;;  %v6053_v0 = vld [vmem:[%s6755_s8 + $0x160] sm:$0xff] }
 0x564   : > { %4366 = vmatpush3.msra.mxu0 %v1952_v57  ;;  %4395 = vmatpush3.msra.mxu1 %v5763_v41  ;;  %v6039_v57 = vld [vmem:[%s6755_s8 + $0x170] sm:$0xff] }
 0x565   : > { %4367 = vmatprep.subr.mxu0 %v1951_v11  ;;  %4396 = vmatprep.subr.mxu1 %v5797_v59 }
 0x566   : > { %4368 = vmatpush3.msra.mxu0 %v1951_v11  ;;  %4397 = vmatpush3.msra.mxu1 %v5797_v59  ;;  %v6060_v11 = vld [vmem:[%s6755_s8 + $0x158] sm:$0xff] }
 0x567   : > { %4369 = vmatprep.subr.mxu0 %v1950_v14  ;;  %4398 = vmatprep.subr.mxu1 %v5803_v60 }
 0x568   : > { %4370 = vmatpush3.msra.mxu0 %v1950_v14  ;;  %4399 = vmatpush3.msra.mxu1 %v5803_v60  ;;  %v6067_v14 = vld [vmem:[%s6755_s8 + $0x150] sm:$0xff] }
 0x569   : > { %4371 = vmatprep.subr.mxu0 %v1949_v61  ;;  %4400 = vmatprep.subr.mxu1 %v5810_v62 }
 0x56a   : > { %4372 = vmatpush3.msra.mxu0 %v1949_v61  ;;  %4401 = vmatpush3.msra.mxu1 %v5810_v62  ;;  %v6074_v61 = vld [vmem:[%s6755_s8 + $0x148] sm:$0xff] }
 0x56b   : > { %4373 = vmatprep.subr.mxu0 %v1948_v63  ;;  %4402 = vmatprep.subr.mxu1 %v5817_v1 }
 0x56c   : > { %4374 = vmatpush3.msra.mxu0 %v1948_v63  ;;  %4403 = vmatpush3.msra.mxu1 %v5817_v1  ;;  %v6081_v63 = vld [vmem:[%s6755_s8 + $0x140] sm:$0xff] }
 0x56d   : > { %4375 = vmatprep.subr.mxu0 %v1947_v2  ;;  %4404 = vmatprep.subr.mxu1 %v5824_v3 }
 0x56e   : > { %4376 = vmatpush3.msra.mxu0 %v1947_v2  ;;  %4405 = vmatpush3.msra.mxu1 %v5824_v3  ;;  %v6088_v2 = vld [vmem:[%s6755_s8 + $0x138] sm:$0xff] }
 0x56f   : > { %4377 = vmatprep.subr.mxu0 %v1946_v4  ;;  %4406 = vmatprep.subr.mxu1 %v5831_v5 }
 0x570   : > { %4378 = vmatpush3.msra.mxu0 %v1946_v4  ;;  %4407 = vmatpush3.msra.mxu1 %v5831_v5  ;;  %v1755_v4 = vsub.s32 1, %v5053_v24 }
 0x571   : > { %4379 = vmatprep.subr.mxu0 %v1945_v6  ;;  %4408 = vmatprep.subr.mxu1 %v5838_v7 }
 0x572   : > { %4380 = vmatpush3.msra.mxu0 %v1945_v6  ;;  %4409 = vmatpush3.msra.mxu1 %v5838_v7  ;;  %v6096_v6 = vld [vmem:[%s6755_s8 + $0x130] sm:$0xff] }
 0x573   : > { %4381 = vmatprep.subr.mxu0 %v1944_v8  ;;  %4410 = vmatprep.subr.mxu1 %v5845_v9 }
 0x574   : > { %4382 = vmatpush3.msra.mxu0 %v1944_v8  ;;  %4411 = vmatpush3.msra.mxu1 %v5845_v9 }
 0x575   : > { %4383 = vmatprep.subr.mxu0 %v1943_v10  ;;  %4412 = vmatprep.subr.mxu1 %v5852_v12 }
 0x576   : > { %4384 = vmatpush3.msra.mxu0 %v1943_v10  ;;  %4413 = vmatpush3.msra.mxu1 %v5852_v12  ;;  %v6103_v10 = vld [vmem:[%s6755_s8 + $0x128] sm:$0xff] }
 0x577   : > { %4385 = vmatprep.subr.mxu0 %v1942_v13  ;;  %4414 = vmatprep.subr.mxu1 %v5859_v15 }
 0x578   : > { %4386 = vmatpush3.msra.mxu0 %v1942_v13  ;;  %4415 = vmatpush3.msra.mxu1 %v5859_v15  ;;  %v1756_v13 = vrot.slane %v1747_v46, %v1755_v4 }
 0x579   : > { %4387 = vmatprep.subr.mxu0 %v1941_v16  ;;  %4416 = vmatprep.subr.mxu1 %v5866_v17 }
 0x57a   : > { %4388 = vmatpush3.msra.mxu0 %v1941_v16  ;;  %4417 = vmatpush3.msra.mxu1 %v5866_v17  ;;  %v6110_v16 = vld [vmem:[%s6755_s8 + $0x120] sm:$0xff] }
 0x57b   : > { %4389 = vmatprep.subr.mxu0 %v1940_v26  ;;  %4418 = vmatprep.subr.mxu1 %v5883_v18 }
 0x57c   : > { %4390 = vmatpush3.msra.mxu0 %v1940_v26  ;;  %4419 = vmatpush3.msra.mxu1 %v5883_v18 }
 0x57d   : > { %4392 = vmatmul.mubr.msk.f32.vlgmr.msra.gmra.mxu0 %vm1367_vm9, %v1845_v25  ;;  %4420 = vmatprep.subr.mxu1 %v5890_v19 }
 0x57e   : > { %4421 = vmatpush3.msra.mxu1 %v5890_v19  ;;  %4429 = vmatprep.subr.mxu0 %v5909_v22 }
 0x57f   : > { %4422 = vmatprep.subr.mxu1 %v5897_v20  ;;  %4430 = vmatpush3.msra.mxu0 %v5909_v22 }
 0x580   : > { %4423 = vmatpush3.msra.mxu1 %v5897_v20  ;;  %4431 = vmatprep.subr.mxu0 %v5918_v23 }
 0x581   : > { %4424 = vmatprep.subr.mxu1 %v5904_v21  ;;  %4432 = vmatpush3.msra.mxu0 %v5918_v23 }
 0x582   : > { %4425 = vmatpush3.msra.mxu1 %v5904_v21  ;;  %4433 = vmatprep.subr.mxu0 %v5931_v28 }
 0x583   : > { %4464 = vmatprep.subr.mxu1 %v5923_v27  ;;  %4434 = vmatpush3.msra.mxu0 %v5931_v28 }
 0x584   : > { %4435 = vmatprep.subr.mxu0 %v5938_v29 }
 0x585   : > { %4436 = vmatpush3.msra.mxu0 %v5938_v29 }
 0x586   : > { %4437 = vmatprep.subr.mxu0 %v5945_v30 }
 0x587   : > { %4438 = vmatpush3.msra.mxu0 %v5945_v30 }
 0x588   : > { %4439 = vmatprep.subr.mxu0 %v5952_v31 }
 0x589   : > { %4440 = vmatpush3.msra.mxu0 %v5952_v31 }
 0x58a   : > { %4441 = vmatprep.subr.mxu0 %v5959_v32 }
 0x58b   : > { %4442 = vmatpush3.msra.mxu0 %v5959_v32 }
 0x58c   : > { %4443 = vmatprep.subr.mxu0 %v5966_v33 }
 0x58d   : > { %4444 = vmatpush3.msra.mxu0 %v5966_v33 }
 0x58e   : > { %4445 = vmatprep.subr.mxu0 %v5973_v34 }
 0x58f   : > { %4446 = vmatpush3.msra.mxu0 %v5973_v34 }
 0x590   : > { %4447 = vmatprep.subr.mxu0 %v5980_v35 }
 0x591   : > { %4448 = vmatpush3.msra.mxu0 %v5980_v35 }
 0x592   : > { %4449 = vmatprep.subr.mxu0 %v5987_v36 }
 0x593   : > { %4450 = vmatpush3.msra.mxu0 %v5987_v36 }
 0x594   : > { %4451 = vmatprep.subr.mxu0 %v5994_v37 }
 0x595   : > { %4452 = vmatpush3.msra.mxu0 %v5994_v37 }
 0x596   : > { %4453 = vmatprep.subr.mxu0 %v6001_v39 }
 0x597   : > { %4454 = vmatpush3.msra.mxu0 %v6001_v39 }
 0x598   : > { %4455 = vmatprep.subr.mxu0 %v6008_v40 }
 0x599   : > { %4456 = vmatpush3.msra.mxu0 %v6008_v40 }
 0x59a   : > { %4457 = vmatprep.subr.mxu0 %v6015_v42 }
 0x59b   : > { %4458 = vmatpush3.msra.mxu0 %v6015_v42 }
 0x59c   : > { %4459 = vmatprep.subr.mxu0 %v6022_v44 }
 0x59d   : > { %4460 = vmatpush3.msra.mxu0 %v6022_v44 }
 0x59e   : > { %4499 = vmatprep.subr.mxu0 %v5763_v41 }
 0x61d   : > { %v1825_v47 = vpop.f32.mrf.mxu0 }
 0x61e   : > { %v1826_v54 = vadd.f32 %v1825_v47, %v1752_v48 }
 0x61f   : > { %v1827_v49 = vpop.f32.mrf.mxu0 }
 0x620   : > { %v1828_v46 = vadd.f32 %v1827_v49, %v1756_v13  ;;  %v6133_v49 = vld [vmem:[%s6755_s8 + $0x108] sm:$0xff] }
 0x621   : > { %v1831_v50 = vpop.f32.mrf.mxu0 }
 0x622   : > { %v1832_v51 = vadd.f32 %v1831_v50, %v1752_v48  ;;  %v4358_v53 = vpop.f32.mrf.mxu1  ;;  %v6126_v50 = vld [vmem:[%s6755_s8 + $0x110] sm:$0xff] }
 0x623   : > { %v1833_v8 = vpop.f32.mrf.mxu0 }
 0x624   : > { %v6031_v56 = vadd.f32 %v4358_v53, %v1832_v51  ;;  %v1930_v52 = vpop.f32.mrf.mxu1  ;;  %v1834_v26 = vadd.f32 %v1833_v8, %v1756_v13 }
 0x625   : > { %v6033_v55 = vadd.f32 %v1930_v52, %v1826_v54  ;;  %v6141_v52 = vld [vmem:[%s6755_s8 + $0x100] sm:$0xff] }
 0x627   : > { %4426 = vmatprep.mubr.f32.mxu1 %v6033_v55 }
 0x628   : > { %4427 = vmatmul.mubr.f32.vlgmr.msra.gmra.mxu1 %v6031_v56 }
 0x629   : > { %4465 = vmatpush3.msra.mxu1 %v5923_v27 }
 0x62a   : > { %4466 = vmatprep.subr.mxu1 %v6039_v57 }
 0x62b   : > { %4467 = vmatpush3.msra.mxu1 %v6039_v57 }
 0x62c   : > { %4468 = vmatprep.subr.mxu1 %v6046_v58 }
 0x62d   : > { %4469 = vmatpush3.msra.mxu1 %v6046_v58 }
 0x62e   : > { %4470 = vmatprep.subr.mxu1 %v6053_v0 }
 0x62f   : > { %4471 = vmatpush3.msra.mxu1 %v6053_v0 }
 0x630   : > { %4472 = vmatprep.subr.mxu1 %v6060_v11 }
 0x631   : > { %4473 = vmatpush3.msra.mxu1 %v6060_v11 }
 0x632   : > { %4474 = vmatprep.subr.mxu1 %v6067_v14 }
 0x633   : > { %4475 = vmatpush3.msra.mxu1 %v6067_v14 }
 0x634   : > { %4476 = vmatprep.subr.mxu1 %v6074_v61 }
 0x635   : > { %4477 = vmatpush3.msra.mxu1 %v6074_v61 }
 0x636   : > { %4478 = vmatprep.subr.mxu1 %v6081_v63 }
 0x637   : > { %4479 = vmatpush3.msra.mxu1 %v6081_v63 }
 0x638   : > { %4480 = vmatprep.subr.mxu1 %v6088_v2 }
 0x639   : > { %4481 = vmatpush3.msra.mxu1 %v6088_v2 }
 0x63a   : > { %4482 = vmatprep.subr.mxu1 %v6096_v6 }
 0x63b   : > { %4483 = vmatpush3.msra.mxu1 %v6096_v6 }
 0x63c   : > { %4484 = vmatprep.subr.mxu1 %v6103_v10 }
 0x63d   : > { %4485 = vmatpush3.msra.mxu1 %v6103_v10  ;;  %v4393_v25 = vpop.f32.mrf.mxu0 }
 0x63e   : > { %v6119_v47 = vadd.f32 %v4393_v25, %v1834_v26  ;;  %4486 = vmatprep.subr.mxu1 %v6110_v16 }
 0x63f   : > { %4487 = vmatpush3.msra.mxu1 %v6110_v16  ;;  %v2022_v48 = vpop.f32.mrf.mxu0 }
 0x640   : > { %v2032_v51 = vadd.f32 %v2022_v48, %v1828_v46  ;;  %4488 = vmatprep.subr.mxu1 %v6117_v45  ;;  %v2036_v53 = vrot.slane %v6119_v47, 7  ;;  %v6514_v48 = vld [vmem:[%s6757_s10 + $0x170] sm:$0xff] }
 0x641   : > { %4489 = vmatpush3.msra.mxu1 %v6117_v45 }
 0x642   : > { %v2035_v54 = vrot.slane %v2032_v51, 7  ;;  %4490 = vmatprep.subr.mxu1 %v6126_v50  ;;  %4496 = vmatprep.mubr.f32.mxu1 %v2032_v51 }
 0x643   : > { %4491 = vmatpush3.msra.mxu1 %v6126_v50 }
 0x644   : > { %4492 = vmatprep.subr.mxu1 %v6133_v49  ;;  %v2038_v4 = vsel %vm515_vm0, %v2036_v53, %v2035_v54  ;;  %v2037_v8 = vsel %vm515_vm0, %v2035_v54, %v2036_v53  ;;  %v6542_v53 = vld [vmem:[%s6757_s10 + $0x150] sm:$0xff]  ;;  %v6549_v54 = vld [vmem:[%s6757_s10 + $0x148] sm:$0xff] }
 0x645   : > { %4493 = vmatpush3.msra.mxu1 %v6133_v49  ;;  %4461 = vmatprep.mubr.msk.f32.mxu0 %vm1354_vm8, %v2038_v4  ;;  %v6563_v4 = vld [vmem:[%s6757_s10 + $0x138] sm:$0xff] }
 0x646   : > { %4494 = vmatprep.subr.mxu1 %v6141_v52  ;;  %4462 = vmatmul.mubr.f32.vlgmr.msra.gmra.mxu0 %v2037_v8  ;;  %v6570_v8 = vld [vmem:[%s6757_s10 + $0x130] sm:$0xff] }
 0x647   : > { %4495 = vmatpush3.msra.mxu1 %v6141_v52  ;;  %4500 = vmatpush3.msra.mxu0 %v5763_v41  ;;  %v2042_v41 = vrot.slane %v6031_v56, 1 }
 0x648   : > { %4497 = vmatmul.mubr.f32.vlgmr.msra.gmra.mxu1 %v6119_v47  ;;  %4501 = vmatprep.subr.mxu0 %v5797_v59 }
 0x649   : > { %4531 = vmatprep.mubr.f32.mxu0 %v2032_v51  ;;  %4534 = vmatprep.subr.mxu1 %v5909_v22  ;;  %v6528_v51 = vld [vmem:[%s6757_s10 + $0x160] sm:$0xff] }
 0x64a   : > { %4502 = vmatpush3.msra.mxu0 %v5797_v59  ;;  %4535 = vmatpush3.msra.mxu1 %v5909_v22  ;;  %v2041_v59 = vrot.slane %v6033_v55, 1  ;;  %v6355_v22 = vld [vmem:[%s6757_s10 + $0x98] sm:$0xff] }
 0x64b   : > { %4566 = vmatprep.mubr.f32.mxu1 %v6033_v55  ;;  %4503 = vmatprep.subr.mxu0 %v5803_v60  ;;  %v6480_v55 = vld [vmem:[%s6757_s10 + $0x10] sm:$0xff] }
 0x64c   : > { %4536 = vmatprep.subr.mxu1 %v5918_v23  ;;  %4504 = vmatpush3.msra.mxu0 %v5803_v60  ;;  %v2043_v60 = vsel %vm528_vm1, %v2041_v59, %v2042_v41 }
 0x64d   : > { %4537 = vmatpush3.msra.mxu1 %v5918_v23  ;;  %4505 = vmatprep.subr.mxu0 %v5810_v62  ;;  %v6362_v23 = vld [vmem:[%s6757_s10 + $0x90] sm:$0xff] }
 0x64e   : > { %4538 = vmatprep.subr.mxu1 %v5931_v28  ;;  %4506 = vmatpush3.msra.mxu0 %v5810_v62  ;;  %v6233_v62 = vld [vmem:[%s6757_s10 + $0xf8] sm:$0xff] }
 0x64f   : > { %4539 = vmatpush3.msra.mxu1 %v5931_v28  ;;  %4507 = vmatprep.subr.mxu0 %v5817_v1  ;;  %v6374_v28 = vld [vmem:[%s6757_s10 + $0x80] sm:$0xff] }
 0x650   : > { %4540 = vmatprep.subr.mxu1 %v5938_v29  ;;  %4508 = vmatpush3.msra.mxu0 %v5817_v1  ;;  %v6238_v1 = vld [vmem:[%s6757_s10 + $0xf0] sm:$0xff] }
 0x651   : > { %4541 = vmatpush3.msra.mxu1 %v5938_v29  ;;  %4509 = vmatprep.subr.mxu0 %v5824_v3  ;;  %v6383_v29 = vld [vmem:[%s6757_s10 + $0x178] sm:$0xff] }
 0x652   : > { %4542 = vmatprep.subr.mxu1 %v5945_v30  ;;  %4510 = vmatpush3.msra.mxu0 %v5824_v3  ;;  %v6247_v3 = vld [vmem:[%s6757_s10 + $0xe8] sm:$0xff] }
 0x653   : > { %4543 = vmatpush3.msra.mxu1 %v5945_v30  ;;  %4511 = vmatprep.subr.mxu0 %v5831_v5  ;;  %v6388_v30 = vld [vmem:[%s6757_s10 + $0x78] sm:$0xff] }
 0x654   : > { %4544 = vmatprep.subr.mxu1 %v5952_v31  ;;  %4512 = vmatpush3.msra.mxu0 %v5831_v5  ;;  %v6256_v5 = vld [vmem:[%s6757_s10 + $0xe0] sm:$0xff] }
 0x655   : > { %4545 = vmatpush3.msra.mxu1 %v5952_v31  ;;  %4513 = vmatprep.subr.mxu0 %v5838_v7  ;;  %v6395_v31 = vld [vmem:[%s6757_s10 + $0x70] sm:$0xff] }
 0x656   : > { %4546 = vmatprep.subr.mxu1 %v5959_v32  ;;  %4514 = vmatpush3.msra.mxu0 %v5838_v7  ;;  %v6265_v7 = vld [vmem:[%s6757_s10 + $0xd8] sm:$0xff] }
 0x657   : > { %4547 = vmatpush3.msra.mxu1 %v5959_v32  ;;  %4515 = vmatprep.subr.mxu0 %v5845_v9  ;;  %v6401_v32 = vld [vmem:[%s6757_s10 + $0x68] sm:$0xff] }
 0x658   : > { %4548 = vmatprep.subr.mxu1 %v5966_v33  ;;  %4516 = vmatpush3.msra.mxu0 %v5845_v9  ;;  %v6274_v9 = vld [vmem:[%s6757_s10 + $0xd0] sm:$0xff] }
 0x659   : > { %4549 = vmatpush3.msra.mxu1 %v5966_v33  ;;  %4517 = vmatprep.subr.mxu0 %v5852_v12  ;;  %v6408_v33 = vld [vmem:[%s6757_s10 + $0x60] sm:$0xff] }
 0x65a   : > { %4550 = vmatprep.subr.mxu1 %v5973_v34  ;;  %4518 = vmatpush3.msra.mxu0 %v5852_v12  ;;  %v6283_v12 = vld [vmem:[%s6757_s10 + $0xc8] sm:$0xff] }
 0x65b   : > { %4551 = vmatpush3.msra.mxu1 %v5973_v34  ;;  %4519 = vmatprep.subr.mxu0 %v5859_v15  ;;  %v6415_v34 = vld [vmem:[%s6757_s10 + $0x58] sm:$0xff] }
 0x65c   : > { %4552 = vmatprep.subr.mxu1 %v5980_v35  ;;  %4520 = vmatpush3.msra.mxu0 %v5859_v15  ;;  %v6292_v15 = vld [vmem:[%s6757_s10 + $0xc0] sm:$0xff] }
 0x65d   : > { %4553 = vmatpush3.msra.mxu1 %v5980_v35  ;;  %4521 = vmatprep.subr.mxu0 %v5866_v17  ;;  %v6422_v35 = vld [vmem:[%s6757_s10 + $0x50] sm:$0xff] }
 0x65e   : > { %4554 = vmatprep.subr.mxu1 %v5987_v36  ;;  %4522 = vmatpush3.msra.mxu0 %v5866_v17  ;;  %v6301_v17 = vld [vmem:[%s6757_s10 + $0xb8] sm:$0xff] }
 0x65f   : > { %4555 = vmatpush3.msra.mxu1 %v5987_v36  ;;  %4523 = vmatprep.subr.mxu0 %v5883_v18  ;;  %v6429_v36 = vld [vmem:[%s6757_s10 + $0x48] sm:$0xff] }
 0x660   : > { %4556 = vmatprep.subr.mxu1 %v5994_v37  ;;  %4524 = vmatpush3.msra.mxu0 %v5883_v18  ;;  %v6310_v18 = vld [vmem:[%s6757_s10 + $0xb0] sm:$0xff] }
 0x661   : > { %4557 = vmatpush3.msra.mxu1 %v5994_v37  ;;  %4525 = vmatprep.subr.mxu0 %v5890_v19  ;;  %v6436_v37 = vld [vmem:[%s6757_s10 + $0x40] sm:$0xff] }
 0x662   : > { %4558 = vmatprep.subr.mxu1 %v6001_v39  ;;  %4526 = vmatpush3.msra.mxu0 %v5890_v19  ;;  %v6332_v19 = vld [vmem:[%s6757_s10 + $0xa8] sm:$0xff] }
 0x663   : > { %4559 = vmatpush3.msra.mxu1 %v6001_v39  ;;  %4527 = vmatprep.subr.mxu0 %v5897_v20  ;;  %v6443_v39 = vld [vmem:[%s6757_s10 + $0x38] sm:$0xff] }
 0x664   : > { %4560 = vmatprep.subr.mxu1 %v6008_v40  ;;  %4528 = vmatpush3.msra.mxu0 %v5897_v20  ;;  %v2044_v20 = vsel %vm528_vm1, %v2042_v41, %v2041_v59  ;;  %v6577_v41 = vld [vmem:[%s6757_s10 + $0x128] sm:$0xff]  ;;  %v6584_v59 = vld [vmem:[%s6757_s10 + $0x120] sm:$0xff] }
 0x665   : > { %4561 = vmatpush3.msra.mxu1 %v6008_v40  ;;  %4529 = vmatprep.subr.mxu0 %v5904_v21  ;;  %v6450_v40 = vld [vmem:[%s6757_s10 + $0x30] sm:$0xff]  ;;  %6774 = vst [vmem:[#allocation6_spill] sm:$0xff] %v6584_v59 }
 0x666   : > { %4562 = vmatprep.subr.mxu1 %v6015_v42  ;;  %4530 = vmatpush3.msra.mxu0 %v5904_v21  ;;  %v6348_v21 = vld [vmem:[%s6757_s10 + $0xa0] sm:$0xff] }
 0x667   : > { %4563 = vmatpush3.msra.mxu1 %v6015_v42  ;;  %4532 = vmatmul.mubr.f32.vlgmr.msra.gmra.mxu0 %v6119_v47  ;;  %v6459_v42 = vld [vmem:[%s6757_s10 + $0x28] sm:$0xff] }
 0x668   : > { %4564 = vmatprep.subr.mxu1 %v6022_v44  ;;  %4569 = vmatprep.subr.mxu0 %v5923_v27 }
 0x669   : > { %4565 = vmatpush3.msra.mxu1 %v6022_v44  ;;  %4570 = vmatpush3.msra.mxu0 %v5923_v27  ;;  %v6367_v27 = vld [vmem:[%s6757_s10 + $0x88] sm:$0xff]  ;;  %v6466_v44 = vld [vmem:[%s6757_s10 + $0x20] sm:$0xff] }
 0x66a   : > { %4601 = vmatprep.mubr.f32.mxu0 %v2043_v60  ;;  %4567 = vmatmul.mubr.f32.vlgmr.msra.gmra.mxu1 %v6031_v56  ;;  %v6473_v56 = vld [vmem:[%s6757_s10 + $0x18] sm:$0xff] }
 0x66b   : > { %4571 = vmatprep.subr.mxu0 %v6039_v57  ;;  %4604 = vmatprep.subr.mxu1 %v6233_v62  ;;  %v6591_v60 = vld [vmem:[%s6757_s10 + $0x118] sm:$0xff] }
 0x66c   : > { %4572 = vmatpush3.msra.mxu0 %v6039_v57  ;;  %4605 = vmatpush3.msra.mxu1 %v6233_v62  ;;  %v6487_v57 = vld [vmem:[%s6757_s10 + $0x8] sm:$0xff]  ;;  %6775 = vst [vmem:[#allocation7_spill] sm:$0xff] %v6591_v60 }
 0x66d   : > { %4573 = vmatprep.subr.mxu0 %v6046_v58  ;;  %4606 = vmatprep.subr.mxu1 %v6238_v1 }
 0x66e   : > { %4574 = vmatpush3.msra.mxu0 %v6046_v58  ;;  %4607 = vmatpush3.msra.mxu1 %v6238_v1  ;;  %v6494_v58 = vld [vmem:[%s6757_s10] sm:$0xff] }
 0x66f   : > { %4575 = vmatprep.subr.mxu0 %v6053_v0  ;;  %4608 = vmatprep.subr.mxu1 %v6247_v3 }
 0x670   : > { %4576 = vmatpush3.msra.mxu0 %v6053_v0  ;;  %4609 = vmatpush3.msra.mxu1 %v6247_v3 }
 0x671   : > { %4577 = vmatprep.subr.mxu0 %v6060_v11  ;;  %4610 = vmatprep.subr.mxu1 %v6256_v5 }
 0x672   : > { %4578 = vmatpush3.msra.mxu0 %v6060_v11  ;;  %4611 = vmatpush3.msra.mxu1 %v6256_v5 }
 0x673   : > { %4579 = vmatprep.subr.mxu0 %v6067_v14  ;;  %4612 = vmatprep.subr.mxu1 %v6265_v7 }
 0x674   : > { %4580 = vmatpush3.msra.mxu0 %v6067_v14  ;;  %4613 = vmatpush3.msra.mxu1 %v6265_v7 }
 0x675   : > { %4581 = vmatprep.subr.mxu0 %v6074_v61  ;;  %4614 = vmatprep.subr.mxu1 %v6274_v9 }
 0x676   : > { %4582 = vmatpush3.msra.mxu0 %v6074_v61  ;;  %4615 = vmatpush3.msra.mxu1 %v6274_v9 }
 0x677   : > { %4583 = vmatprep.subr.mxu0 %v6081_v63  ;;  %4616 = vmatprep.subr.mxu1 %v6283_v12 }
 0x678   : > { %4584 = vmatpush3.msra.mxu0 %v6081_v63  ;;  %4617 = vmatpush3.msra.mxu1 %v6283_v12 }
 0x679   : > { %4585 = vmatprep.subr.mxu0 %v6088_v2  ;;  %4618 = vmatprep.subr.mxu1 %v6292_v15 }
 0x67a   : > { %4586 = vmatpush3.msra.mxu0 %v6088_v2  ;;  %4619 = vmatpush3.msra.mxu1 %v6292_v15 }
 0x67b   : > { %4587 = vmatprep.subr.mxu0 %v6096_v6  ;;  %4620 = vmatprep.subr.mxu1 %v6301_v17 }
 0x67c   : > { %4588 = vmatpush3.msra.mxu0 %v6096_v6  ;;  %4621 = vmatpush3.msra.mxu1 %v6301_v17  ;;  %v6502_v6 = vld [vmem:[%s6756_s9] ss:$0 sm:$0xff] }
 0x67d   : > { %4589 = vmatprep.subr.mxu0 %v6103_v10  ;;  %4622 = vmatprep.subr.mxu1 %v6310_v18 }
 0x67e   : > { %4590 = vmatpush3.msra.mxu0 %v6103_v10  ;;  %4623 = vmatpush3.msra.mxu1 %v6310_v18 }
 0x67f   : > { %4591 = vmatprep.subr.mxu0 %v6110_v16  ;;  %4624 = vmatprep.subr.mxu1 %v6332_v19 }
 0x680   : > { %4592 = vmatpush3.msra.mxu0 %v6110_v16  ;;  %4625 = vmatpush3.msra.mxu1 %v6332_v19 }
 0x681   : > { %4593 = vmatprep.subr.mxu0 %v6117_v45  ;;  %4626 = vmatprep.subr.mxu1 %v6348_v21 }
 0x682   : > { %4594 = vmatpush3.msra.mxu0 %v6117_v45  ;;  %4627 = vmatpush3.msra.mxu1 %v6348_v21 }
 0x683   : > { %4595 = vmatprep.subr.mxu0 %v6126_v50  ;;  %4628 = vmatprep.subr.mxu1 %v6355_v22 }
 0x684   : > { %4596 = vmatpush3.msra.mxu0 %v6126_v50  ;;  %4629 = vmatpush3.msra.mxu1 %v6355_v22  ;;  %v6521_v50 = vld [vmem:[%s6757_s10 + $0x168] sm:$0xff] }
 0x685   : > { %4597 = vmatprep.subr.mxu0 %v6133_v49  ;;  %4630 = vmatprep.subr.mxu1 %v6362_v23 }
 0x686   : > { %4598 = vmatpush3.msra.mxu0 %v6133_v49  ;;  %4631 = vmatpush3.msra.mxu1 %v6362_v23  ;;  %v6535_v49 = vld [vmem:[%s6757_s10 + $0x158] sm:$0xff] }
 0x687   : > { %4599 = vmatprep.subr.mxu0 %v6141_v52  ;;  %4632 = vmatprep.subr.mxu1 %v6367_v27 }
 0x688   : > { %4600 = vmatpush3.msra.mxu0 %v6141_v52  ;;  %4633 = vmatpush3.msra.mxu1 %v6367_v27  ;;  %v6556_v52 = vld [vmem:[%s6757_s10 + $0x140] sm:$0xff] }
 0x689   : > { %4602 = vmatmul.mubr.msk.f32.vlgmr.msra.gmra.mxu0 %vm1367_vm9, %v2044_v20  ;;  %4634 = vmatprep.subr.mxu1 %v6374_v28  ;;  %v6598_v20 = vld [vmem:[%s6757_s10 + $0x110] sm:$0xff] }
 0x68a   : > { %4635 = vmatpush3.msra.mxu1 %v6374_v28  ;;  %4639 = vmatprep.subr.mxu0 %v6388_v30  ;;  %6776 = vst [vmem:[#allocation8_spill] sm:$0xff] %v6598_v20 }
 0x68b   : > { %4674 = vmatprep.subr.mxu1 %v6383_v29  ;;  %4640 = vmatpush3.msra.mxu0 %v6388_v30 }
 0x68c   : > { %4641 = vmatprep.subr.mxu0 %v6395_v31 }
 0x68d   : > { %4642 = vmatpush3.msra.mxu0 %v6395_v31 }
 0x68e   : > { %4643 = vmatprep.subr.mxu0 %v6401_v32 }
 0x68f   : > { %4644 = vmatpush3.msra.mxu0 %v6401_v32 }
 0x690   : > { %4645 = vmatprep.subr.mxu0 %v6408_v33 }
 0x691   : > { %4646 = vmatpush3.msra.mxu0 %v6408_v33 }
 0x692   : > { %4647 = vmatprep.subr.mxu0 %v6415_v34 }
 0x693   : > { %4648 = vmatpush3.msra.mxu0 %v6415_v34 }
 0x694   : > { %4649 = vmatprep.subr.mxu0 %v6422_v35 }
 0x695   : > { %4650 = vmatpush3.msra.mxu0 %v6422_v35 }
 0x696   : > { %4651 = vmatprep.subr.mxu0 %v6429_v36 }
 0x697   : > { %4652 = vmatpush3.msra.mxu0 %v6429_v36 }
 0x698   : > { %4653 = vmatprep.subr.mxu0 %v6436_v37 }
 0x699   : > { %4654 = vmatpush3.msra.mxu0 %v6436_v37 }
 0x69a   : > { %4655 = vmatprep.subr.mxu0 %v6443_v39 }
 0x69b   : > { %4656 = vmatpush3.msra.mxu0 %v6443_v39 }
 0x69c   : > { %4657 = vmatprep.subr.mxu0 %v6450_v40 }
 0x69d   : > { %4658 = vmatpush3.msra.mxu0 %v6450_v40 }
 0x69e   : > { %4659 = vmatprep.subr.mxu0 %v6459_v42 }
 0x69f   : > { %4660 = vmatpush3.msra.mxu0 %v6459_v42 }
 0x6a0   : > { %4661 = vmatprep.subr.mxu0 %v6466_v44 }
 0x6a1   : > { %4662 = vmatpush3.msra.mxu0 %v6466_v44 }
 0x6a2   : > { %4663 = vmatprep.subr.mxu0 %v6473_v56 }
 0x6a3   : > { %4664 = vmatpush3.msra.mxu0 %v6473_v56 }
 0x6a4   : > { %4665 = vmatprep.subr.mxu0 %v6480_v55 }
 0x6a5   : > { %4666 = vmatpush3.msra.mxu0 %v6480_v55 }
 0x6a6   : > { %4667 = vmatprep.subr.mxu0 %v6487_v57 }
 0x6a7   : > { %4668 = vmatpush3.msra.mxu0 %v6487_v57 }
 0x6a8   : > { %4669 = vmatprep.subr.mxu0 %v6494_v58 }
 0x6a9   : > { %4670 = vmatpush3.msra.mxu0 %v6494_v58 }
 0x6aa   : > { %4709 = vmatprep.subr.mxu0 %v6233_v62 }
 0x6e8   : > { %v4428_v0 = vpop.f32.mrf.mxu1 }
 0x6ea   : > { %v2147_v11 = vpop.f32.mrf.mxu1 }
 0x706   : > { %v4463_v14 = vpop.f32.mrf.mxu0 }
 0x707   : > { %v2228_v61 = vadd.f32 %v4463_v14, %v4428_v0  ;;  %v6605_v0 = vld [vmem:[%s6757_s10 + $0x108] sm:$0xff] }
 0x708   : > { %v4498_v63 = vpop.f32.mrf.mxu1  ;;  %v2222_v2 = vpop.f32.mrf.mxu0  ;;  %6777 = vst [vmem:[#allocation9_spill] sm:$0xff] %v6605_v0 }
 0x709   : > { %v2324_v10 = vadd.f32 %v4498_v63, %v2228_v61  ;;  %v2223_v13 = vadd.f32 %v2222_v2, %v2147_v11  ;;  %v6612_v11 = vld [vmem:[%s6757_s10 + $0x100] sm:$0xff] }
 0x70a   : > { %v2314_v16 = vpop.f32.mrf.mxu1  ;;  %6778 = vst [vmem:[#allocation10_spill] sm:$0xff] %v6612_v11 }
 0x70b   : > { %v2323_v26 = vadd.f32 %v2314_v16, %v2223_v13  ;;  %v2332_v25 = vadd.f32 %v6502_v6, %v2324_v10 }
 0x70d   : > { %v2331_v45 = vadd.f32 %v6502_v6, %v2323_v26  ;;  %v6508_v47 = vmax.f32 %v2332_v25, 0.0 }
 0x70f   : > { %v6506_v46 = vmax.f32 %v2331_v45, 0.0  ;;  %v2573_v43 = vrot.slane %v6508_v47, 1 }
 0x711   : > { %4636 = vmatprep.mubr.f32.mxu1 %v6506_v46 }
 0x712   : > { %4637 = vmatmul.mubr.f32.vlgmr.msra.gmra.mxu1 %v6508_v47 }
 0x713   : > { %4675 = vmatpush3.msra.mxu1 %v6383_v29 }
 0x714   : > { %4676 = vmatprep.subr.mxu1 %v6514_v48 }
 0x715   : > { %4677 = vmatpush3.msra.mxu1 %v6514_v48 }
 0x716   : > { %4678 = vmatprep.subr.mxu1 %v6521_v50 }
 0x717   : > { %4679 = vmatpush3.msra.mxu1 %v6521_v50 }
 0x718   : > { %4680 = vmatprep.subr.mxu1 %v6528_v51 }
 0x719   : > { %4681 = vmatpush3.msra.mxu1 %v6528_v51 }
 0x71a   : > { %4682 = vmatprep.subr.mxu1 %v6535_v49 }
 0x71b   : > { %4683 = vmatpush3.msra.mxu1 %v6535_v49 }
 0x71c   : > { %4684 = vmatprep.subr.mxu1 %v6542_v53 }
 0x71d   : > { %4685 = vmatpush3.msra.mxu1 %v6542_v53 }
 0x71e   : > { %4686 = vmatprep.subr.mxu1 %v6549_v54 }
 0x71f   : > { %4687 = vmatpush3.msra.mxu1 %v6549_v54 }
 0x720   : > { %4688 = vmatprep.subr.mxu1 %v6556_v52 }
 0x721   : > { %4689 = vmatpush3.msra.mxu1 %v6556_v52 }
 0x722   : > { %4690 = vmatprep.subr.mxu1 %v6563_v4 }
 0x723   : > { %4691 = vmatpush3.msra.mxu1 %v6563_v4 }
 0x724   : > { %4692 = vmatprep.subr.mxu1 %v6570_v8 }
 0x725   : > { %4693 = vmatpush3.msra.mxu1 %v6570_v8 }
 0x726   : > { %4694 = vmatprep.subr.mxu1 %v6577_v41 }
 0x727   : > { %4695 = vmatpush3.msra.mxu1 %v6577_v41  ;;  %v4533_v14 = vpop.f32.mrf.mxu0 }
 0x728   : > { %4696 = vmatprep.subr.mxu1 %v6584_v59 }
 0x729   : > { %4697 = vmatpush3.msra.mxu1 %v6584_v59  ;;  %v2399_v63 = vpop.f32.mrf.mxu0 }
 0x72a   : > { %4698 = vmatprep.subr.mxu1 %v6591_v60  ;;  %v4568_v61 = vpop.f32.mrf.mxu1 }
 0x72b   : > { %4699 = vmatpush3.msra.mxu1 %v6591_v60  ;;  %v2480_v10 = vadd.f32 %v4568_v61, %v4533_v14 }
 0x72c   : > { %4700 = vmatprep.subr.mxu1 %v6598_v20  ;;  %v2474_v2 = vpop.f32.mrf.mxu1 }
 0x72d   : > { %4701 = vmatpush3.msra.mxu1 %v6598_v20  ;;  %v2475_v16 = vadd.f32 %v2474_v2, %v2399_v63 }
 0x72e   : > { %4702 = vmatprep.subr.mxu1 %v6605_v0 }
 0x72f   : > { %4703 = vmatpush3.msra.mxu1 %v6605_v0 }
 0x730   : > { %4704 = vmatprep.subr.mxu1 %v6612_v11 }
 0x731   : > { %4705 = vmatpush3.msra.mxu1 %v6612_v11 }
 0x732   : > { %4744 = vmatprep.subr.mxu1 %v6388_v30 }
 0x749   : > { %v4603_v13 = vpop.f32.mrf.mxu0 }
 0x74a   : > { %v2559_v26 = vadd.f32 %v4603_v13, %v2480_v10 }
 0x74b   : > { %v2549_v25 = vpop.f32.mrf.mxu0 }
 0x74c   : > { %v2561_v45 = vadd.f32 %v6502_v6, %v2559_v26  ;;  %v2558_v38 = vadd.f32 %v2549_v25, %v2475_v16 }
 0x74e   : > { %v6620_v20 = vmax.f32 %v2561_v45, 0.0  ;;  %v2560_v0 = vadd.f32 %v6502_v6, %v2558_v38  ;;  %v2572_v38 = vrot.slane %v6506_v46, 1 }
 0x750   : > { %v2564_v60 = vmax.f32 %v2560_v0, 0.0  ;;  %v2567_v11 = vrot.slane %v6620_v20, 7 }
 0x752   : > { %v2566_v59 = vrot.slane %v2564_v60, 7  ;;  %4706 = vmatprep.mubr.f32.mxu1 %v2564_v60 }
 0x753   : > { %4707 = vmatmul.mubr.f32.vlgmr.msra.gmra.mxu1 %v6620_v20 }
 0x754   : > { %4745 = vmatpush3.msra.mxu1 %v6388_v30  ;;  %4776 = vmatprep.mubr.f32.mxu1 %v6506_v46  ;;  %v2569_v14 = vsel %vm515_vm0, %v2567_v11, %v2566_v59  ;;  %v2568_v61 = vsel %vm515_vm0, %v2566_v59, %v2567_v11 }
 0x755   : > { %4746 = vmatprep.subr.mxu1 %v6395_v31  ;;  %4671 = vmatprep.mubr.msk.f32.mxu0 %vm1354_vm8, %v2569_v14 }
 0x756   : > { %4747 = vmatpush3.msra.mxu1 %v6395_v31  ;;  %4672 = vmatmul.mubr.f32.vlgmr.msra.gmra.mxu0 %v2568_v61 }
 0x757   : > { %4710 = vmatpush3.msra.mxu0 %v6233_v62  ;;  %4748 = vmatprep.subr.mxu1 %v6401_v32  ;;  %v2574_v62 = vsel %vm528_vm1, %v2572_v38, %v2573_v43 }
 0x758   : > { %4711 = vmatprep.subr.mxu0 %v6238_v1  ;;  %4741 = vmatprep.mubr.f32.mxu0 %v2564_v60 }
 0x759   : > { %4749 = vmatpush3.msra.mxu1 %v6401_v32  ;;  %4712 = vmatpush3.msra.mxu0 %v6238_v1  ;;  %v6779_v1 = vld [vmem:[#allocation6_spill] sm:$0xff] }
 0x75a   : > { %4750 = vmatprep.subr.mxu1 %v6408_v33  ;;  %4713 = vmatprep.subr.mxu0 %v6247_v3 }
 0x75b   : > { %4751 = vmatpush3.msra.mxu1 %v6408_v33  ;;  %4714 = vmatpush3.msra.mxu0 %v6247_v3  ;;  %v6780_v3 = vld [vmem:[#allocation7_spill] sm:$0xff] }
 0x75c   : > { %4752 = vmatprep.subr.mxu1 %v6415_v34  ;;  %4715 = vmatprep.subr.mxu0 %v6256_v5 }
 0x75d   : > { %4753 = vmatpush3.msra.mxu1 %v6415_v34  ;;  %4716 = vmatpush3.msra.mxu0 %v6256_v5  ;;  %v6781_v5 = vld [vmem:[#allocation8_spill] sm:$0xff] }
 0x75e   : > { %4754 = vmatprep.subr.mxu1 %v6422_v35  ;;  %4717 = vmatprep.subr.mxu0 %v6265_v7 }
 0x75f   : > { %4755 = vmatpush3.msra.mxu1 %v6422_v35  ;;  %4718 = vmatpush3.msra.mxu0 %v6265_v7  ;;  %v6782_v7 = vld [vmem:[#allocation9_spill] sm:$0xff] }
 0x760   : > { %4756 = vmatprep.subr.mxu1 %v6429_v36  ;;  %4719 = vmatprep.subr.mxu0 %v6274_v9 }
 0x761   : > { %4757 = vmatpush3.msra.mxu1 %v6429_v36  ;;  %4720 = vmatpush3.msra.mxu0 %v6274_v9  ;;  %v6783_v9 = vld [vmem:[#allocation10_spill] sm:$0xff] }
 0x762   : > { %4758 = vmatprep.subr.mxu1 %v6436_v37  ;;  %4721 = vmatprep.subr.mxu0 %v6283_v12 }
 0x763   : > { %4759 = vmatpush3.msra.mxu1 %v6436_v37  ;;  %4722 = vmatpush3.msra.mxu0 %v6283_v12  ;;  %v2575_v12 = vsel %vm528_vm1, %v2573_v43, %v2572_v38 }
 0x764   : > { %4760 = vmatprep.subr.mxu1 %v6443_v39  ;;  %4723 = vmatprep.subr.mxu0 %v6292_v15 }
 0x765   : > { %4761 = vmatpush3.msra.mxu1 %v6443_v39  ;;  %4724 = vmatpush3.msra.mxu0 %v6292_v15 }
 0x766   : > { %4762 = vmatprep.subr.mxu1 %v6450_v40  ;;  %4725 = vmatprep.subr.mxu0 %v6301_v17 }
 0x767   : > { %4763 = vmatpush3.msra.mxu1 %v6450_v40  ;;  %4726 = vmatpush3.msra.mxu0 %v6301_v17 }
 0x768   : > { %4764 = vmatprep.subr.mxu1 %v6459_v42  ;;  %4727 = vmatprep.subr.mxu0 %v6310_v18 }
 0x769   : > { %4765 = vmatpush3.msra.mxu1 %v6459_v42  ;;  %4728 = vmatpush3.msra.mxu0 %v6310_v18 }
 0x76a   : > { %4766 = vmatprep.subr.mxu1 %v6466_v44  ;;  %4729 = vmatprep.subr.mxu0 %v6332_v19 }
 0x76b   : > { %4767 = vmatpush3.msra.mxu1 %v6466_v44  ;;  %4730 = vmatpush3.msra.mxu0 %v6332_v19 }
 0x76c   : > { %4768 = vmatprep.subr.mxu1 %v6473_v56  ;;  %4731 = vmatprep.subr.mxu0 %v6348_v21 }
 0x76d   : > { %4769 = vmatpush3.msra.mxu1 %v6473_v56  ;;  %4732 = vmatpush3.msra.mxu0 %v6348_v21 }
 0x76e   : > { %4770 = vmatprep.subr.mxu1 %v6480_v55  ;;  %4733 = vmatprep.subr.mxu0 %v6355_v22 }
 0x76f   : > { %4771 = vmatpush3.msra.mxu1 %v6480_v55  ;;  %4734 = vmatpush3.msra.mxu0 %v6355_v22 }
 0x770   : > { %4772 = vmatprep.subr.mxu1 %v6487_v57  ;;  %4735 = vmatprep.subr.mxu0 %v6362_v23 }
 0x771   : > { %4773 = vmatpush3.msra.mxu1 %v6487_v57  ;;  %4736 = vmatpush3.msra.mxu0 %v6362_v23  ;;  %v3432_v23 = vld [vmem:[%s6758_s11] ss:$0 sm:$0xff] }
 0x772   : > { %4774 = vmatprep.subr.mxu1 %v6494_v58  ;;  %4737 = vmatprep.subr.mxu0 %v6367_v27 }
 0x773   : > { %4775 = vmatpush3.msra.mxu1 %v6494_v58  ;;  %4738 = vmatpush3.msra.mxu0 %v6367_v27 }
 0x774   : > { %4777 = vmatmul.mubr.f32.vlgmr.msra.gmra.mxu1 %v6508_v47  ;;  %4739 = vmatprep.subr.mxu0 %v6374_v28 }
 0x775   : > { %4740 = vmatpush3.msra.mxu0 %v6374_v28 }
 0x776   : > { %4742 = vmatmul.mubr.f32.vlgmr.msra.gmra.mxu0 %v6620_v20  ;;  %4779 = vmatprep.subr.mxu0 %v6383_v29 }
 0x777   : > { %4780 = vmatpush3.msra.mxu0 %v6383_v29  ;;  %4811 = vmatprep.mubr.f32.mxu0 %v2574_v62 }
 0x778   : > { %4781 = vmatprep.subr.mxu0 %v6514_v48 }
 0x779   : > { %4782 = vmatpush3.msra.mxu0 %v6514_v48 }
 0x77a   : > { %4783 = vmatprep.subr.mxu0 %v6521_v50 }
 0x77b   : > { %4784 = vmatpush3.msra.mxu0 %v6521_v50 }
 0x77c   : > { %4785 = vmatprep.subr.mxu0 %v6528_v51 }
 0x77d   : > { %4786 = vmatpush3.msra.mxu0 %v6528_v51 }
 0x77e   : > { %4787 = vmatprep.subr.mxu0 %v6535_v49 }
 0x77f   : > { %4788 = vmatpush3.msra.mxu0 %v6535_v49 }
 0x780   : > { %4789 = vmatprep.subr.mxu0 %v6542_v53 }
 0x781   : > { %4790 = vmatpush3.msra.mxu0 %v6542_v53 }
 0x782   : > { %4791 = vmatprep.subr.mxu0 %v6549_v54 }
 0x783   : > { %4792 = vmatpush3.msra.mxu0 %v6549_v54 }
 0x784   : > { %4793 = vmatprep.subr.mxu0 %v6556_v52 }
 0x785   : > { %4794 = vmatpush3.msra.mxu0 %v6556_v52 }
 0x786   : > { %4795 = vmatprep.subr.mxu0 %v6563_v4 }
 0x787   : > { %4796 = vmatpush3.msra.mxu0 %v6563_v4 }
 0x788   : > { %4797 = vmatprep.subr.mxu0 %v6570_v8 }
 0x789   : > { %4798 = vmatpush3.msra.mxu0 %v6570_v8 }
 0x78a   : > { %4799 = vmatprep.subr.mxu0 %v6577_v41 }
 0x78b   : > { %4800 = vmatpush3.msra.mxu0 %v6577_v41 }
 0x78c   : > { %4801 = vmatprep.subr.mxu0 %v6779_v1 }
 0x78d   : > { %4802 = vmatpush3.msra.mxu0 %v6779_v1 }
 0x78e   : > { %4803 = vmatprep.subr.mxu0 %v6780_v3 }
 0x78f   : > { %4804 = vmatpush3.msra.mxu0 %v6780_v3 }
 0x790   : > { %4805 = vmatprep.subr.mxu0 %v6781_v5 }
 0x791   : > { %4806 = vmatpush3.msra.mxu0 %v6781_v5 }
 0x792   : > { %4807 = vmatprep.subr.mxu0 %v6782_v7 }
 0x793   : > { %4808 = vmatpush3.msra.mxu0 %v6782_v7 }
 0x794   : > { %4809 = vmatprep.subr.mxu0 %v6783_v9 }
 0x795   : > { %4810 = vmatpush3.msra.mxu0 %v6783_v9 }
 0x796   : > { %4812 = vmatmul.mubr.msk.f32.vlgmr.msra.gmra.mxu0 %vm1367_vm9, %v2575_v12 }
 0x7d2   : > { %v4638_v17 = vpop.f32.mrf.mxu1 }
 0x7d4   : > { %v2678_v18 = vpop.f32.mrf.mxu1 }
 0x813   : > { %v4708_v19 = vpop.f32.mrf.mxu1 }
 0x815   : > { %v2845_v30 = vpop.f32.mrf.mxu1 }
 0x816   : > { %v4673_v21 = vpop.f32.mrf.mxu0 }
 0x817   : > { %v2759_v22 = vadd.f32 %v4673_v21, %v4638_v17 }
 0x818   : > { %v2753_v27 = vpop.f32.mrf.mxu0 }
 0x819   : > { %v2855_v28 = vadd.f32 %v4708_v19, %v2759_v22  ;;  %v2754_v29 = vadd.f32 %v2753_v27, %v2678_v18 }
 0x81b   : > { %v2863_v31 = vadd.f32 %v3432_v23, %v2855_v28  ;;  %v2854_v32 = vadd.f32 %v2845_v30, %v2754_v29 }
 0x81d   : > { %v2862_v24 = vadd.f32 %v3432_v23, %v2854_v32 }
 0x834   : > { %v4778_v34 = vpop.f32.mrf.mxu1 }
 0x836   : > { %v4743_v33 = vpop.f32.mrf.mxu0  ;;  %v3005_v36 = vpop.f32.mrf.mxu1 }
 0x837   : > { %v3011_v42 = vadd.f32 %v4778_v34, %v4743_v33 }
 0x838   : > { %v2930_v35 = vpop.f32.mrf.mxu0 }
 0x839   : > { %v3006_v39 = vadd.f32 %v3005_v36, %v2930_v35 }
 0x856   : > { %v4813_v37 = vpop.f32.mrf.mxu0 }
 0x857   : > { %v3090_v56 = vadd.f32 %v4813_v37, %v3011_v42 }
 0x858   : > { %v3080_v40 = vpop.f32.mrf.mxu0 }
 0x859   : > { %v3089_v44 = vadd.f32 %v3080_v40, %v3006_v39  ;;  %v3092_v57 = vadd.f32 %v3432_v23, %v3090_v56 }
 0x85b   : > { %v3091_v55 = vadd.f32 %v3432_v23, %v3089_v44 }
 0x85d   : > { %3095 = vrot.lane.b32.xlu0 %v3091_v55, %s4879_s14 }
 0x861   : > { %3097 = vrot.lane.b32.xlu0 %v3092_v57, %s4879_s14 }
 0x8cf   : > { %v3096_v58 = vpop.permute.xlu0 %3095 }
 0x8d0   : > { %v3102_v6 = vsel %vm3101_vm10, %v2862_v24, %v3096_v58 }
 0x8d1   : > { %3105 = vst.msk [vmem:[%s430_s17] sm:$0xff] %vm3104_vm11, %v3102_v6 }
 0x8d3   : > { %v3098_v46 = vpop.permute.xlu0 %3097 }
 0x8d4   : > { %v3103_v47 = vsel %vm3101_vm10, %v2863_v31, %v3098_v46 }
 0x8d5   : > { %3106 = vst.msk [vmem:[%s430_s17 + $0x8] sm:$0xff] %vm3104_vm11, %v3103_v47 }
 0x8d6 PF: > { %s23_s21 = sadd.s32 1, %s4873_s21  }
 0x8d7   : > { %p20_p1 = scmp.ge.s32.totalorder %s23_s21, 6  }
 0x8d9   :  { %22 = sbr.rel (!%p20_p1) target bundleno = 1 (0x1), region = 122 }
 0x8de   :  { %3129 = vsyncpa [#allocation3], 1 }
 0x8df   :  { %3131 = vsyncpa [#allocation3 + $0x1], 1 }

</bundles_post_ra>
